<compile_context>
chip_gen: v7x
topology: tpu7x:2x2x1
jax: 0.10.0
libtpu: 0.0.40
codegen_flags: <defaults>
</compile_context>

<pallas_src>
import functools
import math

import jax
import jax.numpy as jnp
from jax.experimental import pallas as pl
from jax.experimental.pallas import tpu as pltpu

# ----- model hyperparameters (small, consistent with the module) -----
N_LAYERS = 2
D_MODEL = 32
N_HEAD = 4
D_HEAD = D_MODEL // N_HEAD
FFN_HIDDEN = 4 * D_MODEL
LN_EPS = 1e-5

# bias + LayerNorm slab row indices (per layer); every row padded to FFN_HIDDEN lanes
_ROW_BQ_S, _ROW_BKV_S, _ROW_BO_S = 0, 1, 2
_ROW_BQ_C, _ROW_BKV_C, _ROW_BO_C = 3, 4, 5
_ROW_B1, _ROW_B2 = 6, 7
_ROW_G1, _ROW_BE1, _ROW_G2, _ROW_BE2 = 8, 9, 10, 11
_N_BLN_ROWS = 12


# ---------------------------------------------------------------------------
# In-kernel helpers
# ---------------------------------------------------------------------------
def _layernorm(x, gamma, beta):
    # One-pass statistics: mean and mean-of-squares together (var = E[x^2] - mu^2),
    # halving the XLU cross-lane reduce passes.
    mu = jnp.mean(x, axis=-1, keepdims=True)
    ms = jnp.mean(x * x, axis=-1, keepdims=True)
    var = ms - mu * mu
    return (x - mu) * jax.lax.rsqrt(var + LN_EPS) * gamma + beta


def _mha(xf, kvf, b, s_q, s_kv, w_q, w_kv, w_o, b_q, b_kv, b_o):
    """Multi-head attention on row-flattened activations.

    xf:   (b*s_q,  D)  query source
    kvf:  (b*s_kv, D)  key/value source
    w_q:  (D, D)   query projection, PRE-SCALED by 1/sqrt(d_head) on the host
    w_kv: (D, 2D)  fused [Wk | Wv] projection
    w_o:  (D, D)   output projection
    b_q:  (1, D) (pre-scaled), b_kv: (1, 2D), b_o: (1, D)
    """
    # Two fused projection matmuls instead of 12 per-head ones.
    q = jnp.dot(xf, w_q, preferred_element_type=jnp.float32) + b_q        # (b*s_q, D)
    kv = jnp.dot(kvf, w_kv, preferred_element_type=jnp.float32) + b_kv    # (b*s_kv, 2D)
    q3 = q.reshape(b, s_q, D_MODEL)
    kv3 = kv.reshape(b, s_kv, 2 * D_MODEL)

    head_outs = []
    for h in range(N_HEAD):  # heads = static 8-lane slices of the fused projections
        qh = q3[:, :, h * D_HEAD:(h + 1) * D_HEAD]                         # (b, s_q, dh)
        kh = kv3[:, :, h * D_HEAD:(h + 1) * D_HEAD]                        # (b, s_kv, dh)
        vh = kv3[:, :, D_MODEL + h * D_HEAD:D_MODEL + (h + 1) * D_HEAD]    # (b, s_kv, dh)

        s = jnp.einsum("bqd,bkd->bqk", qh, kh,
                       preferred_element_type=jnp.float32)                 # scale pre-folded
        s = s - jnp.max(s, axis=-1, keepdims=True)
        p = jnp.exp(s)
        p = p / jnp.sum(p, axis=-1, keepdims=True)                         # exact (tiny tensor)

        head_outs.append(jnp.einsum("bqk,bkd->bqd", p, vh,
                                    preferred_element_type=jnp.float32))

    # Lane-concat of head outputs (lanes 0-7, 8-15, ...), then ONE output projection.
    o = jnp.concatenate(head_outs, axis=-1).reshape(b * s_q, D_MODEL)
    return jnp.dot(o, w_o, preferred_element_type=jnp.float32) + b_o


def decoder_kernel(obj_ref, kv_ref, w_qo_ref, w_kv_ref, w1_ref, w2_ref, bln_ref,
                   x_ref, *, b, s_q, s_kv, n_layers):
    obj = obj_ref[...]          # (b*s_q,  D) object queries, row-flattened
    kvf = kv_ref[...]           # (b*s_kv, D) encoder memory, row-flattened

    # Decoder.forward: x starts as zeros_like(obj_queries).
    x = jnp.zeros_like(obj)

    D, D2, F = D_MODEL, 2 * D_MODEL, FFN_HIDDEN
    for layer in range(n_layers):          # static unroll; all weights VMEM-resident
        bln = bln_ref[layer]               # (12, FFN_HIDDEN) packed bias + LN slab
        g1, be1 = bln[_ROW_G1:_ROW_G1 + 1, :D], bln[_ROW_BE1:_ROW_BE1 + 1, :D]
        g2, be2 = bln[_ROW_G2:_ROW_G2 + 1, :D], bln[_ROW_BE2:_ROW_BE2 + 1, :D]

        # x = x + obj_queries
        x = x + obj

        # ---- self-attention + residual + norm1 (dropout == identity, eval) ----
        res = x
        x = _mha(x, x, b, s_q, s_q,
                 w_qo_ref[layer, 0, 0], w_kv_ref[layer, 0], w_qo_ref[layer, 0, 1],
                 bln[_ROW_BQ_S:_ROW_BQ_S + 1, :D],
                 bln[_ROW_BKV_S:_ROW_BKV_S + 1, :D2],
                 bln[_ROW_BO_S:_ROW_BO_S + 1, :D])
        x = _layernorm(x + res, g1, be1)

        # ---- cross-attention + residual + norm1 AGAIN (the PyTorch DecoderLayer
        #      reuses self.norm1 / self.dropout1 after cross attention) ----
        res = x
        x = _mha(x, kvf, b, s_q, s_kv,
                 w_qo_ref[layer, 1, 0], w_kv_ref[layer, 1], w_qo_ref[layer, 1, 1],
                 bln[_ROW_BQ_C:_ROW_BQ_C + 1, :D],
                 bln[_ROW_BKV_C:_ROW_BKV_C + 1, :D2],
                 bln[_ROW_BO_C:_ROW_BO_C + 1, :D])
        x = _layernorm(x + res, g1, be1)

        # ---- FFN + residual + norm2 ----
        # TODO(synk): FeedForward source was not provided; assuming Linear -> ReLU -> Linear.
        res = x
        hdn = jnp.maximum(
            jnp.dot(x, w1_ref[layer], preferred_element_type=jnp.float32)
            + bln[_ROW_B1:_ROW_B1 + 1, :F], 0.0)
        x = (jnp.dot(hdn, w2_ref[layer], preferred_element_type=jnp.float32)
             + bln[_ROW_B2:_ROW_B2 + 1, :D])
        x = _layernorm(x + res, g2, be2)

    x_ref[...] = x


# ---------------------------------------------------------------------------
# Host-side parameter packing (PyTorch layout -> 5 stacked, lane-dense slabs)
# ---------------------------------------------------------------------------
def _pack_params(layer_params):
    """Weight convention is y = x @ W (self-consistent with the synthetic init;
    real PyTorch nn.Linear checkpoints would need a transpose here)."""
    scale = 1.0 / math.sqrt(D_HEAD)

    def pad_row(v):
        v = v.reshape(-1)
        return jnp.pad(v, (0, FFN_HIDDEN - v.shape[0]))

    w_qo_l, w_kv_l, w1_l, w2_l, bln_l = [], [], [], [], []
    for p in layer_params:
        def att_pack(w, bv):
            # w: (4, D, D) = [q, k, v, out]; bv: (4, D)
            w_qo = jnp.stack([w[0] * scale, w[3]], axis=0)             # (2, D, D)
            w_kv = jnp.concatenate([w[1], w[2]], axis=1)               # (D, 2D)
            return w_qo, w_kv, bv[0] * scale, jnp.concatenate([bv[1], bv[2]]), bv[3]

        qo_s, kv_s, bq_s, bkv_s, bo_s = att_pack(p["w_self"], p["b_self"])
        qo_c, kv_c, bq_c, bkv_c, bo_c = att_pack(p["w_cross"], p["b_cross"])

        w_qo_l.append(jnp.stack([qo_s, qo_c], axis=0))                 # (2, 2, D, D)
        w_kv_l.append(jnp.stack([kv_s, kv_c], axis=0))                 # (2, D, 2D)
        w1_l.append(p["w1"])                                           # (D, 4D)
        w2_l.append(p["w2"])                                           # (4D, D)
        rows = [bq_s, bkv_s, bo_s, bq_c, bkv_c, bo_c,
                p["b1"], p["b2"],
                p["ln"][0], p["ln"][1], p["ln"][2], p["ln"][3]]
        bln_l.append(jnp.stack([pad_row(r) for r in rows], axis=0))    # (12, 4D)

    stack = lambda xs: jnp.stack(xs, axis=0).astype(jnp.float32)
    return (stack(w_qo_l), stack(w_kv_l), stack(w1_l), stack(w2_l), stack(bln_l))


def decoder_forward(obj_queries, kv, layer_params):
    B, S, D = obj_queries.shape
    L = kv.shape[1]
    n_layers = len(layer_params)

    w_qo, w_kv, w1, w2, bln = _pack_params(layer_params)

    # Row-flatten activations: every projection / FFN matmul is a plain 2-D MXU matmul.
    obj_f = obj_queries.reshape(B * S, D).astype(jnp.float32)
    kv_f = kv.reshape(B * L, D).astype(jnp.float32)

    def full_spec(shape):
        zeros = (0,) * len(shape)
        return pl.BlockSpec(shape, lambda i: zeros)   # whole array resident in VMEM

    kernel = functools.partial(decoder_kernel, b=B, s_q=S, s_kv=L, n_layers=n_layers)

    out = pl.pallas_call(
        kernel,
        out_shape=jax.ShapeDtypeStruct((B * S, D), jnp.float32),
        grid=(1,),  # single step: whole decoder fused, no per-layer grid overhead
        in_specs=[full_spec(obj_f.shape), full_spec(kv_f.shape),
                  full_spec(w_qo.shape), full_spec(w_kv.shape),
                  full_spec(w1.shape), full_spec(w2.shape), full_spec(bln.shape)],
        out_specs=full_spec((B * S, D)),
        compiler_params=pltpu.CompilerParams(dimension_semantics=("arbitrary",)),
    )(obj_f, kv_f, w_qo, w_kv, w1, w2, bln)

    return out.reshape(B, S, D)


# ---------------------------------------------------------------------------
# Pure-JAX reference (mirrors PyTorch math) for verification.
# ---------------------------------------------------------------------------
def _ref_attention(q_in, kv_in, w, bv):
    q = q_in @ w[0] + bv[0]
    k = kv_in @ w[1] + bv[1]
    v = kv_in @ w[2] + bv[2]
    B, S, _ = q.shape
    L = k.shape[1]
    qh = q.reshape(B, S, N_HEAD, D_HEAD).transpose(0, 2, 1, 3)
    kh = k.reshape(B, L, N_HEAD, D_HEAD).transpose(0, 2, 1, 3)
    vh = v.reshape(B, L, N_HEAD, D_HEAD).transpose(0, 2, 1, 3)
    s = jnp.einsum("bhqd,bhkd->bhqk", qh, kh) / math.sqrt(D_HEAD)
    p = jax.nn.softmax(s, axis=-1)
    o = jnp.einsum("bhqk,bhkd->bhqd", p, vh)
    o = o.transpose(0, 2, 1, 3).reshape(B, S, N_HEAD * D_HEAD)
    return o @ w[3] + bv[3]


def _ref_layernorm(x, gamma, beta):
    mu = jnp.mean(x, axis=-1, keepdims=True)
    var = jnp.mean((x - mu) ** 2, axis=-1, keepdims=True)
    return (x - mu) * jax.lax.rsqrt(var + LN_EPS) * gamma + beta


def _ref_layer(x, kv, p):
    res = x
    x = _ref_attention(x, x, p["w_self"], p["b_self"])
    x = _ref_layernorm(x + res, p["ln"][0], p["ln"][1])
    res = x
    x = _ref_attention(x, kv, p["w_cross"], p["b_cross"])
    x = _ref_layernorm(x + res, p["ln"][0], p["ln"][1])
    res = x
    x = jnp.maximum(x @ p["w1"] + p["b1"][0], 0.0) @ p["w2"] + p["b2"][0]
    x = _ref_layernorm(x + res, p["ln"][2], p["ln"][3])
    return x


def _ref_decoder(obj_queries, kv, layer_params):
    x = jnp.zeros_like(obj_queries, dtype=jnp.float32)
    for p in layer_params:
        x = x + obj_queries
        x = _ref_layer(x, kv, p)
    return x


# ---------------------------------------------------------------------------
# Deterministic synthetic parameter init (PyTorch-style layout, y = x @ W).
# LayerNorm gamma/beta randomized (instead of 1/0) so their wiring is verified.
# ---------------------------------------------------------------------------
def init_layer_params(key, d_model, ffn_hidden):
    ks = jax.random.split(key, 10)
    bound = 1.0 / math.sqrt(d_model)
    bound_h = 1.0 / math.sqrt(ffn_hidden)
    u = lambda k, shape, b: jax.random.uniform(k, shape, jnp.float32, -b, b)
    gamma = jax.random.uniform(ks[8], (2, d_model), jnp.float32, 0.5, 1.5)
    beta = jax.random.uniform(ks[9], (2, d_model), jnp.float32, -0.5, 0.5)
    ln = jnp.stack([gamma[0], beta[0], gamma[1], beta[1]], axis=0)  # [g1, b1, g2, b2]
    return {
        "w_self": u(ks[0], (4, d_model, d_model), bound),
        "b_self": u(ks[1], (4, d_model), bound),
        "w_cross": u(ks[2], (4, d_model, d_model), bound),
        "b_cross": u(ks[3], (4, d_model), bound),
        "ln": ln,
        "w1": u(ks[4], (d_model, ffn_hidden), bound),
        "b1": u(ks[5], (1, ffn_hidden), bound),
        "w2": u(ks[6], (ffn_hidden, d_model), bound_h),
        "b2": u(ks[7], (1, d_model), bound_h),
    }


if __name__ == "__main__":
    key = jax.random.PRNGKey(0)
    k_q, k_kv, k_p = jax.random.split(key, 3)

    B, S, L = 2, 8, 16  # batch, num object queries, encoder-memory length
    obj_queries = jax.random.normal(k_q, (B, S, D_MODEL), jnp.float32)
    kv = jax.random.normal(k_kv, (B, L, D_MODEL), jnp.float32)

    layer_keys = jax.random.split(k_p, N_LAYERS)
    layer_params = [init_layer_params(k, D_MODEL, FFN_HIDDEN) for k in layer_keys]

    out = jax.block_until_ready(decoder_forward(obj_queries, kv, layer_params))
    ref = jax.block_until_ready(_ref_decoder(obj_queries, kv, layer_params))

    assert out.shape == (B, S, D_MODEL) and out.dtype == jnp.float32
    # Exact softmax reciprocal restored -> tight tolerance (covers EUP exp / one-pass
    # LayerNorm variance rounding differences only; wiring bugs would be O(1)).
    err = float(jnp.max(jnp.abs(out - ref)))
    assert jnp.allclose(out, ref, rtol=1e-3, atol=1e-3), f"mismatch vs ref, max|diff|={err}"
    print("KERNEL_OK")
</pallas_src>

<mosaic_0001>
module attributes {stable_mosaic.version = 11 : i64} {
  func.func @decoder_kernel(%arg0: i32, %arg1: memref<16x32xf32, #tpu.memory_space<vmem>>, %arg2: memref<32x32xf32, #tpu.memory_space<vmem>>, %arg3: memref<2x2x2x32x32xf32, #tpu.memory_space<vmem>>, %arg4: memref<2x2x32x64xf32, #tpu.memory_space<vmem>>, %arg5: memref<2x32x128xf32, #tpu.memory_space<vmem>>, %arg6: memref<2x128x32xf32, #tpu.memory_space<vmem>>, %arg7: memref<2x12x128xf32, #tpu.memory_space<vmem>>, %arg8: memref<16x32xf32, #tpu.memory_space<vmem>>) attributes {dimension_semantics = [#tpu.dimension_semantics<arbitrary>], iteration_bounds = array<i64: 1>, scalar_prefetch = 0 : i64, scratch_operands = 0 : i64, tpu.core_type = #tpu.core_type<tc>, window_params = [{pipeline_mode = #tpu.pipeline_mode<synchronous>, transform_indices = @transform_0, window_bounds = array<i64: 16, 32>}, {pipeline_mode = #tpu.pipeline_mode<synchronous>, transform_indices = @transform_1, window_bounds = array<i64: 32, 32>}, {pipeline_mode = #tpu.pipeline_mode<synchronous>, transform_indices = @transform_2, window_bounds = array<i64: 2, 2, 2, 32, 32>}, {pipeline_mode = #tpu.pipeline_mode<synchronous>, transform_indices = @transform_3, window_bounds = array<i64: 2, 2, 32, 64>}, {pipeline_mode = #tpu.pipeline_mode<synchronous>, transform_indices = @transform_4, window_bounds = array<i64: 2, 32, 128>}, {pipeline_mode = #tpu.pipeline_mode<synchronous>, transform_indices = @transform_5, window_bounds = array<i64: 2, 128, 32>}, {pipeline_mode = #tpu.pipeline_mode<synchronous>, transform_indices = @transform_6, window_bounds = array<i64: 2, 12, 128>}, {pipeline_mode = #tpu.pipeline_mode<synchronous>, transform_indices = @transform_7, window_bounds = array<i64: 16, 32>}]} {
    %c0 = arith.constant 0 : index
    %c0_0 = arith.constant 0 : index
    %0 = vector.load %arg1[%c0, %c0_0] : memref<16x32xf32, #tpu.memory_space<vmem>>, vector<16x32xf32>
    %c0_1 = arith.constant 0 : index
    %c0_2 = arith.constant 0 : index
    %1 = vector.load %arg2[%c0_1, %c0_2] : memref<32x32xf32, #tpu.memory_space<vmem>>, vector<32x32xf32>
    %cst = arith.constant 0.000000e+00 : f32
    %2 = vector.broadcast %cst : f32 to vector<16x32xf32>
    %c0_3 = arith.constant 0 : index
    %c0_4 = arith.constant 0 : index
    %c0_5 = arith.constant 0 : index
    %3 = vector.load %arg7[%c0_3, %c0_4, %c0_5] : memref<2x12x128xf32, #tpu.memory_space<vmem>>, vector<1x12x128xf32>
    %4 = vector.shape_cast %3 : vector<1x12x128xf32> to vector<12x128xf32>
    %5 = vector.extract_strided_slice %4 {offsets = [8, 0], sizes = [1, 32], strides = [1, 1]} : vector<12x128xf32> to vector<1x32xf32>
    %6 = vector.extract_strided_slice %4 {offsets = [9, 0], sizes = [1, 32], strides = [1, 1]} : vector<12x128xf32> to vector<1x32xf32>
    %7 = vector.extract_strided_slice %4 {offsets = [10, 0], sizes = [1, 32], strides = [1, 1]} : vector<12x128xf32> to vector<1x32xf32>
    %8 = vector.extract_strided_slice %4 {offsets = [11, 0], sizes = [1, 32], strides = [1, 1]} : vector<12x128xf32> to vector<1x32xf32>
    %9 = arith.addf %2, %0 : vector<16x32xf32>
    %c0_6 = arith.constant 0 : index
    %c0_7 = arith.constant 0 : index
    %c0_8 = arith.constant 0 : index
    %c0_9 = arith.constant 0 : index
    %c0_10 = arith.constant 0 : index
    %10 = vector.load %arg3[%c0_6, %c0_7, %c0_8, %c0_9, %c0_10] : memref<2x2x2x32x32xf32, #tpu.memory_space<vmem>>, vector<1x1x1x32x32xf32>
    %11 = vector.shape_cast %10 : vector<1x1x1x32x32xf32> to vector<32x32xf32>
    %c0_11 = arith.constant 0 : index
    %c0_12 = arith.constant 0 : index
    %c0_13 = arith.constant 0 : index
    %c0_14 = arith.constant 0 : index
    %12 = vector.load %arg4[%c0_11, %c0_12, %c0_13, %c0_14] : memref<2x2x32x64xf32, #tpu.memory_space<vmem>>, vector<1x1x32x64xf32>
    %13 = vector.shape_cast %12 : vector<1x1x32x64xf32> to vector<32x64xf32>
    %c0_15 = arith.constant 0 : index
    %c0_16 = arith.constant 0 : index
    %c1 = arith.constant 1 : index
    %c0_17 = arith.constant 0 : index
    %c0_18 = arith.constant 0 : index
    %14 = vector.load %arg3[%c0_15, %c0_16, %c1, %c0_17, %c0_18] : memref<2x2x2x32x32xf32, #tpu.memory_space<vmem>>, vector<1x1x1x32x32xf32>
    %15 = vector.shape_cast %14 : vector<1x1x1x32x32xf32> to vector<32x32xf32>
    %16 = vector.extract_strided_slice %4 {offsets = [0, 0], sizes = [1, 32], strides = [1, 1]} : vector<12x128xf32> to vector<1x32xf32>
    %17 = vector.extract_strided_slice %4 {offsets = [1, 0], sizes = [1, 64], strides = [1, 1]} : vector<12x128xf32> to vector<1x64xf32>
    %18 = vector.extract_strided_slice %4 {offsets = [2, 0], sizes = [1, 32], strides = [1, 1]} : vector<12x128xf32> to vector<1x32xf32>
    %cst_19 = arith.constant dense<0.000000e+00> : vector<16x32xf32>
    %19 = tpu.matmul %9, %11, %cst_19 {dimension_numbers = #tpu.dot_dimension_numbers<[1], [0], [0], [1], [0, 0, 1, 1], [], []>} : vector<16x32xf32>, vector<32x32xf32>, vector<16x32xf32> -> vector<16x32xf32>
    %20 = vector.broadcast %16 : vector<1x32xf32> to vector<16x32xf32>
    %21 = arith.addf %19, %20 : vector<16x32xf32>
    %cst_20 = arith.constant dense<0.000000e+00> : vector<16x64xf32>
    %22 = tpu.matmul %9, %13, %cst_20 {dimension_numbers = #tpu.dot_dimension_numbers<[1], [0], [0], [1], [0, 0, 1, 1], [], []>} : vector<16x32xf32>, vector<32x64xf32>, vector<16x64xf32> -> vector<16x64xf32>
    %23 = vector.broadcast %17 : vector<1x64xf32> to vector<16x64xf32>
    %24 = arith.addf %22, %23 : vector<16x64xf32>
    %25 = vector.shape_cast %21 : vector<16x32xf32> to vector<2x8x32xf32>
    %26 = vector.shape_cast %24 : vector<16x64xf32> to vector<2x8x64xf32>
    %27 = vector.extract_strided_slice %25 {offsets = [0, 0, 0], sizes = [2, 8, 8], strides = [1, 1, 1]} : vector<2x8x32xf32> to vector<2x8x8xf32>
    %28 = vector.extract_strided_slice %26 {offsets = [0, 0, 0], sizes = [2, 8, 8], strides = [1, 1, 1]} : vector<2x8x64xf32> to vector<2x8x8xf32>
    %29 = vector.extract_strided_slice %26 {offsets = [0, 0, 32], sizes = [2, 8, 8], strides = [1, 1, 1]} : vector<2x8x64xf32> to vector<2x8x8xf32>
    "tpu.trace_start"() <{level = 10 : i32, message = "bqd,bkd->bqk"}> : () -> ()
    %cst_21 = arith.constant dense<0.000000e+00> : vector<2x8x8xf32>
    %30 = tpu.matmul %27, %28, %cst_21 {dimension_numbers = #tpu.dot_dimension_numbers<[2], [2], [1], [1], [0, 0, 0, 1, 1, 1], [0], [0]>} : vector<2x8x8xf32>, vector<2x8x8xf32>, vector<2x8x8xf32> -> vector<2x8x8xf32>
    "tpu.trace_stop"() : () -> ()
    %cst_22 = arith.constant dense<0xFF800000> : vector<2x8xf32>
    %31 = vector.multi_reduction <maximumf>, %30, %cst_22 [2] : vector<2x8x8xf32> to vector<2x8xf32>
    %32 = vector.shape_cast %31 : vector<2x8xf32> to vector<2x8x1xf32>
    %33 = vector.broadcast %32 : vector<2x8x1xf32> to vector<2x8x8xf32>
    %34 = arith.subf %30, %33 : vector<2x8x8xf32>
    %35 = math.exp %34 : vector<2x8x8xf32>
    %cst_23 = arith.constant dense<0.000000e+00> : vector<2x8xf32>
    %36 = vector.multi_reduction <add>, %35, %cst_23 [2] : vector<2x8x8xf32> to vector<2x8xf32>
    %37 = vector.shape_cast %36 : vector<2x8xf32> to vector<2x8x1xf32>
    %38 = vector.broadcast %37 : vector<2x8x1xf32> to vector<2x8x8xf32>
    %39 = arith.divf %35, %38 : vector<2x8x8xf32>
    "tpu.trace_start"() <{level = 10 : i32, message = "bqk,bkd->bqd"}> : () -> ()
    %cst_24 = arith.constant dense<0.000000e+00> : vector<2x8x8xf32>
    %40 = tpu.matmul %39, %29, %cst_24 {dimension_numbers = #tpu.dot_dimension_numbers<[2], [1], [1], [2], [0, 0, 0, 1, 1, 2], [0], [0]>} : vector<2x8x8xf32>, vector<2x8x8xf32>, vector<2x8x8xf32> -> vector<2x8x8xf32>
    "tpu.trace_stop"() : () -> ()
    %41 = vector.extract_strided_slice %25 {offsets = [0, 0, 8], sizes = [2, 8, 8], strides = [1, 1, 1]} : vector<2x8x32xf32> to vector<2x8x8xf32>
    %42 = vector.extract_strided_slice %26 {offsets = [0, 0, 8], sizes = [2, 8, 8], strides = [1, 1, 1]} : vector<2x8x64xf32> to vector<2x8x8xf32>
    %43 = vector.extract_strided_slice %26 {offsets = [0, 0, 40], sizes = [2, 8, 8], strides = [1, 1, 1]} : vector<2x8x64xf32> to vector<2x8x8xf32>
    "tpu.trace_start"() <{level = 10 : i32, message = "bqd,bkd->bqk"}> : () -> ()
    %cst_25 = arith.constant dense<0.000000e+00> : vector<2x8x8xf32>
    %44 = tpu.matmul %41, %42, %cst_25 {dimension_numbers = #tpu.dot_dimension_numbers<[2], [2], [1], [1], [0, 0, 0, 1, 1, 1], [0], [0]>} : vector<2x8x8xf32>, vector<2x8x8xf32>, vector<2x8x8xf32> -> vector<2x8x8xf32>
    "tpu.trace_stop"() : () -> ()
    %cst_26 = arith.constant dense<0xFF800000> : vector<2x8xf32>
    %45 = vector.multi_reduction <maximumf>, %44, %cst_26 [2] : vector<2x8x8xf32> to vector<2x8xf32>
    %46 = vector.shape_cast %45 : vector<2x8xf32> to vector<2x8x1xf32>
    %47 = vector.broadcast %46 : vector<2x8x1xf32> to vector<2x8x8xf32>
    %48 = arith.subf %44, %47 : vector<2x8x8xf32>
    %49 = math.exp %48 : vector<2x8x8xf32>
    %cst_27 = arith.constant dense<0.000000e+00> : vector<2x8xf32>
    %50 = vector.multi_reduction <add>, %49, %cst_27 [2] : vector<2x8x8xf32> to vector<2x8xf32>
    %51 = vector.shape_cast %50 : vector<2x8xf32> to vector<2x8x1xf32>
    %52 = vector.broadcast %51 : vector<2x8x1xf32> to vector<2x8x8xf32>
    %53 = arith.divf %49, %52 : vector<2x8x8xf32>
    "tpu.trace_start"() <{level = 10 : i32, message = "bqk,bkd->bqd"}> : () -> ()
    %cst_28 = arith.constant dense<0.000000e+00> : vector<2x8x8xf32>
    %54 = tpu.matmul %53, %43, %cst_28 {dimension_numbers = #tpu.dot_dimension_numbers<[2], [1], [1], [2], [0, 0, 0, 1, 1, 2], [0], [0]>} : vector<2x8x8xf32>, vector<2x8x8xf32>, vector<2x8x8xf32> -> vector<2x8x8xf32>
    "tpu.trace_stop"() : () -> ()
    %55 = vector.extract_strided_slice %25 {offsets = [0, 0, 16], sizes = [2, 8, 8], strides = [1, 1, 1]} : vector<2x8x32xf32> to vector<2x8x8xf32>
    %56 = vector.extract_strided_slice %26 {offsets = [0, 0, 16], sizes = [2, 8, 8], strides = [1, 1, 1]} : vector<2x8x64xf32> to vector<2x8x8xf32>
    %57 = vector.extract_strided_slice %26 {offsets = [0, 0, 48], sizes = [2, 8, 8], strides = [1, 1, 1]} : vector<2x8x64xf32> to vector<2x8x8xf32>
    "tpu.trace_start"() <{level = 10 : i32, message = "bqd,bkd->bqk"}> : () -> ()
    %cst_29 = arith.constant dense<0.000000e+00> : vector<2x8x8xf32>
    %58 = tpu.matmul %55, %56, %cst_29 {dimension_numbers = #tpu.dot_dimension_numbers<[2], [2], [1], [1], [0, 0, 0, 1, 1, 1], [0], [0]>} : vector<2x8x8xf32>, vector<2x8x8xf32>, vector<2x8x8xf32> -> vector<2x8x8xf32>
    "tpu.trace_stop"() : () -> ()
    %cst_30 = arith.constant dense<0xFF800000> : vector<2x8xf32>
    %59 = vector.multi_reduction <maximumf>, %58, %cst_30 [2] : vector<2x8x8xf32> to vector<2x8xf32>
    %60 = vector.shape_cast %59 : vector<2x8xf32> to vector<2x8x1xf32>
    %61 = vector.broadcast %60 : vector<2x8x1xf32> to vector<2x8x8xf32>
    %62 = arith.subf %58, %61 : vector<2x8x8xf32>
    %63 = math.exp %62 : vector<2x8x8xf32>
    %cst_31 = arith.constant dense<0.000000e+00> : vector<2x8xf32>
    %64 = vector.multi_reduction <add>, %63, %cst_31 [2] : vector<2x8x8xf32> to vector<2x8xf32>
    %65 = vector.shape_cast %64 : vector<2x8xf32> to vector<2x8x1xf32>
    %66 = vector.broadcast %65 : vector<2x8x1xf32> to vector<2x8x8xf32>
    %67 = arith.divf %63, %66 : vector<2x8x8xf32>
    "tpu.trace_start"() <{level = 10 : i32, message = "bqk,bkd->bqd"}> : () -> ()
    %cst_32 = arith.constant dense<0.000000e+00> : vector<2x8x8xf32>
    %68 = tpu.matmul %67, %57, %cst_32 {dimension_numbers = #tpu.dot_dimension_numbers<[2], [1], [1], [2], [0, 0, 0, 1, 1, 2], [0], [0]>} : vector<2x8x8xf32>, vector<2x8x8xf32>, vector<2x8x8xf32> -> vector<2x8x8xf32>
    "tpu.trace_stop"() : () -> ()
    %69 = vector.extract_strided_slice %25 {offsets = [0, 0, 24], sizes = [2, 8, 8], strides = [1, 1, 1]} : vector<2x8x32xf32> to vector<2x8x8xf32>
    %70 = vector.extract_strided_slice %26 {offsets = [0, 0, 24], sizes = [2, 8, 8], strides = [1, 1, 1]} : vector<2x8x64xf32> to vector<2x8x8xf32>
    %71 = vector.extract_strided_slice %26 {offsets = [0, 0, 56], sizes = [2, 8, 8], strides = [1, 1, 1]} : vector<2x8x64xf32> to vector<2x8x8xf32>
    "tpu.trace_start"() <{level = 10 : i32, message = "bqd,bkd->bqk"}> : () -> ()
    %cst_33 = arith.constant dense<0.000000e+00> : vector<2x8x8xf32>
    %72 = tpu.matmul %69, %70, %cst_33 {dimension_numbers = #tpu.dot_dimension_numbers<[2], [2], [1], [1], [0, 0, 0, 1, 1, 1], [0], [0]>} : vector<2x8x8xf32>, vector<2x8x8xf32>, vector<2x8x8xf32> -> vector<2x8x8xf32>
    "tpu.trace_stop"() : () -> ()
    %cst_34 = arith.constant dense<0xFF800000> : vector<2x8xf32>
    %73 = vector.multi_reduction <maximumf>, %72, %cst_34 [2] : vector<2x8x8xf32> to vector<2x8xf32>
    %74 = vector.shape_cast %73 : vector<2x8xf32> to vector<2x8x1xf32>
    %75 = vector.broadcast %74 : vector<2x8x1xf32> to vector<2x8x8xf32>
    %76 = arith.subf %72, %75 : vector<2x8x8xf32>
    %77 = math.exp %76 : vector<2x8x8xf32>
    %cst_35 = arith.constant dense<0.000000e+00> : vector<2x8xf32>
    %78 = vector.multi_reduction <add>, %77, %cst_35 [2] : vector<2x8x8xf32> to vector<2x8xf32>
    %79 = vector.shape_cast %78 : vector<2x8xf32> to vector<2x8x1xf32>
    %80 = vector.broadcast %79 : vector<2x8x1xf32> to vector<2x8x8xf32>
    %81 = arith.divf %77, %80 : vector<2x8x8xf32>
    "tpu.trace_start"() <{level = 10 : i32, message = "bqk,bkd->bqd"}> : () -> ()
    %cst_36 = arith.constant dense<0.000000e+00> : vector<2x8x8xf32>
    %82 = tpu.matmul %81, %71, %cst_36 {dimension_numbers = #tpu.dot_dimension_numbers<[2], [1], [1], [2], [0, 0, 0, 1, 1, 2], [0], [0]>} : vector<2x8x8xf32>, vector<2x8x8xf32>, vector<2x8x8xf32> -> vector<2x8x8xf32>
    "tpu.trace_stop"() : () -> ()
    %83 = tpu.concatenate %40, %54, %68, %82 in 2 : vector<2x8x8xf32>, vector<2x8x8xf32>, vector<2x8x8xf32>, vector<2x8x8xf32> -> vector<2x8x32xf32>
    %84 = vector.shape_cast %83 : vector<2x8x32xf32> to vector<16x32xf32>
    %cst_37 = arith.constant dense<0.000000e+00> : vector<16x32xf32>
    %85 = tpu.matmul %84, %15, %cst_37 {dimension_numbers = #tpu.dot_dimension_numbers<[1], [0], [0], [1], [0, 0, 1, 1], [], []>} : vector<16x32xf32>, vector<32x32xf32>, vector<16x32xf32> -> vector<16x32xf32>
    %86 = vector.broadcast %18 : vector<1x32xf32> to vector<16x32xf32>
    %87 = arith.addf %85, %86 : vector<16x32xf32>
    %88 = arith.addf %87, %9 : vector<16x32xf32>
    %cst_38 = arith.constant dense<0.000000e+00> : vector<16xf32>
    %89 = vector.multi_reduction <add>, %88, %cst_38 [1] : vector<16x32xf32> to vector<16xf32>
    %90 = vector.shape_cast %89 : vector<16xf32> to vector<16x1xf32>
    %cst_39 = arith.constant 3.200000e+01 : f32
    %91 = vector.broadcast %cst_39 : f32 to vector<16x1xf32>
    %92 = arith.divf %90, %91 : vector<16x1xf32>
    %93 = arith.mulf %88, %88 : vector<16x32xf32>
    %cst_40 = arith.constant dense<0.000000e+00> : vector<16xf32>
    %94 = vector.multi_reduction <add>, %93, %cst_40 [1] : vector<16x32xf32> to vector<16xf32>
    %95 = vector.shape_cast %94 : vector<16xf32> to vector<16x1xf32>
    %cst_41 = arith.constant 3.200000e+01 : f32
    %96 = vector.broadcast %cst_41 : f32 to vector<16x1xf32>
    %97 = arith.divf %95, %96 : vector<16x1xf32>
    %98 = arith.mulf %92, %92 : vector<16x1xf32>
    %99 = arith.subf %97, %98 : vector<16x1xf32>
    %100 = vector.broadcast %92 : vector<16x1xf32> to vector<16x32xf32>
    %101 = arith.subf %88, %100 : vector<16x32xf32>
    %cst_42 = arith.constant 9.99999974E-6 : f32
    %102 = vector.broadcast %cst_42 : f32 to vector<16x1xf32>
    %103 = arith.addf %99, %102 : vector<16x1xf32>
    %104 = math.rsqrt %103 : vector<16x1xf32>
    %105 = vector.broadcast %104 : vector<16x1xf32> to vector<16x32xf32>
    %106 = arith.mulf %101, %105 : vector<16x32xf32>
    %107 = vector.broadcast %5 : vector<1x32xf32> to vector<16x32xf32>
    %108 = arith.mulf %106, %107 : vector<16x32xf32>
    %109 = vector.broadcast %6 : vector<1x32xf32> to vector<16x32xf32>
    %110 = arith.addf %108, %109 : vector<16x32xf32>
    %c0_43 = arith.constant 0 : index
    %c1_44 = arith.constant 1 : index
    %c0_45 = arith.constant 0 : index
    %c0_46 = arith.constant 0 : index
    %c0_47 = arith.constant 0 : index
    %111 = vector.load %arg3[%c0_43, %c1_44, %c0_45, %c0_46, %c0_47] : memref<2x2x2x32x32xf32, #tpu.memory_space<vmem>>, vector<1x1x1x32x32xf32>
    %112 = vector.shape_cast %111 : vector<1x1x1x32x32xf32> to vector<32x32xf32>
    %c0_48 = arith.constant 0 : index
    %c1_49 = arith.constant 1 : index
    %c0_50 = arith.constant 0 : index
    %c0_51 = arith.constant 0 : index
    %113 = vector.load %arg4[%c0_48, %c1_49, %c0_50, %c0_51] : memref<2x2x32x64xf32, #tpu.memory_space<vmem>>, vector<1x1x32x64xf32>
    %114 = vector.shape_cast %113 : vector<1x1x32x64xf32> to vector<32x64xf32>
    %c0_52 = arith.constant 0 : index
    %c1_53 = arith.constant 1 : index
    %c1_54 = arith.constant 1 : index
    %c0_55 = arith.constant 0 : index
    %c0_56 = arith.constant 0 : index
    %115 = vector.load %arg3[%c0_52, %c1_53, %c1_54, %c0_55, %c0_56] : memref<2x2x2x32x32xf32, #tpu.memory_space<vmem>>, vector<1x1x1x32x32xf32>
    %116 = vector.shape_cast %115 : vector<1x1x1x32x32xf32> to vector<32x32xf32>
    %117 = vector.extract_strided_slice %4 {offsets = [3, 0], sizes = [1, 32], strides = [1, 1]} : vector<12x128xf32> to vector<1x32xf32>
    %118 = vector.extract_strided_slice %4 {offsets = [4, 0], sizes = [1, 64], strides = [1, 1]} : vector<12x128xf32> to vector<1x64xf32>
    %119 = vector.extract_strided_slice %4 {offsets = [5, 0], sizes = [1, 32], strides = [1, 1]} : vector<12x128xf32> to vector<1x32xf32>
    %cst_57 = arith.constant dense<0.000000e+00> : vector<16x32xf32>
    %120 = tpu.matmul %110, %112, %cst_57 {dimension_numbers = #tpu.dot_dimension_numbers<[1], [0], [0], [1], [0, 0, 1, 1], [], []>} : vector<16x32xf32>, vector<32x32xf32>, vector<16x32xf32> -> vector<16x32xf32>
    %121 = vector.broadcast %117 : vector<1x32xf32> to vector<16x32xf32>
    %122 = arith.addf %120, %121 : vector<16x32xf32>
    %cst_58 = arith.constant dense<0.000000e+00> : vector<32x64xf32>
    %123 = tpu.matmul %1, %114, %cst_58 {dimension_numbers = #tpu.dot_dimension_numbers<[1], [0], [0], [1], [0, 0, 1, 1], [], []>} : vector<32x32xf32>, vector<32x64xf32>, vector<32x64xf32> -> vector<32x64xf32>
    %124 = vector.broadcast %118 : vector<1x64xf32> to vector<32x64xf32>
    %125 = arith.addf %123, %124 : vector<32x64xf32>
    %126 = vector.shape_cast %122 : vector<16x32xf32> to vector<2x8x32xf32>
    %127 = vector.shape_cast %125 : vector<32x64xf32> to vector<2x16x64xf32>
    %128 = vector.extract_strided_slice %126 {offsets = [0, 0, 0], sizes = [2, 8, 8], strides = [1, 1, 1]} : vector<2x8x32xf32> to vector<2x8x8xf32>
    %129 = vector.extract_strided_slice %127 {offsets = [0, 0, 0], sizes = [2, 16, 8], strides = [1, 1, 1]} : vector<2x16x64xf32> to vector<2x16x8xf32>
    %130 = vector.extract_strided_slice %127 {offsets = [0, 0, 32], sizes = [2, 16, 8], strides = [1, 1, 1]} : vector<2x16x64xf32> to vector<2x16x8xf32>
    "tpu.trace_start"() <{level = 10 : i32, message = "bqd,bkd->bqk"}> : () -> ()
    %cst_59 = arith.constant dense<0.000000e+00> : vector<2x8x16xf32>
    %131 = tpu.matmul %128, %129, %cst_59 {dimension_numbers = #tpu.dot_dimension_numbers<[2], [2], [1], [1], [0, 0, 0, 1, 1, 1], [0], [0]>} : vector<2x8x8xf32>, vector<2x16x8xf32>, vector<2x8x16xf32> -> vector<2x8x16xf32>
    "tpu.trace_stop"() : () -> ()
    %cst_60 = arith.constant dense<0xFF800000> : vector<2x8xf32>
    %132 = vector.multi_reduction <maximumf>, %131, %cst_60 [2] : vector<2x8x16xf32> to vector<2x8xf32>
    %133 = vector.shape_cast %132 : vector<2x8xf32> to vector<2x8x1xf32>
    %134 = vector.broadcast %133 : vector<2x8x1xf32> to vector<2x8x16xf32>
    %135 = arith.subf %131, %134 : vector<2x8x16xf32>
    %136 = math.exp %135 : vector<2x8x16xf32>
    %cst_61 = arith.constant dense<0.000000e+00> : vector<2x8xf32>
    %137 = vector.multi_reduction <add>, %136, %cst_61 [2] : vector<2x8x16xf32> to vector<2x8xf32>
    %138 = vector.shape_cast %137 : vector<2x8xf32> to vector<2x8x1xf32>
    %139 = vector.broadcast %138 : vector<2x8x1xf32> to vector<2x8x16xf32>
    %140 = arith.divf %136, %139 : vector<2x8x16xf32>
    "tpu.trace_start"() <{level = 10 : i32, message = "bqk,bkd->bqd"}> : () -> ()
    %cst_62 = arith.constant dense<0.000000e+00> : vector<2x8x8xf32>
    %141 = tpu.matmul %140, %130, %cst_62 {dimension_numbers = #tpu.dot_dimension_numbers<[2], [1], [1], [2], [0, 0, 0, 1, 1, 2], [0], [0]>} : vector<2x8x16xf32>, vector<2x16x8xf32>, vector<2x8x8xf32> -> vector<2x8x8xf32>
    "tpu.trace_stop"() : () -> ()
    %142 = vector.extract_strided_slice %126 {offsets = [0, 0, 8], sizes = [2, 8, 8], strides = [1, 1, 1]} : vector<2x8x32xf32> to vector<2x8x8xf32>
    %143 = vector.extract_strided_slice %127 {offsets = [0, 0, 8], sizes = [2, 16, 8], strides = [1, 1, 1]} : vector<2x16x64xf32> to vector<2x16x8xf32>
    %144 = vector.extract_strided_slice %127 {offsets = [0, 0, 40], sizes = [2, 16, 8], strides = [1, 1, 1]} : vector<2x16x64xf32> to vector<2x16x8xf32>
    "tpu.trace_start"() <{level = 10 : i32, message = "bqd,bkd->bqk"}> : () -> ()
    %cst_63 = arith.constant dense<0.000000e+00> : vector<2x8x16xf32>
    %145 = tpu.matmul %142, %143, %cst_63 {dimension_numbers = #tpu.dot_dimension_numbers<[2], [2], [1], [1], [0, 0, 0, 1, 1, 1], [0], [0]>} : vector<2x8x8xf32>, vector<2x16x8xf32>, vector<2x8x16xf32> -> vector<2x8x16xf32>
    "tpu.trace_stop"() : () -> ()
    %cst_64 = arith.constant dense<0xFF800000> : vector<2x8xf32>
    %146 = vector.multi_reduction <maximumf>, %145, %cst_64 [2] : vector<2x8x16xf32> to vector<2x8xf32>
    %147 = vector.shape_cast %146 : vector<2x8xf32> to vector<2x8x1xf32>
    %148 = vector.broadcast %147 : vector<2x8x1xf32> to vector<2x8x16xf32>
    %149 = arith.subf %145, %148 : vector<2x8x16xf32>
    %150 = math.exp %149 : vector<2x8x16xf32>
    %cst_65 = arith.constant dense<0.000000e+00> : vector<2x8xf32>
    %151 = vector.multi_reduction <add>, %150, %cst_65 [2] : vector<2x8x16xf32> to vector<2x8xf32>
    %152 = vector.shape_cast %151 : vector<2x8xf32> to vector<2x8x1xf32>
    %153 = vector.broadcast %152 : vector<2x8x1xf32> to vector<2x8x16xf32>
    %154 = arith.divf %150, %153 : vector<2x8x16xf32>
    "tpu.trace_start"() <{level = 10 : i32, message = "bqk,bkd->bqd"}> : () -> ()
    %cst_66 = arith.constant dense<0.000000e+00> : vector<2x8x8xf32>
    %155 = tpu.matmul %154, %144, %cst_66 {dimension_numbers = #tpu.dot_dimension_numbers<[2], [1], [1], [2], [0, 0, 0, 1, 1, 2], [0], [0]>} : vector<2x8x16xf32>, vector<2x16x8xf32>, vector<2x8x8xf32> -> vector<2x8x8xf32>
    "tpu.trace_stop"() : () -> ()
    %156 = vector.extract_strided_slice %126 {offsets = [0, 0, 16], sizes = [2, 8, 8], strides = [1, 1, 1]} : vector<2x8x32xf32> to vector<2x8x8xf32>
    %157 = vector.extract_strided_slice %127 {offsets = [0, 0, 16], sizes = [2, 16, 8], strides = [1, 1, 1]} : vector<2x16x64xf32> to vector<2x16x8xf32>
    %158 = vector.extract_strided_slice %127 {offsets = [0, 0, 48], sizes = [2, 16, 8], strides = [1, 1, 1]} : vector<2x16x64xf32> to vector<2x16x8xf32>
    "tpu.trace_start"() <{level = 10 : i32, message = "bqd,bkd->bqk"}> : () -> ()
    %cst_67 = arith.constant dense<0.000000e+00> : vector<2x8x16xf32>
    %159 = tpu.matmul %156, %157, %cst_67 {dimension_numbers = #tpu.dot_dimension_numbers<[2], [2], [1], [1], [0, 0, 0, 1, 1, 1], [0], [0]>} : vector<2x8x8xf32>, vector<2x16x8xf32>, vector<2x8x16xf32> -> vector<2x8x16xf32>
    "tpu.trace_stop"() : () -> ()
    %cst_68 = arith.constant dense<0xFF800000> : vector<2x8xf32>
    %160 = vector.multi_reduction <maximumf>, %159, %cst_68 [2] : vector<2x8x16xf32> to vector<2x8xf32>
    %161 = vector.shape_cast %160 : vector<2x8xf32> to vector<2x8x1xf32>
    %162 = vector.broadcast %161 : vector<2x8x1xf32> to vector<2x8x16xf32>
    %163 = arith.subf %159, %162 : vector<2x8x16xf32>
    %164 = math.exp %163 : vector<2x8x16xf32>
    %cst_69 = arith.constant dense<0.000000e+00> : vector<2x8xf32>
    %165 = vector.multi_reduction <add>, %164, %cst_69 [2] : vector<2x8x16xf32> to vector<2x8xf32>
    %166 = vector.shape_cast %165 : vector<2x8xf32> to vector<2x8x1xf32>
    %167 = vector.broadcast %166 : vector<2x8x1xf32> to vector<2x8x16xf32>
    %168 = arith.divf %164, %167 : vector<2x8x16xf32>
    "tpu.trace_start"() <{level = 10 : i32, message = "bqk,bkd->bqd"}> : () -> ()
    %cst_70 = arith.constant dense<0.000000e+00> : vector<2x8x8xf32>
    %169 = tpu.matmul %168, %158, %cst_70 {dimension_numbers = #tpu.dot_dimension_numbers<[2], [1], [1], [2], [0, 0, 0, 1, 1, 2], [0], [0]>} : vector<2x8x16xf32>, vector<2x16x8xf32>, vector<2x8x8xf32> -> vector<2x8x8xf32>
    "tpu.trace_stop"() : () -> ()
    %170 = vector.extract_strided_slice %126 {offsets = [0, 0, 24], sizes = [2, 8, 8], strides = [1, 1, 1]} : vector<2x8x32xf32> to vector<2x8x8xf32>
    %171 = vector.extract_strided_slice %127 {offsets = [0, 0, 24], sizes = [2, 16, 8], strides = [1, 1, 1]} : vector<2x16x64xf32> to vector<2x16x8xf32>
    %172 = vector.extract_strided_slice %127 {offsets = [0, 0, 56], sizes = [2, 16, 8], strides = [1, 1, 1]} : vector<2x16x64xf32> to vector<2x16x8xf32>
    "tpu.trace_start"() <{level = 10 : i32, message = "bqd,bkd->bqk"}> : () -> ()
    %cst_71 = arith.constant dense<0.000000e+00> : vector<2x8x16xf32>
    %173 = tpu.matmul %170, %171, %cst_71 {dimension_numbers = #tpu.dot_dimension_numbers<[2], [2], [1], [1], [0, 0, 0, 1, 1, 1], [0], [0]>} : vector<2x8x8xf32>, vector<2x16x8xf32>, vector<2x8x16xf32> -> vector<2x8x16xf32>
    "tpu.trace_stop"() : () -> ()
    %cst_72 = arith.constant dense<0xFF800000> : vector<2x8xf32>
    %174 = vector.multi_reduction <maximumf>, %173, %cst_72 [2] : vector<2x8x16xf32> to vector<2x8xf32>
    %175 = vector.shape_cast %174 : vector<2x8xf32> to vector<2x8x1xf32>
    %176 = vector.broadcast %175 : vector<2x8x1xf32> to vector<2x8x16xf32>
    %177 = arith.subf %173, %176 : vector<2x8x16xf32>
    %178 = math.exp %177 : vector<2x8x16xf32>
    %cst_73 = arith.constant dense<0.000000e+00> : vector<2x8xf32>
    %179 = vector.multi_reduction <add>, %178, %cst_73 [2] : vector<2x8x16xf32> to vector<2x8xf32>
    %180 = vector.shape_cast %179 : vector<2x8xf32> to vector<2x8x1xf32>
    %181 = vector.broadcast %180 : vector<2x8x1xf32> to vector<2x8x16xf32>
    %182 = arith.divf %178, %181 : vector<2x8x16xf32>
    "tpu.trace_start"() <{level = 10 : i32, message = "bqk,bkd->bqd"}> : () -> ()
    %cst_74 = arith.constant dense<0.000000e+00> : vector<2x8x8xf32>
    %183 = tpu.matmul %182, %172, %cst_74 {dimension_numbers = #tpu.dot_dimension_numbers<[2], [1], [1], [2], [0, 0, 0, 1, 1, 2], [0], [0]>} : vector<2x8x16xf32>, vector<2x16x8xf32>, vector<2x8x8xf32> -> vector<2x8x8xf32>
    "tpu.trace_stop"() : () -> ()
    %184 = tpu.concatenate %141, %155, %169, %183 in 2 : vector<2x8x8xf32>, vector<2x8x8xf32>, vector<2x8x8xf32>, vector<2x8x8xf32> -> vector<2x8x32xf32>
    %185 = vector.shape_cast %184 : vector<2x8x32xf32> to vector<16x32xf32>
    %cst_75 = arith.constant dense<0.000000e+00> : vector<16x32xf32>
    %186 = tpu.matmul %185, %116, %cst_75 {dimension_numbers = #tpu.dot_dimension_numbers<[1], [0], [0], [1], [0, 0, 1, 1], [], []>} : vector<16x32xf32>, vector<32x32xf32>, vector<16x32xf32> -> vector<16x32xf32>
    %187 = vector.broadcast %119 : vector<1x32xf32> to vector<16x32xf32>
    %188 = arith.addf %186, %187 : vector<16x32xf32>
    %189 = arith.addf %188, %110 : vector<16x32xf32>
    %cst_76 = arith.constant dense<0.000000e+00> : vector<16xf32>
    %190 = vector.multi_reduction <add>, %189, %cst_76 [1] : vector<16x32xf32> to vector<16xf32>
    %191 = vector.shape_cast %190 : vector<16xf32> to vector<16x1xf32>
    %cst_77 = arith.constant 3.200000e+01 : f32
    %192 = vector.broadcast %cst_77 : f32 to vector<16x1xf32>
    %193 = arith.divf %191, %192 : vector<16x1xf32>
    %194 = arith.mulf %189, %189 : vector<16x32xf32>
    %cst_78 = arith.constant dense<0.000000e+00> : vector<16xf32>
    %195 = vector.multi_reduction <add>, %194, %cst_78 [1] : vector<16x32xf32> to vector<16xf32>
    %196 = vector.shape_cast %195 : vector<16xf32> to vector<16x1xf32>
    %cst_79 = arith.constant 3.200000e+01 : f32
    %197 = vector.broadcast %cst_79 : f32 to vector<16x1xf32>
    %198 = arith.divf %196, %197 : vector<16x1xf32>
    %199 = arith.mulf %193, %193 : vector<16x1xf32>
    %200 = arith.subf %198, %199 : vector<16x1xf32>
    %201 = vector.broadcast %193 : vector<16x1xf32> to vector<16x32xf32>
    %202 = arith.subf %189, %201 : vector<16x32xf32>
    %cst_80 = arith.constant 9.99999974E-6 : f32
    %203 = vector.broadcast %cst_80 : f32 to vector<16x1xf32>
    %204 = arith.addf %200, %203 : vector<16x1xf32>
    %205 = math.rsqrt %204 : vector<16x1xf32>
    %206 = vector.broadcast %205 : vector<16x1xf32> to vector<16x32xf32>
    %207 = arith.mulf %202, %206 : vector<16x32xf32>
    %208 = vector.broadcast %5 : vector<1x32xf32> to vector<16x32xf32>
    %209 = arith.mulf %207, %208 : vector<16x32xf32>
    %210 = vector.broadcast %6 : vector<1x32xf32> to vector<16x32xf32>
    %211 = arith.addf %209, %210 : vector<16x32xf32>
    %c0_81 = arith.constant 0 : index
    %c0_82 = arith.constant 0 : index
    %c0_83 = arith.constant 0 : index
    %212 = vector.load %arg5[%c0_81, %c0_82, %c0_83] : memref<2x32x128xf32, #tpu.memory_space<vmem>>, vector<1x32x128xf32>
    %213 = vector.shape_cast %212 : vector<1x32x128xf32> to vector<32x128xf32>
    %cst_84 = arith.constant dense<0.000000e+00> : vector<16x128xf32>
    %214 = tpu.matmul %211, %213, %cst_84 {dimension_numbers = #tpu.dot_dimension_numbers<[1], [0], [0], [1], [0, 0, 1, 1], [], []>} : vector<16x32xf32>, vector<32x128xf32>, vector<16x128xf32> -> vector<16x128xf32>
    %215 = vector.extract_strided_slice %4 {offsets = [6, 0], sizes = [1, 128], strides = [1, 1]} : vector<12x128xf32> to vector<1x128xf32>
    %216 = vector.broadcast %215 : vector<1x128xf32> to vector<16x128xf32>
    %217 = arith.addf %214, %216 : vector<16x128xf32>
    %cst_85 = arith.constant 0.000000e+00 : f32
    %218 = vector.broadcast %cst_85 : f32 to vector<16x128xf32>
    %219 = arith.maximumf %217, %218 : vector<16x128xf32>
    %c0_86 = arith.constant 0 : index
    %c0_87 = arith.constant 0 : index
    %c0_88 = arith.constant 0 : index
    %220 = vector.load %arg6[%c0_86, %c0_87, %c0_88] : memref<2x128x32xf32, #tpu.memory_space<vmem>>, vector<1x128x32xf32>
    %221 = vector.shape_cast %220 : vector<1x128x32xf32> to vector<128x32xf32>
    %cst_89 = arith.constant dense<0.000000e+00> : vector<16x32xf32>
    %222 = tpu.matmul %219, %221, %cst_89 {dimension_numbers = #tpu.dot_dimension_numbers<[1], [0], [0], [1], [0, 0, 1, 1], [], []>} : vector<16x128xf32>, vector<128x32xf32>, vector<16x32xf32> -> vector<16x32xf32>
    %223 = vector.extract_strided_slice %4 {offsets = [7, 0], sizes = [1, 32], strides = [1, 1]} : vector<12x128xf32> to vector<1x32xf32>
    %224 = vector.broadcast %223 : vector<1x32xf32> to vector<16x32xf32>
    %225 = arith.addf %222, %224 : vector<16x32xf32>
    %226 = arith.addf %225, %211 : vector<16x32xf32>
    %cst_90 = arith.constant dense<0.000000e+00> : vector<16xf32>
    %227 = vector.multi_reduction <add>, %226, %cst_90 [1] : vector<16x32xf32> to vector<16xf32>
    %228 = vector.shape_cast %227 : vector<16xf32> to vector<16x1xf32>
    %cst_91 = arith.constant 3.200000e+01 : f32
    %229 = vector.broadcast %cst_91 : f32 to vector<16x1xf32>
    %230 = arith.divf %228, %229 : vector<16x1xf32>
    %231 = arith.mulf %226, %226 : vector<16x32xf32>
    %cst_92 = arith.constant dense<0.000000e+00> : vector<16xf32>
    %232 = vector.multi_reduction <add>, %231, %cst_92 [1] : vector<16x32xf32> to vector<16xf32>
    %233 = vector.shape_cast %232 : vector<16xf32> to vector<16x1xf32>
    %cst_93 = arith.constant 3.200000e+01 : f32
    %234 = vector.broadcast %cst_93 : f32 to vector<16x1xf32>
    %235 = arith.divf %233, %234 : vector<16x1xf32>
    %236 = arith.mulf %230, %230 : vector<16x1xf32>
    %237 = arith.subf %235, %236 : vector<16x1xf32>
    %238 = vector.broadcast %230 : vector<16x1xf32> to vector<16x32xf32>
    %239 = arith.subf %226, %238 : vector<16x32xf32>
    %cst_94 = arith.constant 9.99999974E-6 : f32
    %240 = vector.broadcast %cst_94 : f32 to vector<16x1xf32>
    %241 = arith.addf %237, %240 : vector<16x1xf32>
    %242 = math.rsqrt %241 : vector<16x1xf32>
    %243 = vector.broadcast %242 : vector<16x1xf32> to vector<16x32xf32>
    %244 = arith.mulf %239, %243 : vector<16x32xf32>
    %245 = vector.broadcast %7 : vector<1x32xf32> to vector<16x32xf32>
    %246 = arith.mulf %244, %245 : vector<16x32xf32>
    %247 = vector.broadcast %8 : vector<1x32xf32> to vector<16x32xf32>
    %248 = arith.addf %246, %247 : vector<16x32xf32>
    %c1_95 = arith.constant 1 : index
    %c0_96 = arith.constant 0 : index
    %c0_97 = arith.constant 0 : index
    %249 = vector.load %arg7[%c1_95, %c0_96, %c0_97] : memref<2x12x128xf32, #tpu.memory_space<vmem>>, vector<1x12x128xf32>
    %250 = vector.shape_cast %249 : vector<1x12x128xf32> to vector<12x128xf32>
    %251 = vector.extract_strided_slice %250 {offsets = [8, 0], sizes = [1, 32], strides = [1, 1]} : vector<12x128xf32> to vector<1x32xf32>
    %252 = vector.extract_strided_slice %250 {offsets = [9, 0], sizes = [1, 32], strides = [1, 1]} : vector<12x128xf32> to vector<1x32xf32>
    %253 = vector.extract_strided_slice %250 {offsets = [10, 0], sizes = [1, 32], strides = [1, 1]} : vector<12x128xf32> to vector<1x32xf32>
    %254 = vector.extract_strided_slice %250 {offsets = [11, 0], sizes = [1, 32], strides = [1, 1]} : vector<12x128xf32> to vector<1x32xf32>
    %255 = arith.addf %248, %0 : vector<16x32xf32>
    %c1_98 = arith.constant 1 : index
    %c0_99 = arith.constant 0 : index
    %c0_100 = arith.constant 0 : index
    %c0_101 = arith.constant 0 : index
    %c0_102 = arith.constant 0 : index
    %256 = vector.load %arg3[%c1_98, %c0_99, %c0_100, %c0_101, %c0_102] : memref<2x2x2x32x32xf32, #tpu.memory_space<vmem>>, vector<1x1x1x32x32xf32>
    %257 = vector.shape_cast %256 : vector<1x1x1x32x32xf32> to vector<32x32xf32>
    %c1_103 = arith.constant 1 : index
    %c0_104 = arith.constant 0 : index
    %c0_105 = arith.constant 0 : index
    %c0_106 = arith.constant 0 : index
    %258 = vector.load %arg4[%c1_103, %c0_104, %c0_105, %c0_106] : memref<2x2x32x64xf32, #tpu.memory_space<vmem>>, vector<1x1x32x64xf32>
    %259 = vector.shape_cast %258 : vector<1x1x32x64xf32> to vector<32x64xf32>
    %c1_107 = arith.constant 1 : index
    %c0_108 = arith.constant 0 : index
    %c1_109 = arith.constant 1 : index
    %c0_110 = arith.constant 0 : index
    %c0_111 = arith.constant 0 : index
    %260 = vector.load %arg3[%c1_107, %c0_108, %c1_109, %c0_110, %c0_111] : memref<2x2x2x32x32xf32, #tpu.memory_space<vmem>>, vector<1x1x1x32x32xf32>
    %261 = vector.shape_cast %260 : vector<1x1x1x32x32xf32> to vector<32x32xf32>
    %262 = vector.extract_strided_slice %250 {offsets = [0, 0], sizes = [1, 32], strides = [1, 1]} : vector<12x128xf32> to vector<1x32xf32>
    %263 = vector.extract_strided_slice %250 {offsets = [1, 0], sizes = [1, 64], strides = [1, 1]} : vector<12x128xf32> to vector<1x64xf32>
    %264 = vector.extract_strided_slice %250 {offsets = [2, 0], sizes = [1, 32], strides = [1, 1]} : vector<12x128xf32> to vector<1x32xf32>
    %cst_112 = arith.constant dense<0.000000e+00> : vector<16x32xf32>
    %265 = tpu.matmul %255, %257, %cst_112 {dimension_numbers = #tpu.dot_dimension_numbers<[1], [0], [0], [1], [0, 0, 1, 1], [], []>} : vector<16x32xf32>, vector<32x32xf32>, vector<16x32xf32> -> vector<16x32xf32>
    %266 = vector.broadcast %262 : vector<1x32xf32> to vector<16x32xf32>
    %267 = arith.addf %265, %266 : vector<16x32xf32>
    %cst_113 = arith.constant dense<0.000000e+00> : vector<16x64xf32>
    %268 = tpu.matmul %255, %259, %cst_113 {dimension_numbers = #tpu.dot_dimension_numbers<[1], [0], [0], [1], [0, 0, 1, 1], [], []>} : vector<16x32xf32>, vector<32x64xf32>, vector<16x64xf32> -> vector<16x64xf32>
    %269 = vector.broadcast %263 : vector<1x64xf32> to vector<16x64xf32>
    %270 = arith.addf %268, %269 : vector<16x64xf32>
    %271 = vector.shape_cast %267 : vector<16x32xf32> to vector<2x8x32xf32>
    %272 = vector.shape_cast %270 : vector<16x64xf32> to vector<2x8x64xf32>
    %273 = vector.extract_strided_slice %271 {offsets = [0, 0, 0], sizes = [2, 8, 8], strides = [1, 1, 1]} : vector<2x8x32xf32> to vector<2x8x8xf32>
    %274 = vector.extract_strided_slice %272 {offsets = [0, 0, 0], sizes = [2, 8, 8], strides = [1, 1, 1]} : vector<2x8x64xf32> to vector<2x8x8xf32>
    %275 = vector.extract_strided_slice %272 {offsets = [0, 0, 32], sizes = [2, 8, 8], strides = [1, 1, 1]} : vector<2x8x64xf32> to vector<2x8x8xf32>
    "tpu.trace_start"() <{level = 10 : i32, message = "bqd,bkd->bqk"}> : () -> ()
    %cst_114 = arith.constant dense<0.000000e+00> : vector<2x8x8xf32>
    %276 = tpu.matmul %273, %274, %cst_114 {dimension_numbers = #tpu.dot_dimension_numbers<[2], [2], [1], [1], [0, 0, 0, 1, 1, 1], [0], [0]>} : vector<2x8x8xf32>, vector<2x8x8xf32>, vector<2x8x8xf32> -> vector<2x8x8xf32>
    "tpu.trace_stop"() : () -> ()
    %cst_115 = arith.constant dense<0xFF800000> : vector<2x8xf32>
    %277 = vector.multi_reduction <maximumf>, %276, %cst_115 [2] : vector<2x8x8xf32> to vector<2x8xf32>
    %278 = vector.shape_cast %277 : vector<2x8xf32> to vector<2x8x1xf32>
    %279 = vector.broadcast %278 : vector<2x8x1xf32> to vector<2x8x8xf32>
    %280 = arith.subf %276, %279 : vector<2x8x8xf32>
    %281 = math.exp %280 : vector<2x8x8xf32>
    %cst_116 = arith.constant dense<0.000000e+00> : vector<2x8xf32>
    %282 = vector.multi_reduction <add>, %281, %cst_116 [2] : vector<2x8x8xf32> to vector<2x8xf32>
    %283 = vector.shape_cast %282 : vector<2x8xf32> to vector<2x8x1xf32>
    %284 = vector.broadcast %283 : vector<2x8x1xf32> to vector<2x8x8xf32>
    %285 = arith.divf %281, %284 : vector<2x8x8xf32>
    "tpu.trace_start"() <{level = 10 : i32, message = "bqk,bkd->bqd"}> : () -> ()
    %cst_117 = arith.constant dense<0.000000e+00> : vector<2x8x8xf32>
    %286 = tpu.matmul %285, %275, %cst_117 {dimension_numbers = #tpu.dot_dimension_numbers<[2], [1], [1], [2], [0, 0, 0, 1, 1, 2], [0], [0]>} : vector<2x8x8xf32>, vector<2x8x8xf32>, vector<2x8x8xf32> -> vector<2x8x8xf32>
    "tpu.trace_stop"() : () -> ()
    %287 = vector.extract_strided_slice %271 {offsets = [0, 0, 8], sizes = [2, 8, 8], strides = [1, 1, 1]} : vector<2x8x32xf32> to vector<2x8x8xf32>
    %288 = vector.extract_strided_slice %272 {offsets = [0, 0, 8], sizes = [2, 8, 8], strides = [1, 1, 1]} : vector<2x8x64xf32> to vector<2x8x8xf32>
    %289 = vector.extract_strided_slice %272 {offsets = [0, 0, 40], sizes = [2, 8, 8], strides = [1, 1, 1]} : vector<2x8x64xf32> to vector<2x8x8xf32>
    "tpu.trace_start"() <{level = 10 : i32, message = "bqd,bkd->bqk"}> : () -> ()
    %cst_118 = arith.constant dense<0.000000e+00> : vector<2x8x8xf32>
    %290 = tpu.matmul %287, %288, %cst_118 {dimension_numbers = #tpu.dot_dimension_numbers<[2], [2], [1], [1], [0, 0, 0, 1, 1, 1], [0], [0]>} : vector<2x8x8xf32>, vector<2x8x8xf32>, vector<2x8x8xf32> -> vector<2x8x8xf32>
    "tpu.trace_stop"() : () -> ()
    %cst_119 = arith.constant dense<0xFF800000> : vector<2x8xf32>
    %291 = vector.multi_reduction <maximumf>, %290, %cst_119 [2] : vector<2x8x8xf32> to vector<2x8xf32>
    %292 = vector.shape_cast %291 : vector<2x8xf32> to vector<2x8x1xf32>
    %293 = vector.broadcast %292 : vector<2x8x1xf32> to vector<2x8x8xf32>
    %294 = arith.subf %290, %293 : vector<2x8x8xf32>
    %295 = math.exp %294 : vector<2x8x8xf32>
    %cst_120 = arith.constant dense<0.000000e+00> : vector<2x8xf32>
    %296 = vector.multi_reduction <add>, %295, %cst_120 [2] : vector<2x8x8xf32> to vector<2x8xf32>
    %297 = vector.shape_cast %296 : vector<2x8xf32> to vector<2x8x1xf32>
    %298 = vector.broadcast %297 : vector<2x8x1xf32> to vector<2x8x8xf32>
    %299 = arith.divf %295, %298 : vector<2x8x8xf32>
    "tpu.trace_start"() <{level = 10 : i32, message = "bqk,bkd->bqd"}> : () -> ()
    %cst_121 = arith.constant dense<0.000000e+00> : vector<2x8x8xf32>
    %300 = tpu.matmul %299, %289, %cst_121 {dimension_numbers = #tpu.dot_dimension_numbers<[2], [1], [1], [2], [0, 0, 0, 1, 1, 2], [0], [0]>} : vector<2x8x8xf32>, vector<2x8x8xf32>, vector<2x8x8xf32> -> vector<2x8x8xf32>
    "tpu.trace_stop"() : () -> ()
    %301 = vector.extract_strided_slice %271 {offsets = [0, 0, 16], sizes = [2, 8, 8], strides = [1, 1, 1]} : vector<2x8x32xf32> to vector<2x8x8xf32>
    %302 = vector.extract_strided_slice %272 {offsets = [0, 0, 16], sizes = [2, 8, 8], strides = [1, 1, 1]} : vector<2x8x64xf32> to vector<2x8x8xf32>
    %303 = vector.extract_strided_slice %272 {offsets = [0, 0, 48], sizes = [2, 8, 8], strides = [1, 1, 1]} : vector<2x8x64xf32> to vector<2x8x8xf32>
    "tpu.trace_start"() <{level = 10 : i32, message = "bqd,bkd->bqk"}> : () -> ()
    %cst_122 = arith.constant dense<0.000000e+00> : vector<2x8x8xf32>
    %304 = tpu.matmul %301, %302, %cst_122 {dimension_numbers = #tpu.dot_dimension_numbers<[2], [2], [1], [1], [0, 0, 0, 1, 1, 1], [0], [0]>} : vector<2x8x8xf32>, vector<2x8x8xf32>, vector<2x8x8xf32> -> vector<2x8x8xf32>
    "tpu.trace_stop"() : () -> ()
    %cst_123 = arith.constant dense<0xFF800000> : vector<2x8xf32>
    %305 = vector.multi_reduction <maximumf>, %304, %cst_123 [2] : vector<2x8x8xf32> to vector<2x8xf32>
    %306 = vector.shape_cast %305 : vector<2x8xf32> to vector<2x8x1xf32>
    %307 = vector.broadcast %306 : vector<2x8x1xf32> to vector<2x8x8xf32>
    %308 = arith.subf %304, %307 : vector<2x8x8xf32>
    %309 = math.exp %308 : vector<2x8x8xf32>
    %cst_124 = arith.constant dense<0.000000e+00> : vector<2x8xf32>
    %310 = vector.multi_reduction <add>, %309, %cst_124 [2] : vector<2x8x8xf32> to vector<2x8xf32>
    %311 = vector.shape_cast %310 : vector<2x8xf32> to vector<2x8x1xf32>
    %312 = vector.broadcast %311 : vector<2x8x1xf32> to vector<2x8x8xf32>
    %313 = arith.divf %309, %312 : vector<2x8x8xf32>
    "tpu.trace_start"() <{level = 10 : i32, message = "bqk,bkd->bqd"}> : () -> ()
    %cst_125 = arith.constant dense<0.000000e+00> : vector<2x8x8xf32>
    %314 = tpu.matmul %313, %303, %cst_125 {dimension_numbers = #tpu.dot_dimension_numbers<[2], [1], [1], [2], [0, 0, 0, 1, 1, 2], [0], [0]>} : vector<2x8x8xf32>, vector<2x8x8xf32>, vector<2x8x8xf32> -> vector<2x8x8xf32>
    "tpu.trace_stop"() : () -> ()
    %315 = vector.extract_strided_slice %271 {offsets = [0, 0, 24], sizes = [2, 8, 8], strides = [1, 1, 1]} : vector<2x8x32xf32> to vector<2x8x8xf32>
    %316 = vector.extract_strided_slice %272 {offsets = [0, 0, 24], sizes = [2, 8, 8], strides = [1, 1, 1]} : vector<2x8x64xf32> to vector<2x8x8xf32>
    %317 = vector.extract_strided_slice %272 {offsets = [0, 0, 56], sizes = [2, 8, 8], strides = [1, 1, 1]} : vector<2x8x64xf32> to vector<2x8x8xf32>
    "tpu.trace_start"() <{level = 10 : i32, message = "bqd,bkd->bqk"}> : () -> ()
    %cst_126 = arith.constant dense<0.000000e+00> : vector<2x8x8xf32>
    %318 = tpu.matmul %315, %316, %cst_126 {dimension_numbers = #tpu.dot_dimension_numbers<[2], [2], [1], [1], [0, 0, 0, 1, 1, 1], [0], [0]>} : vector<2x8x8xf32>, vector<2x8x8xf32>, vector<2x8x8xf32> -> vector<2x8x8xf32>
    "tpu.trace_stop"() : () -> ()
    %cst_127 = arith.constant dense<0xFF800000> : vector<2x8xf32>
    %319 = vector.multi_reduction <maximumf>, %318, %cst_127 [2] : vector<2x8x8xf32> to vector<2x8xf32>
    %320 = vector.shape_cast %319 : vector<2x8xf32> to vector<2x8x1xf32>
    %321 = vector.broadcast %320 : vector<2x8x1xf32> to vector<2x8x8xf32>
    %322 = arith.subf %318, %321 : vector<2x8x8xf32>
    %323 = math.exp %322 : vector<2x8x8xf32>
    %cst_128 = arith.constant dense<0.000000e+00> : vector<2x8xf32>
    %324 = vector.multi_reduction <add>, %323, %cst_128 [2] : vector<2x8x8xf32> to vector<2x8xf32>
    %325 = vector.shape_cast %324 : vector<2x8xf32> to vector<2x8x1xf32>
    %326 = vector.broadcast %325 : vector<2x8x1xf32> to vector<2x8x8xf32>
    %327 = arith.divf %323, %326 : vector<2x8x8xf32>
    "tpu.trace_start"() <{level = 10 : i32, message = "bqk,bkd->bqd"}> : () -> ()
    %cst_129 = arith.constant dense<0.000000e+00> : vector<2x8x8xf32>
    %328 = tpu.matmul %327, %317, %cst_129 {dimension_numbers = #tpu.dot_dimension_numbers<[2], [1], [1], [2], [0, 0, 0, 1, 1, 2], [0], [0]>} : vector<2x8x8xf32>, vector<2x8x8xf32>, vector<2x8x8xf32> -> vector<2x8x8xf32>
    "tpu.trace_stop"() : () -> ()
    %329 = tpu.concatenate %286, %300, %314, %328 in 2 : vector<2x8x8xf32>, vector<2x8x8xf32>, vector<2x8x8xf32>, vector<2x8x8xf32> -> vector<2x8x32xf32>
    %330 = vector.shape_cast %329 : vector<2x8x32xf32> to vector<16x32xf32>
    %cst_130 = arith.constant dense<0.000000e+00> : vector<16x32xf32>
    %331 = tpu.matmul %330, %261, %cst_130 {dimension_numbers = #tpu.dot_dimension_numbers<[1], [0], [0], [1], [0, 0, 1, 1], [], []>} : vector<16x32xf32>, vector<32x32xf32>, vector<16x32xf32> -> vector<16x32xf32>
    %332 = vector.broadcast %264 : vector<1x32xf32> to vector<16x32xf32>
    %333 = arith.addf %331, %332 : vector<16x32xf32>
    %334 = arith.addf %333, %255 : vector<16x32xf32>
    %cst_131 = arith.constant dense<0.000000e+00> : vector<16xf32>
    %335 = vector.multi_reduction <add>, %334, %cst_131 [1] : vector<16x32xf32> to vector<16xf32>
    %336 = vector.shape_cast %335 : vector<16xf32> to vector<16x1xf32>
    %cst_132 = arith.constant 3.200000e+01 : f32
    %337 = vector.broadcast %cst_132 : f32 to vector<16x1xf32>
    %338 = arith.divf %336, %337 : vector<16x1xf32>
    %339 = arith.mulf %334, %334 : vector<16x32xf32>
    %cst_133 = arith.constant dense<0.000000e+00> : vector<16xf32>
    %340 = vector.multi_reduction <add>, %339, %cst_133 [1] : vector<16x32xf32> to vector<16xf32>
    %341 = vector.shape_cast %340 : vector<16xf32> to vector<16x1xf32>
    %cst_134 = arith.constant 3.200000e+01 : f32
    %342 = vector.broadcast %cst_134 : f32 to vector<16x1xf32>
    %343 = arith.divf %341, %342 : vector<16x1xf32>
    %344 = arith.mulf %338, %338 : vector<16x1xf32>
    %345 = arith.subf %343, %344 : vector<16x1xf32>
    %346 = vector.broadcast %338 : vector<16x1xf32> to vector<16x32xf32>
    %347 = arith.subf %334, %346 : vector<16x32xf32>
    %cst_135 = arith.constant 9.99999974E-6 : f32
    %348 = vector.broadcast %cst_135 : f32 to vector<16x1xf32>
    %349 = arith.addf %345, %348 : vector<16x1xf32>
    %350 = math.rsqrt %349 : vector<16x1xf32>
    %351 = vector.broadcast %350 : vector<16x1xf32> to vector<16x32xf32>
    %352 = arith.mulf %347, %351 : vector<16x32xf32>
    %353 = vector.broadcast %251 : vector<1x32xf32> to vector<16x32xf32>
    %354 = arith.mulf %352, %353 : vector<16x32xf32>
    %355 = vector.broadcast %252 : vector<1x32xf32> to vector<16x32xf32>
    %356 = arith.addf %354, %355 : vector<16x32xf32>
    %c1_136 = arith.constant 1 : index
    %c1_137 = arith.constant 1 : index
    %c0_138 = arith.constant 0 : index
    %c0_139 = arith.constant 0 : index
    %c0_140 = arith.constant 0 : index
    %357 = vector.load %arg3[%c1_136, %c1_137, %c0_138, %c0_139, %c0_140] : memref<2x2x2x32x32xf32, #tpu.memory_space<vmem>>, vector<1x1x1x32x32xf32>
    %358 = vector.shape_cast %357 : vector<1x1x1x32x32xf32> to vector<32x32xf32>
    %c1_141 = arith.constant 1 : index
    %c1_142 = arith.constant 1 : index
    %c0_143 = arith.constant 0 : index
    %c0_144 = arith.constant 0 : index
    %359 = vector.load %arg4[%c1_141, %c1_142, %c0_143, %c0_144] : memref<2x2x32x64xf32, #tpu.memory_space<vmem>>, vector<1x1x32x64xf32>
    %360 = vector.shape_cast %359 : vector<1x1x32x64xf32> to vector<32x64xf32>
    %c1_145 = arith.constant 1 : index
    %c1_146 = arith.constant 1 : index
    %c1_147 = arith.constant 1 : index
    %c0_148 = arith.constant 0 : index
    %c0_149 = arith.constant 0 : index
    %361 = vector.load %arg3[%c1_145, %c1_146, %c1_147, %c0_148, %c0_149] : memref<2x2x2x32x32xf32, #tpu.memory_space<vmem>>, vector<1x1x1x32x32xf32>
    %362 = vector.shape_cast %361 : vector<1x1x1x32x32xf32> to vector<32x32xf32>
    %363 = vector.extract_strided_slice %250 {offsets = [3, 0], sizes = [1, 32], strides = [1, 1]} : vector<12x128xf32> to vector<1x32xf32>
    %364 = vector.extract_strided_slice %250 {offsets = [4, 0], sizes = [1, 64], strides = [1, 1]} : vector<12x128xf32> to vector<1x64xf32>
    %365 = vector.extract_strided_slice %250 {offsets = [5, 0], sizes = [1, 32], strides = [1, 1]} : vector<12x128xf32> to vector<1x32xf32>
    %cst_150 = arith.constant dense<0.000000e+00> : vector<16x32xf32>
    %366 = tpu.matmul %356, %358, %cst_150 {dimension_numbers = #tpu.dot_dimension_numbers<[1], [0], [0], [1], [0, 0, 1, 1], [], []>} : vector<16x32xf32>, vector<32x32xf32>, vector<16x32xf32> -> vector<16x32xf32>
    %367 = vector.broadcast %363 : vector<1x32xf32> to vector<16x32xf32>
    %368 = arith.addf %366, %367 : vector<16x32xf32>
    %cst_151 = arith.constant dense<0.000000e+00> : vector<32x64xf32>
    %369 = tpu.matmul %1, %360, %cst_151 {dimension_numbers = #tpu.dot_dimension_numbers<[1], [0], [0], [1], [0, 0, 1, 1], [], []>} : vector<32x32xf32>, vector<32x64xf32>, vector<32x64xf32> -> vector<32x64xf32>
    %370 = vector.broadcast %364 : vector<1x64xf32> to vector<32x64xf32>
    %371 = arith.addf %369, %370 : vector<32x64xf32>
    %372 = vector.shape_cast %368 : vector<16x32xf32> to vector<2x8x32xf32>
    %373 = vector.shape_cast %371 : vector<32x64xf32> to vector<2x16x64xf32>
    %374 = vector.extract_strided_slice %372 {offsets = [0, 0, 0], sizes = [2, 8, 8], strides = [1, 1, 1]} : vector<2x8x32xf32> to vector<2x8x8xf32>
    %375 = vector.extract_strided_slice %373 {offsets = [0, 0, 0], sizes = [2, 16, 8], strides = [1, 1, 1]} : vector<2x16x64xf32> to vector<2x16x8xf32>
    %376 = vector.extract_strided_slice %373 {offsets = [0, 0, 32], sizes = [2, 16, 8], strides = [1, 1, 1]} : vector<2x16x64xf32> to vector<2x16x8xf32>
    "tpu.trace_start"() <{level = 10 : i32, message = "bqd,bkd->bqk"}> : () -> ()
    %cst_152 = arith.constant dense<0.000000e+00> : vector<2x8x16xf32>
    %377 = tpu.matmul %374, %375, %cst_152 {dimension_numbers = #tpu.dot_dimension_numbers<[2], [2], [1], [1], [0, 0, 0, 1, 1, 1], [0], [0]>} : vector<2x8x8xf32>, vector<2x16x8xf32>, vector<2x8x16xf32> -> vector<2x8x16xf32>
    "tpu.trace_stop"() : () -> ()
    %cst_153 = arith.constant dense<0xFF800000> : vector<2x8xf32>
    %378 = vector.multi_reduction <maximumf>, %377, %cst_153 [2] : vector<2x8x16xf32> to vector<2x8xf32>
    %379 = vector.shape_cast %378 : vector<2x8xf32> to vector<2x8x1xf32>
    %380 = vector.broadcast %379 : vector<2x8x1xf32> to vector<2x8x16xf32>
    %381 = arith.subf %377, %380 : vector<2x8x16xf32>
    %382 = math.exp %381 : vector<2x8x16xf32>
    %cst_154 = arith.constant dense<0.000000e+00> : vector<2x8xf32>
    %383 = vector.multi_reduction <add>, %382, %cst_154 [2] : vector<2x8x16xf32> to vector<2x8xf32>
    %384 = vector.shape_cast %383 : vector<2x8xf32> to vector<2x8x1xf32>
    %385 = vector.broadcast %384 : vector<2x8x1xf32> to vector<2x8x16xf32>
    %386 = arith.divf %382, %385 : vector<2x8x16xf32>
    "tpu.trace_start"() <{level = 10 : i32, message = "bqk,bkd->bqd"}> : () -> ()
    %cst_155 = arith.constant dense<0.000000e+00> : vector<2x8x8xf32>
    %387 = tpu.matmul %386, %376, %cst_155 {dimension_numbers = #tpu.dot_dimension_numbers<[2], [1], [1], [2], [0, 0, 0, 1, 1, 2], [0], [0]>} : vector<2x8x16xf32>, vector<2x16x8xf32>, vector<2x8x8xf32> -> vector<2x8x8xf32>
    "tpu.trace_stop"() : () -> ()
    %388 = vector.extract_strided_slice %372 {offsets = [0, 0, 8], sizes = [2, 8, 8], strides = [1, 1, 1]} : vector<2x8x32xf32> to vector<2x8x8xf32>
    %389 = vector.extract_strided_slice %373 {offsets = [0, 0, 8], sizes = [2, 16, 8], strides = [1, 1, 1]} : vector<2x16x64xf32> to vector<2x16x8xf32>
    %390 = vector.extract_strided_slice %373 {offsets = [0, 0, 40], sizes = [2, 16, 8], strides = [1, 1, 1]} : vector<2x16x64xf32> to vector<2x16x8xf32>
    "tpu.trace_start"() <{level = 10 : i32, message = "bqd,bkd->bqk"}> : () -> ()
    %cst_156 = arith.constant dense<0.000000e+00> : vector<2x8x16xf32>
    %391 = tpu.matmul %388, %389, %cst_156 {dimension_numbers = #tpu.dot_dimension_numbers<[2], [2], [1], [1], [0, 0, 0, 1, 1, 1], [0], [0]>} : vector<2x8x8xf32>, vector<2x16x8xf32>, vector<2x8x16xf32> -> vector<2x8x16xf32>
    "tpu.trace_stop"() : () -> ()
    %cst_157 = arith.constant dense<0xFF800000> : vector<2x8xf32>
    %392 = vector.multi_reduction <maximumf>, %391, %cst_157 [2] : vector<2x8x16xf32> to vector<2x8xf32>
    %393 = vector.shape_cast %392 : vector<2x8xf32> to vector<2x8x1xf32>
    %394 = vector.broadcast %393 : vector<2x8x1xf32> to vector<2x8x16xf32>
    %395 = arith.subf %391, %394 : vector<2x8x16xf32>
    %396 = math.exp %395 : vector<2x8x16xf32>
    %cst_158 = arith.constant dense<0.000000e+00> : vector<2x8xf32>
    %397 = vector.multi_reduction <add>, %396, %cst_158 [2] : vector<2x8x16xf32> to vector<2x8xf32>
    %398 = vector.shape_cast %397 : vector<2x8xf32> to vector<2x8x1xf32>
    %399 = vector.broadcast %398 : vector<2x8x1xf32> to vector<2x8x16xf32>
    %400 = arith.divf %396, %399 : vector<2x8x16xf32>
    "tpu.trace_start"() <{level = 10 : i32, message = "bqk,bkd->bqd"}> : () -> ()
    %cst_159 = arith.constant dense<0.000000e+00> : vector<2x8x8xf32>
    %401 = tpu.matmul %400, %390, %cst_159 {dimension_numbers = #tpu.dot_dimension_numbers<[2], [1], [1], [2], [0, 0, 0, 1, 1, 2], [0], [0]>} : vector<2x8x16xf32>, vector<2x16x8xf32>, vector<2x8x8xf32> -> vector<2x8x8xf32>
    "tpu.trace_stop"() : () -> ()
    %402 = vector.extract_strided_slice %372 {offsets = [0, 0, 16], sizes = [2, 8, 8], strides = [1, 1, 1]} : vector<2x8x32xf32> to vector<2x8x8xf32>
    %403 = vector.extract_strided_slice %373 {offsets = [0, 0, 16], sizes = [2, 16, 8], strides = [1, 1, 1]} : vector<2x16x64xf32> to vector<2x16x8xf32>
    %404 = vector.extract_strided_slice %373 {offsets = [0, 0, 48], sizes = [2, 16, 8], strides = [1, 1, 1]} : vector<2x16x64xf32> to vector<2x16x8xf32>
    "tpu.trace_start"() <{level = 10 : i32, message = "bqd,bkd->bqk"}> : () -> ()
    %cst_160 = arith.constant dense<0.000000e+00> : vector<2x8x16xf32>
    %405 = tpu.matmul %402, %403, %cst_160 {dimension_numbers = #tpu.dot_dimension_numbers<[2], [2], [1], [1], [0, 0, 0, 1, 1, 1], [0], [0]>} : vector<2x8x8xf32>, vector<2x16x8xf32>, vector<2x8x16xf32> -> vector<2x8x16xf32>
    "tpu.trace_stop"() : () -> ()
    %cst_161 = arith.constant dense<0xFF800000> : vector<2x8xf32>
    %406 = vector.multi_reduction <maximumf>, %405, %cst_161 [2] : vector<2x8x16xf32> to vector<2x8xf32>
    %407 = vector.shape_cast %406 : vector<2x8xf32> to vector<2x8x1xf32>
    %408 = vector.broadcast %407 : vector<2x8x1xf32> to vector<2x8x16xf32>
    %409 = arith.subf %405, %408 : vector<2x8x16xf32>
    %410 = math.exp %409 : vector<2x8x16xf32>
    %cst_162 = arith.constant dense<0.000000e+00> : vector<2x8xf32>
    %411 = vector.multi_reduction <add>, %410, %cst_162 [2] : vector<2x8x16xf32> to vector<2x8xf32>
    %412 = vector.shape_cast %411 : vector<2x8xf32> to vector<2x8x1xf32>
    %413 = vector.broadcast %412 : vector<2x8x1xf32> to vector<2x8x16xf32>
    %414 = arith.divf %410, %413 : vector<2x8x16xf32>
    "tpu.trace_start"() <{level = 10 : i32, message = "bqk,bkd->bqd"}> : () -> ()
    %cst_163 = arith.constant dense<0.000000e+00> : vector<2x8x8xf32>
    %415 = tpu.matmul %414, %404, %cst_163 {dimension_numbers = #tpu.dot_dimension_numbers<[2], [1], [1], [2], [0, 0, 0, 1, 1, 2], [0], [0]>} : vector<2x8x16xf32>, vector<2x16x8xf32>, vector<2x8x8xf32> -> vector<2x8x8xf32>
    "tpu.trace_stop"() : () -> ()
    %416 = vector.extract_strided_slice %372 {offsets = [0, 0, 24], sizes = [2, 8, 8], strides = [1, 1, 1]} : vector<2x8x32xf32> to vector<2x8x8xf32>
    %417 = vector.extract_strided_slice %373 {offsets = [0, 0, 24], sizes = [2, 16, 8], strides = [1, 1, 1]} : vector<2x16x64xf32> to vector<2x16x8xf32>
    %418 = vector.extract_strided_slice %373 {offsets = [0, 0, 56], sizes = [2, 16, 8], strides = [1, 1, 1]} : vector<2x16x64xf32> to vector<2x16x8xf32>
    "tpu.trace_start"() <{level = 10 : i32, message = "bqd,bkd->bqk"}> : () -> ()
    %cst_164 = arith.constant dense<0.000000e+00> : vector<2x8x16xf32>
    %419 = tpu.matmul %416, %417, %cst_164 {dimension_numbers = #tpu.dot_dimension_numbers<[2], [2], [1], [1], [0, 0, 0, 1, 1, 1], [0], [0]>} : vector<2x8x8xf32>, vector<2x16x8xf32>, vector<2x8x16xf32> -> vector<2x8x16xf32>
    "tpu.trace_stop"() : () -> ()
    %cst_165 = arith.constant dense<0xFF800000> : vector<2x8xf32>
    %420 = vector.multi_reduction <maximumf>, %419, %cst_165 [2] : vector<2x8x16xf32> to vector<2x8xf32>
    %421 = vector.shape_cast %420 : vector<2x8xf32> to vector<2x8x1xf32>
    %422 = vector.broadcast %421 : vector<2x8x1xf32> to vector<2x8x16xf32>
    %423 = arith.subf %419, %422 : vector<2x8x16xf32>
    %424 = math.exp %423 : vector<2x8x16xf32>
    %cst_166 = arith.constant dense<0.000000e+00> : vector<2x8xf32>
    %425 = vector.multi_reduction <add>, %424, %cst_166 [2] : vector<2x8x16xf32> to vector<2x8xf32>
    %426 = vector.shape_cast %425 : vector<2x8xf32> to vector<2x8x1xf32>
    %427 = vector.broadcast %426 : vector<2x8x1xf32> to vector<2x8x16xf32>
    %428 = arith.divf %424, %427 : vector<2x8x16xf32>
    "tpu.trace_start"() <{level = 10 : i32, message = "bqk,bkd->bqd"}> : () -> ()
    %cst_167 = arith.constant dense<0.000000e+00> : vector<2x8x8xf32>
    %429 = tpu.matmul %428, %418, %cst_167 {dimension_numbers = #tpu.dot_dimension_numbers<[2], [1], [1], [2], [0, 0, 0, 1, 1, 2], [0], [0]>} : vector<2x8x16xf32>, vector<2x16x8xf32>, vector<2x8x8xf32> -> vector<2x8x8xf32>
    "tpu.trace_stop"() : () -> ()
    %430 = tpu.concatenate %387, %401, %415, %429 in 2 : vector<2x8x8xf32>, vector<2x8x8xf32>, vector<2x8x8xf32>, vector<2x8x8xf32> -> vector<2x8x32xf32>
    %431 = vector.shape_cast %430 : vector<2x8x32xf32> to vector<16x32xf32>
    %cst_168 = arith.constant dense<0.000000e+00> : vector<16x32xf32>
    %432 = tpu.matmul %431, %362, %cst_168 {dimension_numbers = #tpu.dot_dimension_numbers<[1], [0], [0], [1], [0, 0, 1, 1], [], []>} : vector<16x32xf32>, vector<32x32xf32>, vector<16x32xf32> -> vector<16x32xf32>
    %433 = vector.broadcast %365 : vector<1x32xf32> to vector<16x32xf32>
    %434 = arith.addf %432, %433 : vector<16x32xf32>
    %435 = arith.addf %434, %356 : vector<16x32xf32>
    %cst_169 = arith.constant dense<0.000000e+00> : vector<16xf32>
    %436 = vector.multi_reduction <add>, %435, %cst_169 [1] : vector<16x32xf32> to vector<16xf32>
    %437 = vector.shape_cast %436 : vector<16xf32> to vector<16x1xf32>
    %cst_170 = arith.constant 3.200000e+01 : f32
    %438 = vector.broadcast %cst_170 : f32 to vector<16x1xf32>
    %439 = arith.divf %437, %438 : vector<16x1xf32>
    %440 = arith.mulf %435, %435 : vector<16x32xf32>
    %cst_171 = arith.constant dense<0.000000e+00> : vector<16xf32>
    %441 = vector.multi_reduction <add>, %440, %cst_171 [1] : vector<16x32xf32> to vector<16xf32>
    %442 = vector.shape_cast %441 : vector<16xf32> to vector<16x1xf32>
    %cst_172 = arith.constant 3.200000e+01 : f32
    %443 = vector.broadcast %cst_172 : f32 to vector<16x1xf32>
    %444 = arith.divf %442, %443 : vector<16x1xf32>
    %445 = arith.mulf %439, %439 : vector<16x1xf32>
    %446 = arith.subf %444, %445 : vector<16x1xf32>
    %447 = vector.broadcast %439 : vector<16x1xf32> to vector<16x32xf32>
    %448 = arith.subf %435, %447 : vector<16x32xf32>
    %cst_173 = arith.constant 9.99999974E-6 : f32
    %449 = vector.broadcast %cst_173 : f32 to vector<16x1xf32>
    %450 = arith.addf %446, %449 : vector<16x1xf32>
    %451 = math.rsqrt %450 : vector<16x1xf32>
    %452 = vector.broadcast %451 : vector<16x1xf32> to vector<16x32xf32>
    %453 = arith.mulf %448, %452 : vector<16x32xf32>
    %454 = vector.broadcast %251 : vector<1x32xf32> to vector<16x32xf32>
    %455 = arith.mulf %453, %454 : vector<16x32xf32>
    %456 = vector.broadcast %252 : vector<1x32xf32> to vector<16x32xf32>
    %457 = arith.addf %455, %456 : vector<16x32xf32>
    %c1_174 = arith.constant 1 : index
    %c0_175 = arith.constant 0 : index
    %c0_176 = arith.constant 0 : index
    %458 = vector.load %arg5[%c1_174, %c0_175, %c0_176] : memref<2x32x128xf32, #tpu.memory_space<vmem>>, vector<1x32x128xf32>
    %459 = vector.shape_cast %458 : vector<1x32x128xf32> to vector<32x128xf32>
    %cst_177 = arith.constant dense<0.000000e+00> : vector<16x128xf32>
    %460 = tpu.matmul %457, %459, %cst_177 {dimension_numbers = #tpu.dot_dimension_numbers<[1], [0], [0], [1], [0, 0, 1, 1], [], []>} : vector<16x32xf32>, vector<32x128xf32>, vector<16x128xf32> -> vector<16x128xf32>
    %461 = vector.extract_strided_slice %250 {offsets = [6, 0], sizes = [1, 128], strides = [1, 1]} : vector<12x128xf32> to vector<1x128xf32>
    %462 = vector.broadcast %461 : vector<1x128xf32> to vector<16x128xf32>
    %463 = arith.addf %460, %462 : vector<16x128xf32>
    %cst_178 = arith.constant 0.000000e+00 : f32
    %464 = vector.broadcast %cst_178 : f32 to vector<16x128xf32>
    %465 = arith.maximumf %463, %464 : vector<16x128xf32>
    %c1_179 = arith.constant 1 : index
    %c0_180 = arith.constant 0 : index
    %c0_181 = arith.constant 0 : index
    %466 = vector.load %arg6[%c1_179, %c0_180, %c0_181] : memref<2x128x32xf32, #tpu.memory_space<vmem>>, vector<1x128x32xf32>
    %467 = vector.shape_cast %466 : vector<1x128x32xf32> to vector<128x32xf32>
    %cst_182 = arith.constant dense<0.000000e+00> : vector<16x32xf32>
    %468 = tpu.matmul %465, %467, %cst_182 {dimension_numbers = #tpu.dot_dimension_numbers<[1], [0], [0], [1], [0, 0, 1, 1], [], []>} : vector<16x128xf32>, vector<128x32xf32>, vector<16x32xf32> -> vector<16x32xf32>
    %469 = vector.extract_strided_slice %250 {offsets = [7, 0], sizes = [1, 32], strides = [1, 1]} : vector<12x128xf32> to vector<1x32xf32>
    %470 = vector.broadcast %469 : vector<1x32xf32> to vector<16x32xf32>
    %471 = arith.addf %468, %470 : vector<16x32xf32>
    %472 = arith.addf %471, %457 : vector<16x32xf32>
    %cst_183 = arith.constant dense<0.000000e+00> : vector<16xf32>
    %473 = vector.multi_reduction <add>, %472, %cst_183 [1] : vector<16x32xf32> to vector<16xf32>
    %474 = vector.shape_cast %473 : vector<16xf32> to vector<16x1xf32>
    %cst_184 = arith.constant 3.200000e+01 : f32
    %475 = vector.broadcast %cst_184 : f32 to vector<16x1xf32>
    %476 = arith.divf %474, %475 : vector<16x1xf32>
    %477 = arith.mulf %472, %472 : vector<16x32xf32>
    %cst_185 = arith.constant dense<0.000000e+00> : vector<16xf32>
    %478 = vector.multi_reduction <add>, %477, %cst_185 [1] : vector<16x32xf32> to vector<16xf32>
    %479 = vector.shape_cast %478 : vector<16xf32> to vector<16x1xf32>
    %cst_186 = arith.constant 3.200000e+01 : f32
    %480 = vector.broadcast %cst_186 : f32 to vector<16x1xf32>
    %481 = arith.divf %479, %480 : vector<16x1xf32>
    %482 = arith.mulf %476, %476 : vector<16x1xf32>
    %483 = arith.subf %481, %482 : vector<16x1xf32>
    %484 = vector.broadcast %476 : vector<16x1xf32> to vector<16x32xf32>
    %485 = arith.subf %472, %484 : vector<16x32xf32>
    %cst_187 = arith.constant 9.99999974E-6 : f32
    %486 = vector.broadcast %cst_187 : f32 to vector<16x1xf32>
    %487 = arith.addf %483, %486 : vector<16x1xf32>
    %488 = math.rsqrt %487 : vector<16x1xf32>
    %489 = vector.broadcast %488 : vector<16x1xf32> to vector<16x32xf32>
    %490 = arith.mulf %485, %489 : vector<16x32xf32>
    %491 = vector.broadcast %253 : vector<1x32xf32> to vector<16x32xf32>
    %492 = arith.mulf %490, %491 : vector<16x32xf32>
    %493 = vector.broadcast %254 : vector<1x32xf32> to vector<16x32xf32>
    %494 = arith.addf %492, %493 : vector<16x32xf32>
    %c0_188 = arith.constant 0 : index
    %c0_189 = arith.constant 0 : index
    %495 = vector.load %arg8[%c0_188, %c0_189] : memref<16x32xf32, #tpu.memory_space<vmem>>, vector<16x32xf32>
    tpu.vector_store %arg8[%c0_188, %c0_189], %494 {strides = array<i32>} : memref<16x32xf32, #tpu.memory_space<vmem>>, vector<16x32xf32>,
    return
  }
  func.func @transform_0(%arg0: i32) -> (i32, i32) {
    %c0_i32 = arith.constant 0 : i32
    %c0_i32_0 = arith.constant 0 : i32
    %c0_i32_1 = arith.constant 0 : i32
    return %c0_i32, %c0_i32_0 : i32, i32
  }
  func.func @transform_1(%arg0: i32) -> (i32, i32) {
    %c0_i32 = arith.constant 0 : i32
    %c0_i32_0 = arith.constant 0 : i32
    %c0_i32_1 = arith.constant 0 : i32
    return %c0_i32, %c0_i32_0 : i32, i32
  }
  func.func @transform_2(%arg0: i32) -> (i32, i32, i32, i32, i32) {
    %c0_i32 = arith.constant 0 : i32
    %c0_i32_0 = arith.constant 0 : i32
    %c0_i32_1 = arith.constant 0 : i32
    %c0_i32_2 = arith.constant 0 : i32
    %c0_i32_3 = arith.constant 0 : i32
    %c0_i32_4 = arith.constant 0 : i32
    return %c0_i32, %c0_i32_0, %c0_i32_1, %c0_i32_2, %c0_i32_3 : i32, i32, i32, i32, i32
  }
  func.func @transform_3(%arg0: i32) -> (i32, i32, i32, i32) {
    %c0_i32 = arith.constant 0 : i32
    %c0_i32_0 = arith.constant 0 : i32
    %c0_i32_1 = arith.constant 0 : i32
    %c0_i32_2 = arith.constant 0 : i32
    %c0_i32_3 = arith.constant 0 : i32
    return %c0_i32, %c0_i32_0, %c0_i32_1, %c0_i32_2 : i32, i32, i32, i32
  }
  func.func @transform_4(%arg0: i32) -> (i32, i32, i32) {
    %c0_i32 = arith.constant 0 : i32
    %c0_i32_0 = arith.constant 0 : i32
    %c0_i32_1 = arith.constant 0 : i32
    %c0_i32_2 = arith.constant 0 : i32
    return %c0_i32, %c0_i32_0, %c0_i32_1 : i32, i32, i32
  }
  func.func @transform_5(%arg0: i32) -> (i32, i32, i32) {
    %c0_i32 = arith.constant 0 : i32
    %c0_i32_0 = arith.constant 0 : i32
    %c0_i32_1 = arith.constant 0 : i32
    %c0_i32_2 = arith.constant 0 : i32
    return %c0_i32, %c0_i32_0, %c0_i32_1 : i32, i32, i32
  }
  func.func @transform_6(%arg0: i32) -> (i32, i32, i32) {
    %c0_i32 = arith.constant 0 : i32
    %c0_i32_0 = arith.constant 0 : i32
    %c0_i32_1 = arith.constant 0 : i32
    %c0_i32_2 = arith.constant 0 : i32
    return %c0_i32, %c0_i32_0, %c0_i32_1 : i32, i32, i32
  }
  func.func @transform_7(%arg0: i32) -> (i32, i32) {
    %c0_i32 = arith.constant 0 : i32
    %c0_i32_0 = arith.constant 0 : i32
    %c0_i32_1 = arith.constant 0 : i32
    return %c0_i32, %c0_i32_0 : i32, i32
  }
}

</mosaic_0001>

<bundles_post_ra>
// kernel: tpu_custom_call.1
= control target key start
LH: loop header
LB: loop body
LE: loop exit
PB: predicated region body
PF: predicated region fallthrough
CT: control target
= control target key end

     0   :  { %12 = vsyncpa [#allocation3], 0  ;;  %s10377_s0 = inlined_call_operand.hbm [shape: f32[16,32], index: 0, kind: input, shape index: {}]   ;;  %s10378_s1 = inlined_call_operand.hbm [shape: f32[32,32], index: 1, kind: input, shape index: {}]   ;;  %s10379_s2 = inlined_call_operand.vmem [shape: f32[2,2,2,32,32], index: 2, kind: input, shape index: {}]   ;;  %s10380_s3 = inlined_call_operand.hbm [shape: f32[2,2,32,64], index: 3, kind: input, shape index: {}]   ;;  %s10381_s4 = inlined_call_operand.vmem [shape: f32[2,32,128], index: 4, kind: input, shape index: {}]   ;;  %s10382_s5 = inlined_call_operand.vmem [shape: f32[2,128,32], index: 5, kind: input, shape index: {}]   ;;  %s10383_s6 = inlined_call_operand.vmem [shape: f32[2,12,128], index: 6, kind: input, shape index: {}]   ;;  %s10384_s7 = inlined_call_operand.hbm [shape: f32[16,32], index: 7, kind: output, shape index: {}]  }
   0x1   :  { %13 = vsyncpa [#allocation6], 0 }
   0x2   :  { %14 = vsyncpa [#allocation4], 0  ;;  %s9101_s24 = smov [#allocation5]   ;;  %s9102_s26 = smov [#allocation2]  }
   0x3   :  { %s32_s25 = sshll.u32 %s9101_s24, 4  ;;  %s20_s27 = sshll.u32 %s9102_s26, 4  ;;  %s33_s25 = int_to_ptr.vmem [resolvable:$true] %s32_s25  ;;  %s9159_s27 = int_to_ptr.vmem [resolvable:$true] %s20_s27 }
   0x4   :  { %s9007_s30 = scalar_lea.hbm %s10378_s1, 512 }
   0x5   :  { %p9008_p0 = scmp.ne.s32.totalorder %s10378_s1, %s9007_s30  ;;  %p9011_p1 = scmp.lt.u32.totalorder %s9007_s30, %s10378_s1 }
   0x7   :  { %p9013_p2 = pnand %p9011_p1, %p9008_p0 }
   0x9   :  { %9016 = shalt.err (!%p9013_p2)
}
   0xa   :  { %s9017_s12 = scalar_lea.vmem %s33_s25, 512  ;;  %p9022_p4 = scmp.lt.s32.totalorder %s33_s25, %s33_s25 }
   0xb   :  { %p9018_p3 = scmp.ne.s32.totalorder %s33_s25, %s9017_s12  ;;  %p9023_p5 = scmp.lt.s32.totalorder %s9017_s12, %s9017_s12 }
   0xd   :  { %p9024_p6 = por %p9023_p5, %p9022_p4 }
   0xf   :  { %p9025_p7 = pnand %p9024_p6, %p9018_p3 }
  0x11   :  { %9028 = shalt.err (!%p9025_p7)
}
  0x12   :  { %s9103_s13 = smov 128   ;;  %s9104_s14 = smov 8  }
  0x13   :  { %38 = dma.hbm_to_vmem [thread:$0]  %s10378_s1, 512, %s33_s25, [#allocation6], %s9103_s13, %s9103_s13, %s9104_s14  }
  0x14   :  { %s9029_s19 = scalar_lea.hbm %s10377_s0, 256 }
  0x15   :  { %p9030_p8 = scmp.ne.s32.totalorder %s10377_s0, %s9029_s19  ;;  %p9033_p9 = scmp.lt.u32.totalorder %s9029_s19, %s10377_s0 }
  0x17   :  { %p9035_p10 = pnand %p9033_p9, %p9030_p8 }
  0x19   :  { %9038 = shalt.err (!%p9035_p10)
}
  0x1a   :  { %s9039_s24 = scalar_lea.vmem %s9159_s27, 256  ;;  %p9044_p12 = scmp.lt.s32.totalorder %s9159_s27, %s9159_s27 }
  0x1b   :  { %p9040_p11 = scmp.ne.s32.totalorder %s9159_s27, %s9039_s24  ;;  %p9045_p13 = scmp.lt.s32.totalorder %s9039_s24, %s9039_s24 }
  0x1d   :  { %p9046_p0 = por %p9045_p13, %p9044_p12 }
  0x1f   :  { %p9047_p1 = pnand %p9046_p0, %p9040_p11 }
  0x21   :  { %9050 = shalt.err (!%p9047_p1)
}
  0x22   :  { %26 = dma.hbm_to_vmem [thread:$0]  %s10377_s0, 256, %s9159_s27, [#allocation3], %s9103_s13, %s9103_s13, %s9104_s14  }
  0x23   :  { %s9105_s26 = smov [#allocation7]   ;;  %s9051_s8 = scalar_lea.hbm %s10380_s3, 2048 }
  0x24   :  { %s46_s28 = sshll.u32 %s9105_s26, 4  ;;  %p9052_p2 = scmp.ne.s32.totalorder %s10380_s3, %s9051_s8  ;;  %s47_s28 = int_to_ptr.vmem [resolvable:$true] %s46_s28 }
  0x25   :  { %p9055_p3 = scmp.lt.u32.totalorder %s9051_s8, %s10380_s3 }
  0x27   :  { %p9057_p4 = pnand %p9055_p3, %p9052_p2 }
  0x29   :  { %9060 = shalt.err (!%p9057_p4)
}
  0x2a   :  { %s9061_s15 = scalar_lea.vmem %s47_s28, 2048  ;;  %p9066_p6 = scmp.lt.s32.totalorder %s47_s28, %s47_s28 }
  0x2b   :  { %p9062_p5 = scmp.ne.s32.totalorder %s47_s28, %s9061_s15  ;;  %p9067_p7 = scmp.lt.s32.totalorder %s9061_s15, %s9061_s15 }
  0x2d   :  { %p9068_p8 = por %p9067_p7, %p9066_p6 }
  0x2f   :  { %p9069_p9 = pnand %p9068_p8, %p9062_p5 }
  0x31   :  { %9072 = shalt.err (!%p9069_p9)
}
  0x32   :  { %52 = dma.hbm_to_vmem [thread:$0]  %s10380_s3, 2048, %s47_s28, [#allocation6], %s9103_s13, %s9103_s13, %s9104_s14  }
  0x33   :  { %9095 = dma.done.wait [#allocation3], 256  }
  0x34   :  { %9096 = vsyncadd [#allocation3], 4294967040 }
  0x35   :  { %9097 = dma.done.wait [#allocation6], 2560  }
  0x36   :  { %9098 = vsyncadd [#allocation6], 4294964736  ;;  %vm95_vm0 = vcmask 261120   ;;  %v78_v0 = vld [vmem:[%s10379_s2] sm:$0xff]  ;;  %v79_v1 = vld [vmem:[%s10379_s2 + $0x8] sm:$0xff]  ;;  %v9106_v14 = vmov 0.0   ;;  %v91_v15 = vlaneseq }
  0x37   :  { %v80_v2 = vld [vmem:[%s10379_s2 + $0x10] sm:$0xff]  ;;  %v8400_v3 = vpack.c.bf16 %v79_v1, %v78_v0  ;;  %v81_v4 = vld [vmem:[%s10379_s2 + $0x18] sm:$0xff]  ;;  %v9223_v5 = vld [vmem:[#allocation2] sm:$0xff]  ;;  %7808 = vmatprep.subr.mxu0 %v9106_v14  ;;  %vm9107_vm1 = vmmov 0   ;;  %vm256_vm2 = vcmask 64512   ;;  %s9108_s1 = smov 96  }
  0x38   :  { %v8404_v6 = vpack.c.bf16 %v81_v4, %v80_v2  ;;  %7794 = vmatprep.mubr.msk.f32.mxu1 %vm95_vm0, %v9223_v5  ;;  %v82_v7 = vld [vmem:[#allocation7] sm:$0xff]  ;;  %v83_v8 = vld [vmem:[#allocation7 + $0x8] sm:$0xff]  ;;  %v84_v10 = vld [vmem:[#allocation7 + $0x10] sm:$0xff]  ;;  %7810 = vmatprep.mubr.msk.f32.mxu0 %vm9107_vm1, %v9106_v14  ;;  %v9241_v16 = vshrl.u32 %v91_v15, 7  ;;  %s9109_s25 = smov 120   ;;  %s9110_s26 = smov 88  }
  0x39   :  { %8401 = vmatprep.subr.bf16.mxu1 %v8400_v3  ;;  %v8408_v9 = vpack.c.bf16 %v83_v8, %v82_v7  ;;  %v85_v11 = vld [vmem:[#allocation7 + $0x18] sm:$0xff]  ;;  %v9249_v20 = vld [vmem:[%s10383_s6] sm:$0xff]  ;;  %s9111_s28 = smov 112   ;;  %s9112_s29 = smov 80   ;;  %vm1599_vm3 = vcmask 130048   ;;  %vm1602_vm4 = vcmask 195584   ;;  %vm9502_vm5 = vmpackc.low %vm256_vm2, %vm256_vm2 }
  0x3a   :  { %8403 = vmatpush3.bf16.msra.mxu1 %v8400_v3  ;;  %v9227_v12 = vld [vmem:[#allocation2 + $0x8] sm:$0xff]  ;;  %v8412_v13 = vpack.c.bf16 %v85_v11, %v84_v10  ;;  %v9244_v19 = vsub.s32 1, %v9241_v16  ;;  %v9252_v21 = vsub.s32 0, %v9241_v16  ;;  %s9113_s30 = smov 104   ;;  %s9114_s8 = smov 72  }
  0x3b   :  { %8405 = vmatprep.subr.bf16.mxu1 %v8404_v6  ;;  %s9115_s9 = smov 16   ;;  %s9116_s18 = smov 24  }
  0x3c   :  { %v180_v22 = vrot.slane %v9249_v20, %v9244_v19  ;;  %v94_v23 = vrot.slane %v9249_v20, %v9252_v21 }
  0x3e   :  { %8407 = vmatpush3.bf16.msra.mxu1 %v8404_v6 }
  0x3f   :  { %8409 = vmatprep.subr.bf16.mxu1 %v8408_v9 }
  0x41   :  { %7795 = vmatmul.mubr.msk.f32.vlgmr.msra.gmra.mrb[0].mxu1 %vm95_vm0, %v9227_v12 }
  0x42   :  { %8411 = vmatpush3.bf16.msra.mxu1 %v8408_v9  ;;  %7805 = vmatprep.mubr.msk.f32.mxu1 %vm95_vm0, %v9223_v5 }
  0x43   :  { %8413 = vmatprep.subr.bf16.mxu1 %v8412_v13 }
  0x46   :  { %8415 = vmatpush3.bf16.msra.mxu1 %v8412_v13 }
  0x47   :  { %7813 = vmatprep.subr.mxu1 %v9106_v14 }
  0x49   :  { %7806 = vmatmul.mubr.msk.f32.vlgmr.msra.gmra.mrb[2].mxu1 %vm95_vm0, %v9227_v12 }
  0x4a   :  { %7815 = vmatprep.mubr.msk.f32.mxu1 %vm9107_vm1, %v9106_v14 }
 0x114   :  { %v7796_v17 = vpop.f32.mrb[0].mxu1 }
 0x115   :  { %v168_v18 = vpop.f32.mrb[1].mxu1  ;;  %v9266_v28 = vadd.f32 %v7796_v17, %v94_v23 }
 0x116   :  { %v9271_v29 = vadd.f32 %v168_v18, %v94_v23 }
 0x11c   :  { %v7807_v24 = vpop.f32.mrb[2].mxu1 }
 0x11d   :  { %v9258_v25 = vadd.f32 %v7807_v24, %v180_v22  ;;  %v247_v26 = vpop.f32.mrb[3].mxu1 }
 0x11e   :  { %v9260_v27 = vadd.f32 %v247_v26, %v180_v22 }
 0x11f   :  { %507 = vrot.lane.b32.xlu1 %v9258_v25, %s9108_s1  ;;  %7814 = vmatpush3.xpose.msk.msra.mxu1 %vm256_vm2, %v9258_v25 }
 0x120   :  { %7809 = vmatpush3.xpose.msk.msra.mxu0 %vm256_vm2, %v9260_v27  ;;  %7823 = vmatprep.subr.mxu1 %v9106_v14 }
 0x121   :  { %7818 = vmatprep.subr.mxu0 %v9106_v14 }
 0x122   :  { %7816 = vmatmul.mubr.msk.f32.vlgmr.msra.gmra.mrb[4].mxu1 %vm256_vm2, %v9266_v28 }
 0x123   :  { %585 = vrot.lane.b32.xlu1 %v9260_v27, %s9109_s25  ;;  %7811 = vmatmul.mubr.msk.f32.vlgmr.msra.gmra.mrb[0].mxu0 %vm256_vm2, %v9271_v29 }
 0x124   :  { %7825 = vmatprep.mubr.msk.f32.mxu1 %vm9107_vm1, %v9106_v14  ;;  %7820 = vmatprep.mubr.msk.f32.mxu0 %vm9107_vm1, %v9106_v14 }
 0x127   :  { %663 = vrot.lane.b32.xlu1 %v9258_v25, %s9109_s25 }
 0x191   :  { %v508_v30 = vpop.permute.xlu1 %507 }
 0x192   :  { %7824 = vmatpush3.msra.mxu1 %v508_v30 }
 0x193   :  { %7833 = vmatprep.subr.mxu1 %v9106_v14 }
 0x195   :  { %v586_v48 = vpop.permute.xlu1 %585 }
 0x199   :  { %v664_v49 = vpop.permute.xlu1 %663 }
 0x1f5   :  { %v405_v31 = vpop.f32.mrb[4].mxu1 }
 0x1f6   :  { %v329_v32 = vpop.f32.mrb[0].mxu0  ;;  %v7817_v33 = vpop.f32.mrb[5].mxu1  ;;  %v412_v36 = vsel %vm256_vm2, %v405_v31, -inf }
 0x1f7   :  { %v7812_v34 = vpop.f32.mrb[1].mxu0  ;;  %v409_v35 = vsel %vm256_vm2, %v329_v32, -inf }
 0x1f8   :  { %410 = vmax.xlane.f32.xlu0 %v409_v35 }
 0x1fc   :  { %413 = vmax.xlane.f32.xlu0 %v412_v36 }
 0x212   :  { %431 = vrot.lane.b32.xlu0 %v9260_v27, %s9108_s1 }
 0x216   :  { %583 = vrot.lane.b32.xlu0 %v9271_v29, %s9109_s25 }
 0x285   :  { %v411_v37 = vpop.xlane.xlu0 %410 }
 0x286   :  { %v415_v38 = vsub.f32 %v329_v32, %v411_v37 }
 0x288   :  { %v417_v41 = vmul.f32 1.442695, %v415_v38 }
 0x289   :  { %v414_v39 = vpop.xlane.xlu0 %413 }
 0x28a   :  { %v416_v40 = vsub.f32 %v405_v31, %v414_v39 }
 0x28c   :  { %v419_v42 = vmul.f32 1.442695, %v416_v40 }
 0x28d   :  { %v432_v43 = vpop.permute.xlu0 %431 }
 0x28e   :  { %8846 = vpow2.f32 %v419_v42  ;;  %7819 = vmatpush3.msra.mxu0 %v432_v43 }
 0x28f   :  { %7828 = vmatprep.subr.mxu0 %v9106_v14  ;;  %8848 = vpow2.f32 %v417_v41 }
 0x291   :  { %v584_v57 = vpop.permute.xlu0 %583 }
 0x298   :  { %v8847_v44 = vpop.eup %8846 }
 0x299   :  { %v424_v45 = vsel %vm256_vm2, %v8847_v44, 0.0  ;;  %v8849_v46 = vpop.eup %8848 }
 0x29a   :  { %425 = vadd.xlane.f32.xlu1 %v424_v45  ;;  %v421_v47 = vsel %vm256_vm2, %v8849_v46, 0.0 }
 0x29e   :  { %422 = vadd.xlane.f32.xlu1 %v421_v47 }
 0x2af   :  { %661 = vrot.lane.b32.xlu1 %v9266_v28, %s9109_s25 }
 0x327   :  { %v426_v50 = vpop.xlane.xlu1 %425 }
 0x328   :  { %8850 = vrcp.f32 %v426_v50 }
 0x32b   :  { %v423_v51 = vpop.xlane.xlu1 %422 }
 0x32c   :  { %8852 = vrcp.f32 %v423_v51 }
 0x32f   :  { %v662_v56 = vpop.permute.xlu1 %661 }
 0x332   :  { %v8851_v52 = vpop.eup %8850 }
 0x333   :  { %v430_v53 = vmul.f32 %v8851_v52, %v8847_v44 }
 0x335   :  { %7826 = vmatmul.mubr.msk.f32.vlgmr.msra.gmra.mrb[6].mxu1 %vm256_vm2, %v430_v53 }
 0x336   :  { %v8853_v54 = vpop.eup %8852  ;;  %7834 = vmatpush3.xpose.msk.msra.mxu1 %vm256_vm2, %v664_v49  ;;  %7835 = vmatprep.mubr.msk.f32.mxu1 %vm9107_vm1, %v9106_v14 }
 0x337   :  { %v428_v55 = vmul.f32 %v8853_v54, %v8849_v46  ;;  %7843 = vmatprep.subr.mxu1 %v9106_v14 }
 0x339   :  { %7821 = vmatmul.mubr.msk.f32.vlgmr.msra.gmra.mrb[2].mxu0 %vm256_vm2, %v428_v55  ;;  %7836 = vmatmul.mubr.msk.f32.vlgmr.msra.gmra.mrb[8].mxu1 %vm256_vm2, %v662_v56 }
 0x33a   :  { %7829 = vmatpush3.xpose.msk.msra.mxu0 %vm256_vm2, %v586_v48  ;;  %7830 = vmatprep.mubr.msk.f32.mxu0 %vm9107_vm1, %v9106_v14 }
 0x33b   :  { %7838 = vmatprep.subr.mxu0 %v9106_v14  ;;  %7845 = vmatprep.mubr.msk.f32.mxu1 %vm9107_vm1, %v9106_v14 }
 0x33d   :  { %7831 = vmatmul.mubr.msk.f32.vlgmr.msra.gmra.mrb[4].mxu0 %vm256_vm2, %v584_v57 }
 0x33e   :  { %7840 = vmatprep.mubr.msk.f32.mxu0 %vm9107_vm1, %v9106_v14 }
 0x408   :  { %v9314_v58 = vpop.f32.mrb[6].mxu1 }
 0x409   :  { %v7827_v59 = vpop.f32.mrb[7].mxu1 }
 0x40c   :  { %v9316_v60 = vpop.f32.mrb[2].mxu0  ;;  %v735_v61 = vpop.f32.mrb[8].mxu1 }
 0x40d   :  { %v7822_v62 = vpop.f32.mrb[3].mxu0  ;;  %v7837_v63 = vpop.f32.mrb[9].mxu1  ;;  %v742_v0 = vsel %vm256_vm2, %v735_v61, -inf }
 0x40e   :  { %743 = vmax.xlane.f32.xlu1 %v742_v0 }
 0x410   :  { %v657_v1 = vpop.f32.mrb[4].mxu0 }
 0x411   :  { %v7832_v2 = vpop.f32.mrb[5].mxu0  ;;  %v739_v3 = vsel %vm256_vm2, %v657_v1, -inf }
 0x412   :  { %740 = vmax.xlane.f32.xlu0 %v739_v3 }
 0x41f   :  { %837 = vrot.lane.b32.xlu1 %v9258_v25, %s9110_s26 }
 0x423   :  { %915 = vrot.lane.b32.xlu1 %v9260_v27, %s9111_s28 }
 0x427   :  { %993 = vrot.lane.b32.xlu1 %v9258_v25, %s9111_s28 }
 0x428   :  { %761 = vrot.lane.b32.xlu0 %v9260_v27, %s9110_s26 }
 0x42b   :  { %991 = vrot.lane.b32.xlu1 %v9266_v28, %s9111_s28 }
 0x49b   :  { %v744_v4 = vpop.xlane.xlu1 %743 }
 0x49c   :  { %v746_v6 = vsub.f32 %v735_v61, %v744_v4 }
 0x49e   :  { %v749_v7 = vmul.f32 1.442695, %v746_v6 }
 0x49f   :  { %v838_v8 = vpop.permute.xlu1 %837  ;;  %v741_v9 = vpop.xlane.xlu0 %740 }
 0x4a0   :  { %8854 = vpow2.f32 %v749_v7  ;;  %v745_v10 = vsub.f32 %v657_v1, %v741_v9  ;;  %7844 = vmatpush3.msra.mxu1 %v838_v8 }
 0x4a1   :  { %7853 = vmatprep.subr.mxu1 %v9106_v14 }
 0x4a2   :  { %v747_v11 = vmul.f32 1.442695, %v745_v10 }
 0x4a3   :  { %v762_v13 = vpop.permute.xlu0 %761  ;;  %v916_v26 = vpop.permute.xlu1 %915 }
 0x4a4   :  { %8856 = vpow2.f32 %v747_v11  ;;  %7839 = vmatpush3.msra.mxu0 %v762_v13 }
 0x4a5   :  { %7848 = vmatprep.subr.mxu0 %v9106_v14 }
 0x4a7   :  { %v994_v31 = vpop.permute.xlu1 %993 }
 0x4aa   :  { %v8855_v15 = vpop.eup %8854 }
 0x4ab   :  { %v754_v17 = vsel %vm256_vm2, %v8855_v15, 0.0  ;;  %v992_v35 = vpop.permute.xlu1 %991 }
 0x4ac   :  { %755 = vadd.xlane.f32.xlu0 %v754_v17 }
 0x4ae   :  { %v8857_v18 = vpop.eup %8856 }
 0x4af   :  { %v751_v22 = vsel %vm256_vm2, %v8857_v18, 0.0 }
 0x4b0   :  { %752 = vadd.xlane.f32.xlu0 %v751_v22 }
 0x4c6   :  { %913 = vrot.lane.b32.xlu0 %v9271_v29, %s9111_s28 }
 0x539   :  { %v756_v23 = vpop.xlane.xlu0 %755 }
 0x53a   :  { %8858 = vrcp.f32 %v756_v23 }
 0x53d   :  { %v753_v24 = vpop.xlane.xlu0 %752 }
 0x53e   :  { %8860 = vrcp.f32 %v753_v24 }
 0x541   :  { %v914_v36 = vpop.permute.xlu0 %913 }
 0x544   :  { %v8859_v30 = vpop.eup %8858 }
 0x545   :  { %v760_v32 = vmul.f32 %v8859_v30, %v8855_v15 }
 0x547   :  { %7846 = vmatmul.mubr.msk.f32.vlgmr.msra.gmra.mrb[10].mxu1 %vm256_vm2, %v760_v32 }
 0x548   :  { %v8861_v33 = vpop.eup %8860  ;;  %7854 = vmatpush3.xpose.msk.msra.mxu1 %vm256_vm2, %v994_v31  ;;  %7855 = vmatprep.mubr.msk.f32.mxu1 %vm9107_vm1, %v9106_v14 }
 0x549   :  { %v758_v34 = vmul.f32 %v8861_v33, %v8857_v18  ;;  %7863 = vmatprep.subr.mxu1 %v9106_v14 }
 0x54b   :  { %7841 = vmatmul.mubr.msk.f32.vlgmr.msra.gmra.mrb[6].mxu0 %vm256_vm2, %v758_v34  ;;  %7856 = vmatmul.mubr.msk.f32.vlgmr.msra.gmra.mrb[12].mxu1 %vm256_vm2, %v992_v35 }
 0x54c   :  { %7849 = vmatpush3.xpose.msk.msra.mxu0 %vm256_vm2, %v916_v26  ;;  %7850 = vmatprep.mubr.msk.f32.mxu0 %vm9107_vm1, %v9106_v14 }
 0x54d   :  { %7858 = vmatprep.subr.mxu0 %v9106_v14  ;;  %7865 = vmatprep.mubr.msk.f32.mxu1 %vm9107_vm1, %v9106_v14 }
 0x54f   :  { %7851 = vmatmul.mubr.msk.f32.vlgmr.msra.gmra.mrb[8].mxu0 %vm256_vm2, %v914_v36 }
 0x550   :  { %7860 = vmatprep.mubr.msk.f32.mxu0 %vm9107_vm1, %v9106_v14 }
 0x61a   :  { %v9352_v37 = vpop.f32.mrb[10].mxu1 }
 0x61b   :  { %v7847_v38 = vpop.f32.mrb[11].mxu1 }
 0x61e   :  { %v9354_v39 = vpop.f32.mrb[6].mxu0  ;;  %v1065_v40 = vpop.f32.mrb[12].mxu1 }
 0x61f   :  { %v7842_v41 = vpop.f32.mrb[7].mxu0  ;;  %v7857_v42 = vpop.f32.mrb[13].mxu1  ;;  %v1072_v43 = vsel %vm256_vm2, %v1065_v40, -inf }
 0x620   :  { %1073 = vmax.xlane.f32.xlu1 %v1072_v43  ;;  %v7309_v43 = vld [vmem:[%s10379_s2 + $0x28] sm:$0xff] }
 0x622   :  { %v987_v44 = vpop.f32.mrb[8].mxu0 }
 0x623   :  { %v7852_v45 = vpop.f32.mrb[9].mxu0  ;;  %v1069_v46 = vsel %vm256_vm2, %v987_v44, -inf }
 0x624   :  { %1070 = vmax.xlane.f32.xlu0 %v1069_v46  ;;  %v7310_v45 = vld [vmem:[%s10379_s2 + $0x30] sm:$0xff]  ;;  %v7311_v46 = vld [vmem:[%s10379_s2 + $0x38] sm:$0xff] }
 0x631   :  { %1167 = vrot.lane.b32.xlu1 %v9258_v25, %s9112_s29 }
 0x635   :  { %1245 = vrot.lane.b32.xlu1 %v9260_v27, %s9113_s30 }
 0x639   :  { %1323 = vrot.lane.b32.xlu1 %v9258_v25, %s9113_s30 }
 0x63a   :  { %1091 = vrot.lane.b32.xlu0 %v9260_v27, %s9112_s29 }
 0x63d   :  { %1321 = vrot.lane.b32.xlu1 %v9266_v28, %s9113_s30 }
 0x6ad   :  { %v1074_v47 = vpop.xlane.xlu1 %1073 }
 0x6ae   :  { %v1076_v48 = vsub.f32 %v1065_v40, %v1074_v47  ;;  %v8420_v47 = vpack.c.bf16 %v7311_v46, %v7310_v45 }
 0x6b0   :  { %v1079_v49 = vmul.f32 1.442695, %v1076_v48 }
 0x6b1   :  { %v1168_v50 = vpop.permute.xlu1 %1167  ;;  %v1071_v51 = vpop.xlane.xlu0 %1070 }
 0x6b2   :  { %8862 = vpow2.f32 %v1079_v49  ;;  %v1075_v52 = vsub.f32 %v987_v44, %v1071_v51  ;;  %7864 = vmatpush3.msra.mxu1 %v1168_v50 }
 0x6b3   :  { %7873 = vmatprep.subr.mxu1 %v9106_v14 }
 0x6b4   :  { %v1077_v53 = vmul.f32 1.442695, %v1075_v52 }
 0x6b5   :  { %v1092_v54 = vpop.permute.xlu0 %1091  ;;  %v1246_v62 = vpop.permute.xlu1 %1245 }
 0x6b6   :  { %8864 = vpow2.f32 %v1077_v53  ;;  %7859 = vmatpush3.msra.mxu0 %v1092_v54 }
 0x6b7   :  { %7868 = vmatprep.subr.mxu0 %v9106_v14 }
 0x6b9   :  { %v1324_v0 = vpop.permute.xlu1 %1323 }
 0x6bc   :  { %v8863_v55 = vpop.eup %8862 }
 0x6bd   :  { %v1084_v56 = vsel %vm256_vm2, %v8863_v55, 0.0 }
 0x6be   :  { %1085 = vadd.xlane.f32.xlu0 %v1084_v56 }
 0x6c0   :  { %v8865_v28 = vpop.eup %8864 }
 0x6c1   :  { %v1081_v57 = vsel %vm256_vm2, %v8865_v28, 0.0 }
 0x6c2   :  { %1082 = vadd.xlane.f32.xlu0 %v1081_v57 }
 0x6d8   :  { %1243 = vrot.lane.b32.xlu0 %v9271_v29, %s9113_s30  ;;  %v1322_v29 = vpop.permute.xlu1 %1321 }
 0x74b   :  { %v1086_v59 = vpop.xlane.xlu0 %1085 }
 0x74c   :  { %8866 = vrcp.f32 %v1086_v59 }
 0x74f   :  { %v1083_v61 = vpop.xlane.xlu0 %1082 }
 0x750   :  { %8868 = vrcp.f32 %v1083_v61 }
 0x753   :  { %v1244_v4 = vpop.permute.xlu0 %1243 }
 0x756   :  { %v8867_v63 = vpop.eup %8866 }
 0x757   :  { %v1090_v1 = vmul.f32 %v8867_v63, %v8863_v55 }
 0x759   :  { %7866 = vmatmul.mubr.msk.f32.vlgmr.msra.gmra.mrb[14].mxu1 %vm256_vm2, %v1090_v1 }
 0x75a   :  { %v8869_v2 = vpop.eup %8868  ;;  %7874 = vmatpush3.xpose.msk.msra.mxu1 %vm256_vm2, %v1324_v0  ;;  %7875 = vmatprep.mubr.msk.f32.mxu1 %vm9107_vm1, %v9106_v14 }
 0x75b   :  { %v1088_v3 = vmul.f32 %v8869_v2, %v8865_v28  ;;  %7883 = vmatprep.subr.mxu1 %v9106_v14 }
 0x75d   :  { %7861 = vmatmul.mubr.msk.f32.vlgmr.msra.gmra.mrb[10].mxu0 %vm256_vm2, %v1088_v3  ;;  %7876 = vmatmul.mubr.msk.f32.vlgmr.msra.gmra.mrb[16].mxu1 %vm256_vm2, %v1322_v29 }
 0x75e   :  { %7869 = vmatpush3.xpose.msk.msra.mxu0 %vm256_vm2, %v1246_v62  ;;  %7870 = vmatprep.mubr.msk.f32.mxu0 %vm9107_vm1, %v9106_v14 }
 0x75f   :  { %7878 = vmatprep.subr.mxu0 %v9106_v14  ;;  %7885 = vmatprep.mubr.msk.f32.mxu1 %vm9107_vm1, %v9106_v14 }
 0x761   :  { %7871 = vmatmul.mubr.msk.f32.vlgmr.msra.gmra.mrb[12].mxu0 %vm256_vm2, %v1244_v4 }
 0x762   :  { %7880 = vmatprep.mubr.msk.f32.mxu0 %vm9107_vm1, %v9106_v14 }
 0x82c   :  { %v1239_v6 = vpop.f32.mrb[14].mxu1 }
 0x82d   :  { %v7867_v7 = vpop.f32.mrb[15].mxu1 }
 0x830   :  { %v1163_v8 = vpop.f32.mrb[10].mxu0  ;;  %v1395_v9 = vpop.f32.mrb[16].mxu1 }
 0x831   :  { %v7862_v10 = vpop.f32.mrb[11].mxu0  ;;  %v7877_v11 = vpop.f32.mrb[17].mxu1  ;;  %v1402_v13 = vsel %vm256_vm2, %v1395_v9, -inf }
 0x832   :  { %1403 = vmax.xlane.f32.xlu1 %v1402_v13  ;;  %v1741_v11 = vld [vmem:[#allocation7 + $0x20] sm:$0xff]  ;;  %v1742_v13 = vld [vmem:[#allocation7 + $0x28] sm:$0xff] }
 0x834   :  { %v1317_v15 = vpop.f32.mrb[12].mxu0 }
 0x835   :  { %v7872_v17 = vpop.f32.mrb[13].mxu0  ;;  %v1399_v18 = vsel %vm256_vm2, %v1317_v15, -inf }
 0x836   :  { %1400 = vmax.xlane.f32.xlu0 %v1399_v18  ;;  %v1743_v17 = vld [vmem:[#allocation7 + $0x30] sm:$0xff]  ;;  %v1744_v18 = vld [vmem:[#allocation7 + $0x38] sm:$0xff] }
 0x843   :  { %1497 = vrot.lane.b32.xlu1 %v9258_v25, %s9114_s8 }
 0x847   :  { %1575 = vrot.lane.b32.xlu1 %v9354_v39, %s9104_s14 }
 0x84b   :  { %1577 = vrot.lane.b32.xlu1 %v9352_v37, %s9104_s14 }
 0x84f   :  { %1585 = vrot.lane.b32.xlu1 %v1239_v6, %s9115_s9 }
 0x8bf   :  { %v1404_v22 = vpop.xlane.xlu1 %1403 }
 0x8c0   :  { %v1406_v23 = vsub.f32 %v1395_v9, %v1404_v22  ;;  %v8436_v22 = vpack.c.bf16 %v1744_v18, %v1743_v17 }
 0x8c2   :  { %v1409_v24 = vmul.f32 1.442695, %v1406_v23  ;;  %v70_v23 = vld [vmem:[#allocation5] sm:$0xff] }
 0x8c3   :  { %v1498_v26 = vpop.permute.xlu1 %1497  ;;  %v1401_v30 = vpop.xlane.xlu0 %1400 }
 0x8c4   :  { %8870 = vpow2.f32 %v1409_v24  ;;  %v1405_v31 = vsub.f32 %v1317_v15, %v1401_v30  ;;  %7884 = vmatpush3.msra.mxu1 %v1498_v26  ;;  %v8432_v15 = vpack.c.bf16 %v1742_v13, %v1741_v11  ;;  %v71_v24 = vld [vmem:[#allocation5 + $0x8] sm:$0xff]  ;;  %v72_v26 = vld [vmem:[#allocation5 + $0x10] sm:$0xff]  ;;  %v73_v30 = vld [vmem:[#allocation5 + $0x18] sm:$0xff]  ;;  %v9517_v13 = vsub.s32 3, %v9241_v16 }
 0x8c6   :  { %v1407_v32 = vmul.f32 1.442695, %v1405_v31  ;;  %v7342_v31 = vld [vmem:[%s10379_s2 + $0x40] sm:$0xff] }
 0x8c7   :  { %v1576_v52 = vpop.permute.xlu1 %1575 }
 0x8c8   :  { %8872 = vpow2.f32 %v1407_v32  ;;  %v1597_v56 = vsel %vm256_vm2, %v9316_v60, %v1576_v52  ;;  %v9431_v60 = vsub.s32 2, %v9241_v16  ;;  %v7343_v32 = vld [vmem:[%s10379_s2 + $0x48] sm:$0xff] }
 0x8ca   :  { %v1608_v1 = vrot.slane %v9249_v20, %v9431_v60 }
 0x8cb   :  { %v1578_v53 = vpop.permute.xlu1 %1577 }
 0x8cc   :  { %v1598_v57 = vsel %vm256_vm2, %v9314_v58, %v1578_v53 }
 0x8ce   :  { %v8871_v25 = vpop.eup %8870 }
 0x8cf   :  { %v1414_v33 = vsel %vm256_vm2, %v8871_v25, 0.0  ;;  %v1586_v54 = vpop.permute.xlu1 %1585 }
 0x8d0   :  { %1415 = vadd.xlane.f32.xlu0 %v1414_v33  ;;  %v1601_v62 = vsel %vm1599_vm3, %v1598_v57, %v1586_v54  ;;  %v7344_v33 = vld [vmem:[%s10379_s2 + $0x50] sm:$0xff] }
 0x8d2   :  { %v8873_v34 = vpop.eup %8872 }
 0x8d3   :  { %v1411_v35 = vsel %vm256_vm2, %v8873_v34, 0.0 }
 0x8d4   :  { %1412 = vadd.xlane.f32.xlu0 %v1411_v35 }
 0x8ea   :  { %1421 = vrot.lane.b32.xlu0 %v9260_v27, %s9114_s8  ;;  %v7308_v27 = vld [vmem:[%s10379_s2 + $0x20] sm:$0xff] }
 0x8eb   :  { %v8416_v44 = vpack.c.bf16 %v7309_v43, %v7308_v27 }
 0x8ed   :  { %8417 = vmatprep.subr.bf16.mxu1 %v8416_v44 }
 0x8ee   :  { %1583 = vrot.lane.b32.xlu0 %v1163_v8, %s9115_s9 }
 0x95d   :  { %v1416_v36 = vpop.xlane.xlu0 %1415 }
 0x95e   :  { %8874 = vrcp.f32 %v1416_v36  ;;  %v9117_v36 = vmov 0.0|0.0  }
 0x961   :  { %v1413_v37 = vpop.xlane.xlu0 %1412 }
 0x962   :  { %8876 = vrcp.f32 %v1413_v37 }
 0x965   :  { %v1422_v38 = vpop.permute.xlu0 %1421 }
 0x966   :  { %7879 = vmatpush3.msra.mxu0 %v1422_v38 }
 0x967   :  { %8433 = vmatprep.subr.bf16.mxu0 %v8432_v15 }
 0x968   :  { %v8875_v39 = vpop.eup %8874 }
 0x969   :  { %v1420_v40 = vmul.f32 %v8875_v39, %v8871_v25  ;;  %v1584_v55 = vpop.permute.xlu0 %1583  ;;  %v8424_v25 = vpack.c.bf16 %v7343_v32, %v7342_v31 }
 0x96a   :  { %v1600_v59 = vsel %vm1599_vm3, %v1597_v56, %v1584_v55 }
 0x96b   :  { %7886 = vmatmul.mubr.msk.f32.vlgmr.msra.gmra.mrb[18].mxu1 %vm256_vm2, %v1420_v40 }
 0x96c   :  { %v8877_v41 = vpop.eup %8876  ;;  %8419 = vmatpush3.bf16.msra.mxu1 %v8416_v44 }
 0x96d   :  { %v1418_v42 = vmul.f32 %v8877_v41, %v8873_v34  ;;  %8421 = vmatprep.subr.bf16.mxu1 %v8420_v47  ;;  %v7345_v34 = vld [vmem:[%s10379_s2 + $0x58] sm:$0xff] }
 0x96e   :  { %v8428_v35 = vpack.c.bf16 %v7345_v34, %v7344_v33 }
 0x96f   :  { %7881 = vmatmul.mubr.msk.f32.vlgmr.msra.gmra.mrb[14].mxu0 %vm256_vm2, %v1418_v42 }
 0x970   :  { %8423 = vmatpush3.bf16.msra.mxu1 %v8420_v47  ;;  %8435 = vmatpush3.bf16.msra.mxu0 %v8432_v15  ;;  %v1753_v15 = vrot.slane %v9249_v20, %v9517_v13 }
 0x971   :  { %8437 = vmatprep.subr.bf16.mxu0 %v8436_v22  ;;  %7918 = vmatprep.mubr.msk.f32.mxu0 %vm95_vm0, %v70_v23 }
 0x972   :  { %8425 = vmatprep.subr.bf16.mxu1 %v8424_v25 }
 0x974   :  { %8439 = vmatpush3.bf16.msra.mxu0 %v8436_v22 }
 0x975   :  { %8444 = vmatprep.subr.bf16.mxu0 %v9117_v36 }
 0x977   :  { %7919 = vmatmul.mubr.msk.f32.vlgmr.msra.gmra.mrb[16].mxu0 %vm95_vm0, %v71_v24 }
 0x978   :  { %7921 = vmatprep.mubr.msk.f32.mxu0 %vm95_vm0, %v72_v26 }
 0x97b   :  { %7922 = vmatmul.mubr.msk.f32.gmra.mrb[18].mxu0 %vm95_vm0, %v73_v30 }
 0x97c   :  { %7935 = vmatprep.mubr.msk.f32.mxu0 %vm9107_vm1, %v9106_v14 }
 0xa3e   :  { %v1569_v48 = vpop.f32.mrb[18].mxu1 }
 0xa3f   :  { %1593 = vrot.lane.b32.xlu1 %v1569_v48, %s9116_s18  ;;  %v7887_v49 = vpop.f32.mrb[19].mxu1 }
 0xa42   :  { %v1493_v50 = vpop.f32.mrb[14].mxu0 }
 0xa43   :  { %1591 = vrot.lane.b32.xlu0 %v1493_v50, %s9116_s18  ;;  %v7882_v51 = vpop.f32.mrb[15].mxu0  ;;  %v75_v50 = vld [vmem:[%s10383_s6 + $0x8] sm:$0xf] }
 0xa44   :  { %v9476_v52 = vrot.slane %v75_v50, %v9252_v21  ;;  %v9479_v55 = vrot.slane %v75_v50, %v9244_v19 }
 0xab1   :  { %v1594_v28 = vpop.permute.xlu1 %1593 }
 0xab2   :  { %v1604_v0 = vsel %vm1602_vm4, %v1601_v62, %v1594_v28 }
 0xab5   :  { %v1592_v61 = vpop.permute.xlu0 %1591 }
 0xab6   :  { %v1603_v63 = vsel %vm1602_vm4, %v1600_v59, %v1592_v61 }
 0xab7   :  { %7896 = vmatprep.mubr.msk.f32.mxu1 %vm95_vm0, %v1603_v63 }
 0xab8   :  { %7897 = vmatmul.mubr.msk.f32.vlgmr.msra.gmra.mrb[20].mxu1 %vm95_vm0, %v1604_v0  ;;  %v1837_v0 = vsub.s32 4, %v9241_v16 }
 0xab9   :  { %8427 = vmatpush3.bf16.msra.mxu1 %v8424_v25 }
 0xaba   :  { %8429 = vmatprep.subr.bf16.mxu1 %v8428_v35 }
 0xabd   :  { %8431 = vmatpush3.bf16.msra.mxu1 %v8428_v35 }
 0xabe   :  { %8440 = vmatprep.subr.bf16.mxu1 %v9117_v36 }
 0xb8b   :  { %v7898_v58 = vpop.f32.mrb[20].mxu1 }
 0xb8c   :  { %v1687_v2 = vadd.f32 %v7898_v58, %v1608_v1  ;;  %v1681_v3 = vpop.f32.mrb[21].mxu1  ;;  %v7920_v58 = vpop.f32.mrb[16].mxu0 }
 0xb8d   :  { %v1682_v29 = vadd.f32 %v1681_v3, %v1608_v1  ;;  %v1838_v1 = vrot.slane %v9249_v20, %v1837_v0  ;;  %v1917_v3 = vpop.f32.mrb[17].mxu0 }
 0xb8e   :  { %v9436_v4 = vadd.f32 %v1687_v2, %v9227_v12 }
 0xb8f   :  { %v9439_v6 = vadd.f32 %v1682_v29, %v9223_v5  ;;  %v1923_v2 = vadd.f32 %v7920_v58, %v1838_v1  ;;  %v1918_v29 = vadd.f32 %v1917_v3, %v1838_v1 }
 0xb90   :  { %v1695_v7 = vsel %vm95_vm0, %v9436_v4, 0.0  ;;  %v1702_v12 = vmul.f32 %v9436_v4, %v9436_v4 }
 0xb91   :  { %1696 = vadd.xlane.f32.xlu1 %v1695_v7  ;;  %v1692_v8 = vsel %vm95_vm0, %v9439_v6, 0.0  ;;  %v1701_v9 = vmul.f32 %v9439_v6, %v9439_v6  ;;  %v8441_v7 = vpack.c.bf16 %v1923_v2, %v1918_v29 }
 0xb92   :  { %1693 = vadd.xlane.f32.xlu0 %v1692_v8  ;;  %v1706_v5 = vsel %vm95_vm0, %v1702_v12, 0.0 }
 0xb93   :  { %v1703_v10 = vsel %vm95_vm0, %v1701_v9, 0.0 }
 0xb96   :  { %1704 = vadd.xlane.f32.xlu0 %v1703_v10 }
 0xb9a   :  { %1707 = vadd.xlane.f32.xlu0 %v1706_v5  ;;  %v9509_v5 = vpack.i.bf16 %v1923_v2, %v1918_v29 }
 0xc1e   :  { %v1697_v39 = vpop.xlane.xlu1 %1696 }
 0xc1f   :  { %v1694_v37 = vpop.xlane.xlu0 %1693  ;;  %v1700_v41 = vmul.f32 0.03125, %v1697_v39 }
 0xc20   :  { %v1699_v38 = vmul.f32 0.03125, %v1694_v37 }
 0xc21   :  { %v1712_v45 = vmul.f32 %v1700_v41, %v1700_v41  ;;  %v1716_v56 = vsub.f32 %v9436_v4, %v1700_v41 }
 0xc22   :  { %v1711_v42 = vmul.f32 %v1699_v38, %v1699_v38  ;;  %v1715_v51 = vsub.f32 %v9439_v6, %v1699_v38  ;;  %v7923_v6 = vpop.f32.mrb[18].mxu0 }
 0xc23   :  { %v1705_v40 = vpop.xlane.xlu0 %1704  ;;  %v1933_v8 = vadd.f32 %v7923_v6, %v1838_v1  ;;  %v1927_v9 = vpop.f32.mrb[19].mxu0 }
 0xc24   :  { %v1709_v27 = vmul.f32 0.03125, %v1705_v40  ;;  %v1928_v10 = vadd.f32 %v1927_v9, %v1838_v1 }
 0xc26   :  { %v1713_v43 = vsub.f32 %v1709_v27, %v1711_v42  ;;  %v8445_v12 = vpack.c.bf16 %v1933_v8, %v1928_v10  ;;  %v9514_v11 = vpack.i.bf16 %v1933_v8, %v1928_v10 }
 0xc27   :  { %v1708_v44 = vpop.xlane.xlu0 %1707 }
 0xc28   :  { %v1717_v46 = vadd.f32 1e-05, %v1713_v43  ;;  %v1710_v47 = vmul.f32 0.03125, %v1708_v44  ;;  %8447 = vmatpush3.bf16.xpose.msk.msra.mxu0 %vm9502_vm5, %v8445_v12 }
 0xc29   :  { %8454 = vmatprep.subr.bf16.mxu0 %v9117_v36 }
 0xc2a   :  { %8878 = vrsqrt.f32 %v1717_v46  ;;  %v1714_v48 = vsub.f32 %v1710_v47, %v1712_v45 }
 0xc2c   :  { %v1718_v49 = vadd.f32 1e-05, %v1714_v48 }
 0xc2e   :  { %8880 = vrsqrt.f32 %v1718_v49 }
 0xc34   :  { %v8879_v53 = vpop.eup %8878 }
 0xc35   :  { %v1721_v54 = vmul.f32 %v8879_v53, %v1715_v51 }
 0xc37   :  { %v1727_v28 = vmul.f32 %v9476_v52, %v1721_v54 }
 0xc38   :  { %v8881_v57 = vpop.eup %8880 }
 0xc39   :  { %v1722_v59 = vmul.f32 %v8881_v57, %v1716_v56  ;;  %v9484_v61 = vadd.f32 %v9479_v55, %v1727_v28 }
 0xc3b   :  { %7907 = vmatprep.mubr.msk.f32.mxu1 %vm95_vm0, %v9484_v61  ;;  %v1728_v62 = vmul.f32 %v9476_v52, %v1722_v59 }
 0xc3d   :  { %v9490_v63 = vadd.f32 %v9479_v55, %v1728_v62 }
 0xc3f   :  { %7908 = vmatmul.mubr.msk.f32.vlgmr.msra.gmra.mrb[22].mxu1 %vm95_vm0, %v9490_v63 }
 0xc40   :  { %7928 = vmatprep.mubr.msk.f32.mxu1 %vm9107_vm1, %v9106_v14  ;;  %8443 = vmatpush3.bf16.xpose.msk.msra.mxu1 %vm9502_vm5, %v8441_v7 }
 0xc41   :  { %8448 = vmatprep.subr.bf16.mxu1 %v9117_v36 }
 0xd12   :  { %v7909_v17 = vpop.f32.mrb[22].mxu1 }
 0xd13   :  { %v9521_v18 = vadd.f32 %v7909_v17, %v1753_v15  ;;  %v1826_v22 = vpop.f32.mrb[23].mxu1 }
 0xd14   :  { %v9523_v23 = vadd.f32 %v1826_v22, %v1753_v15 }
 0xd15   :  { %7936 = vmatmul.mubr.msk.f32.vlgmr.msra.gmra.mrb[20].mxu0 %vm256_vm2, %v9521_v18 }
 0xd16   :  { %7929 = vmatmul.mubr.msk.f32.vlgmr.msra.gmra.mrb[24].mxu1 %vm256_vm2, %v9523_v23  ;;  %7956 = vmatprep.mubr.msk.f32.mxu0 %vm9107_vm1, %v9106_v14 }
 0xd17   :  { %7942 = vmatprep.mubr.msk.f32.mxu1 %vm9107_vm1, %v9106_v14 }
 0xde8   :  { %v2090_v24 = vpop.f32.mrb[20].mxu0 }
 0xde9   :  { %v2011_v20 = vpop.f32.mrb[24].mxu1  ;;  %v7937_v26 = vpop.f32.mrb[21].mxu0  ;;  %v2097_v30 = vsel %vm1599_vm3, %v2090_v24, -inf }
 0xdea   :  { %2098 = vmax.xlane.f32.xlu1 %v2097_v30  ;;  %v7930_v31 = vpop.f32.mrb[25].mxu1  ;;  %v2094_v32 = vsel %vm1599_vm3, %v2011_v20, -inf }
 0xdeb   :  { %2095 = vmax.xlane.f32.xlu0 %v2094_v32 }
 0xe77   :  { %v2099_v25 = vpop.xlane.xlu1 %2098 }
 0xe78   :  { %v2101_v33 = vsub.f32 %v2090_v24, %v2099_v25  ;;  %v2096_v34 = vpop.xlane.xlu0 %2095 }
 0xe79   :  { %v2100_v35 = vsub.f32 %v2011_v20, %v2096_v34 }
 0xe7a   :  { %v2104_v37 = vmul.f32 1.442695, %v2101_v33 }
 0xe7b   :  { %v2102_v38 = vmul.f32 1.442695, %v2100_v35 }
 0xe7c   :  { %8882 = vpow2.f32 %v2104_v37 }
 0xe7d   :  { %8884 = vpow2.f32 %v2102_v38 }
 0xe86   :  { %v8883_v39 = vpop.eup %8882 }
 0xe87   :  { %v8885_v40 = vpop.eup %8884  ;;  %v2109_v41 = vsel %vm1599_vm3, %v8883_v39, 0.0 }
 0xe88   :  { %2110 = vadd.xlane.f32.xlu1 %v2109_v41  ;;  %v2106_v42 = vsel %vm1599_vm3, %v8885_v40, 0.0 }
 0xe89   :  { %2107 = vadd.xlane.f32.xlu0 %v2106_v42 }
 0xe99   :  { %8712 = vrot.lane.b32.xlu1 %v9514_v11, %s9108_s1 }
 0xe9d   :  { %8717 = vrot.lane.b32.xlu1 %v9509_v5, %s9109_s25 }
 0xe9f   :  { %8707 = vrot.lane.b32.xlu0 %v9509_v5, %s9108_s1 }
 0xea1   :  { %8722 = vrot.lane.b32.xlu1 %v9514_v11, %s9109_s25 }
 0xea3   :  { %2274 = vrot.lane.b32.xlu0 %v9523_v23, %s9109_s25 }
 0xea5   :  { %2356 = vrot.lane.b32.xlu1 %v9521_v18, %s9109_s25 }
 0xf15   :  { %v2111_v27 = vpop.xlane.xlu1 %2110 }
 0xf16   :  { %v2108_v43 = vpop.xlane.xlu0 %2107 }
 0xf17   :  { %8886 = vrcp.f32 %v2108_v43 }
 0xf18   :  { %8888 = vrcp.f32 %v2111_v27 }
 0xf19   :  { %v8713_v44 = vpop.permute.xlu1 %8712 }
 0xf1a   :  { %v8708_v45 = vpop.permute.xlu0 %8707  ;;  %v8715_v53 = vunpack.i.h.bf16 %v8713_v44  ;;  %v8714_v54 = vunpack.i.l.bf16 %v8713_v44 }
 0xf1b   :  { %v8710_v46 = vunpack.i.h.bf16 %v8708_v45  ;;  %v8709_v47 = vunpack.i.l.bf16 %v8708_v45 }
 0xf1c   :  { %v8452_v62 = vpack.c.bf16 %v8715_v53, %v8714_v54 }
 0xf1d   :  { %v8449_v48 = vpack.c.bf16 %v8710_v46, %v8709_v47  ;;  %v8718_v49 = vpop.permute.xlu1 %8717 }
 0xf1e   :  { %v8720_v50 = vunpack.i.h.bf16 %v8718_v49  ;;  %v8719_v51 = vunpack.i.l.bf16 %v8718_v49  ;;  %v2275_v2 = vpop.permute.xlu0 %2274 }
 0xf1f   :  { %8450 = vmatpush3.bf16.msra.mxu1 %v8449_v48 }
 0xf20   :  { %v8455_v56 = vpack.c.bf16 %v8720_v50, %v8719_v51  ;;  %8451 = vmatprep.subr.bf16.mxu1 %v9117_v36 }
 0xf21   :  { %v8887_v28 = vpop.eup %8886  ;;  %v8723_v1 = vpop.permute.xlu1 %8722 }
 0xf22   :  { %8457 = vmatpush3.bf16.xpose.msk.msra.mxu0 %vm9502_vm5, %v8455_v56  ;;  %v2113_v57 = vmul.f32 %v8887_v28, %v8885_v40  ;;  %v8889_v59 = vpop.eup %8888  ;;  %v8725_v3 = vunpack.i.h.bf16 %v8723_v1  ;;  %v8724_v29 = vunpack.i.l.bf16 %v8723_v1 }
 0xf23   :  { %8462 = vmatprep.subr.bf16.mxu0 %v9117_v36  ;;  %v2115_v58 = vmul.f32 %v8889_v59, %v8883_v39 }
 0xf24   :  { %7943 = vmatmul.mubr.msk.f32.vlgmr.msra.gmra.mrb[26].mxu1 %vm1599_vm3, %v2113_v57  ;;  %v8459_v6 = vpack.c.bf16 %v8725_v3, %v8724_v29 }
 0xf25   :  { %8453 = vmatpush3.bf16.msra.mxu1 %v8452_v62  ;;  %7949 = vmatprep.mubr.msk.f32.mxu1 %vm9107_vm1, %v9106_v14  ;;  %v2357_v7 = vpop.permute.xlu1 %2356 }
 0xf26   :  { %8458 = vmatprep.subr.bf16.mxu1 %v9117_v36 }
 0xf28   :  { %7950 = vmatmul.mubr.msk.f32.vlgmr.msra.gmra.mrb[28].mxu1 %vm1599_vm3, %v2115_v58 }
 0xf29   :  { %7957 = vmatmul.mubr.msk.f32.vlgmr.msra.gmra.mrb[22].mxu0 %vm256_vm2, %v2275_v2  ;;  %7963 = vmatprep.mubr.msk.f32.mxu1 %vm9107_vm1, %v9106_v14 }
 0xf2a   :  { %7970 = vmatprep.mubr.msk.f32.mxu0 %vm9107_vm1, %v9106_v14 }
 0xf2e   :  { %8461 = vmatpush3.bf16.xpose.msk.msra.mxu1 %vm9502_vm5, %v8459_v6 }
 0xf2f   :  { %8465 = vmatprep.subr.bf16.mxu1 %v9117_v36 }
 0xf35   :  { %7964 = vmatmul.mubr.msk.f32.vlgmr.msra.gmra.mrb[30].mxu1 %vm256_vm2, %v2357_v7 }
 0xf36   :  { %7977 = vmatprep.mubr.msk.f32.mxu1 %vm9107_vm1, %v9106_v14 }
 0xff7   :  { %v9569_v8 = vpop.f32.mrb[26].mxu1 }
 0xff8   :  { %v7944_v9 = vpop.f32.mrb[27].mxu1 }
 0xffb   :  { %v9571_v10 = vpop.f32.mrb[28].mxu1 }
 0xffc   :  { %v7951_v12 = vpop.f32.mrb[29].mxu1  ;;  %v2352_v15 = vpop.f32.mrb[22].mxu0 }
 0xffd   :  { %v7958_v17 = vpop.f32.mrb[23].mxu0  ;;  %v2438_v22 = vsel %vm1599_vm3, %v2352_v15, -inf }
 0xffe   :  { %2439 = vmax.xlane.f32.xlu0 %v2438_v22 }
0x1008   :  { %v2434_v24 = vpop.f32.mrb[30].mxu1 }
0x1009   :  { %v7965_v20 = vpop.f32.mrb[31].mxu1  ;;  %v2441_v26 = vsel %vm1599_vm3, %v2434_v24, -inf }
0x100a   :  { %2442 = vmax.xlane.f32.xlu1 %v2441_v26 }
0x101b   :  { %8732 = vrot.lane.b32.xlu1 %v9514_v11, %s9110_s26 }
0x101f   :  { %8737 = vrot.lane.b32.xlu1 %v9509_v5, %s9111_s28 }
0x1023   :  { %8742 = vrot.lane.b32.xlu1 %v9514_v11, %s9111_s28 }
0x1027   :  { %2700 = vrot.lane.b32.xlu1 %v9521_v18, %s9111_s28 }
0x108b   :  { %v2440_v30 = vpop.xlane.xlu0 %2439 }
0x108c   :  { %v2444_v31 = vsub.f32 %v2352_v15, %v2440_v30 }
0x108e   :  { %v2446_v32 = vmul.f32 1.442695, %v2444_v31 }
0x1090   :  { %8890 = vpow2.f32 %v2446_v32 }
0x1097   :  { %v2443_v25 = vpop.xlane.xlu1 %2442 }
0x1098   :  { %v2445_v33 = vsub.f32 %v2434_v24, %v2443_v25 }
0x109a   :  { %v8891_v34 = vpop.eup %8890  ;;  %v2448_v35 = vmul.f32 1.442695, %v2445_v33 }
0x109b   :  { %v8733_v37 = vpop.permute.xlu1 %8732  ;;  %v2450_v38 = vsel %vm1599_vm3, %v8891_v34, 0.0 }
0x109c   :  { %8892 = vpow2.f32 %v2448_v35  ;;  %v8735_v39 = vunpack.i.h.bf16 %v8733_v37  ;;  %v8734_v40 = vunpack.i.l.bf16 %v8733_v37  ;;  %2451 = vadd.xlane.f32.xlu0 %v2450_v38 }
0x109e   :  { %v8466_v41 = vpack.c.bf16 %v8735_v39, %v8734_v40 }
0x109f   :  { %v8738_v44 = vpop.permute.xlu1 %8737 }
0x10a0   :  { %8467 = vmatpush3.bf16.msra.mxu1 %v8466_v41  ;;  %v8740_v57 = vunpack.i.h.bf16 %v8738_v44  ;;  %v8739_v59 = vunpack.i.l.bf16 %v8738_v44 }
0x10a1   :  { %8472 = vmatprep.subr.bf16.mxu1 %v9117_v36 }
0x10a2   :  { %v8469_v58 = vpack.c.bf16 %v8740_v57, %v8739_v59 }
0x10a3   :  { %v8743_v49 = vpop.permute.xlu1 %8742 }
0x10a4   :  { %v8745_v53 = vunpack.i.h.bf16 %v8743_v49  ;;  %v8744_v54 = vunpack.i.l.bf16 %v8743_v49 }
0x10a6   :  { %v8893_v42 = vpop.eup %8892  ;;  %v8473_v1 = vpack.c.bf16 %v8745_v53, %v8744_v54 }
0x10a7   :  { %v2453_v27 = vsel %vm1599_vm3, %v8893_v42, 0.0  ;;  %v2701_v2 = vpop.permute.xlu1 %2700 }
0x10a8   :  { %2454 = vadd.xlane.f32.xlu0 %v2453_v27 }
0x10be   :  { %8727 = vrot.lane.b32.xlu0 %v9509_v5, %s9110_s26 }
0x10c2   :  { %2618 = vrot.lane.b32.xlu0 %v9523_v23, %s9111_s28 }
0x1129   :  { %v2452_v43 = vpop.xlane.xlu0 %2451 }
0x112a   :  { %8894 = vrcp.f32 %v2452_v43 }
0x1134   :  { %v8895_v50 = vpop.eup %8894 }
0x1135   :  { %v2455_v45 = vpop.xlane.xlu0 %2454  ;;  %v2457_v56 = vmul.f32 %v8895_v50, %v8891_v34 }
0x1136   :  { %8896 = vrcp.f32 %v2455_v45 }
0x1139   :  { %v8728_v46 = vpop.permute.xlu0 %8727 }
0x113a   :  { %v8730_v47 = vunpack.i.h.bf16 %v8728_v46  ;;  %v8729_v48 = vunpack.i.l.bf16 %v8728_v46 }
0x113c   :  { %v8463_v51 = vpack.c.bf16 %v8730_v47, %v8729_v48 }
0x113d   :  { %v2619_v3 = vpop.permute.xlu0 %2618 }
0x113e   :  { %8464 = vmatpush3.bf16.msra.mxu0 %v8463_v51 }
0x113f   :  { %8468 = vmatprep.subr.bf16.mxu0 %v9117_v36 }
0x1140   :  { %v8897_v28 = vpop.eup %8896 }
0x1141   :  { %7971 = vmatmul.mubr.msk.f32.vlgmr.msra.gmra.mrb[24].mxu0 %vm1599_vm3, %v2457_v56  ;;  %v2459_v62 = vmul.f32 %v8897_v28, %v8893_v42 }
0x1142   :  { %7984 = vmatprep.mubr.msk.f32.mxu0 %vm9107_vm1, %v9106_v14 }
0x1143   :  { %7978 = vmatmul.mubr.msk.f32.vlgmr.msra.gmra.mrb[32].mxu1 %vm1599_vm3, %v2459_v62 }
0x1144   :  { %8475 = vmatpush3.bf16.xpose.msk.msra.mxu1 %vm9502_vm5, %v8473_v1  ;;  %7991 = vmatprep.mubr.msk.f32.mxu1 %vm9107_vm1, %v9106_v14 }
0x1145   :  { %8479 = vmatprep.subr.bf16.mxu1 %v9117_v36 }
0x1147   :  { %8471 = vmatpush3.bf16.xpose.msk.msra.mxu0 %vm9502_vm5, %v8469_v58 }
0x1148   :  { %8476 = vmatprep.subr.bf16.mxu0 %v9117_v36 }
0x114b   :  { %7992 = vmatmul.mubr.msk.f32.vlgmr.msra.gmra.mrb[34].mxu1 %vm256_vm2, %v2701_v2 }
0x114c   :  { %8005 = vmatprep.mubr.msk.f32.mxu1 %vm9107_vm1, %v9106_v14 }
0x114e   :  { %7985 = vmatmul.mubr.msk.f32.vlgmr.msra.gmra.mrb[26].mxu0 %vm256_vm2, %v2619_v3 }
0x114f   :  { %7998 = vmatprep.mubr.msk.f32.mxu0 %vm9107_vm1, %v9106_v14 }
0x1214   :  { %v9609_v29 = vpop.f32.mrb[24].mxu0 }
0x1215   :  { %v7972_v6 = vpop.f32.mrb[25].mxu0 }
0x1216   :  { %v9611_v7 = vpop.f32.mrb[32].mxu1 }
0x1217   :  { %v7979_v9 = vpop.f32.mrb[33].mxu1 }
0x121e   :  { %v2778_v12 = vpop.f32.mrb[34].mxu1 }
0x121f   :  { %v7993_v15 = vpop.f32.mrb[35].mxu1  ;;  %v2785_v17 = vsel %vm1599_vm3, %v2778_v12, -inf }
0x1220   :  { %2786 = vmax.xlane.f32.xlu1 %v2785_v17 }
0x1221   :  { %v2696_v22 = vpop.f32.mrb[26].mxu0 }
0x1222   :  { %v7986_v24 = vpop.f32.mrb[27].mxu0  ;;  %v2782_v20 = vsel %vm1599_vm3, %v2696_v22, -inf }
0x1223   :  { %2783 = vmax.xlane.f32.xlu0 %v2782_v20 }
0x1231   :  { %8752 = vrot.lane.b32.xlu1 %v9514_v11, %s9112_s29 }
0x1235   :  { %8757 = vrot.lane.b32.xlu1 %v9509_v5, %s9113_s30 }
0x1239   :  { %8762 = vrot.lane.b32.xlu1 %v9514_v11, %s9113_s30 }
0x123d   :  { %3044 = vrot.lane.b32.xlu1 %v9521_v18, %s9113_s30 }
0x12ad   :  { %v2787_v26 = vpop.xlane.xlu1 %2786 }
0x12ae   :  { %v2789_v30 = vsub.f32 %v2778_v12, %v2787_v26 }
0x12b0   :  { %v2784_v31 = vpop.xlane.xlu0 %2783  ;;  %v2792_v35 = vmul.f32 1.442695, %v2789_v30 }
0x12b1   :  { %v2788_v32 = vsub.f32 %v2696_v22, %v2784_v31  ;;  %v8753_v25 = vpop.permute.xlu1 %8752 }
0x12b2   :  { %v8755_v33 = vunpack.i.h.bf16 %v8753_v25  ;;  %v8754_v34 = vunpack.i.l.bf16 %v8753_v25 }
0x12b3   :  { %v2790_v37 = vmul.f32 1.442695, %v2788_v32 }
0x12b4   :  { %v8480_v38 = vpack.c.bf16 %v8755_v33, %v8754_v34 }
0x12b5   :  { %8898 = vpow2.f32 %v2790_v37  ;;  %v8758_v27 = vpop.permute.xlu1 %8757 }
0x12b6   :  { %8481 = vmatpush3.bf16.msra.mxu1 %v8480_v38  ;;  %8900 = vpow2.f32 %v2792_v35  ;;  %v8760_v56 = vunpack.i.h.bf16 %v8758_v27 }
0x12b7   :  { %8486 = vmatprep.subr.bf16.mxu1 %v9117_v36 }
0x12b9   :  { %v8763_v47 = vpop.permute.xlu1 %8762 }
0x12ba   :  { %v8765_v50 = vunpack.i.h.bf16 %v8763_v47  ;;  %v8764_v51 = vunpack.i.l.bf16 %v8763_v47  ;;  %v7347_v47 = vld [vmem:[%s10379_s2 + $0x68] sm:$0xff] }
0x12bc   :  { %v8487_v57 = vpack.c.bf16 %v8765_v50, %v8764_v51  ;;  %v7349_v50 = vld [vmem:[%s10379_s2 + $0x78] sm:$0xff] }
0x12bd   :  { %v3045_v62 = vpop.permute.xlu1 %3044 }
0x12bf   :  { %v8899_v39 = vpop.eup %8898 }
0x12c0   :  { %v2794_v40 = vsel %vm1599_vm3, %v8899_v39, 0.0  ;;  %v8901_v41 = vpop.eup %8900 }
0x12c1   :  { %2795 = vadd.xlane.f32.xlu0 %v2794_v40  ;;  %v2797_v18 = vsel %vm1599_vm3, %v8901_v41, 0.0 }
0x12c5   :  { %2798 = vadd.xlane.f32.xlu0 %v2797_v18 }
0x12db   :  { %8747 = vrot.lane.b32.xlu0 %v9509_v5, %s9112_s29 }
0x12df   :  { %2962 = vrot.lane.b32.xlu0 %v9523_v23, %s9113_s30  ;;  %v8759_v23 = vunpack.i.l.bf16 %v8758_v27 }
0x12e1   :  { %v8483_v59 = vpack.c.bf16 %v8760_v56, %v8759_v23 }
0x134e   :  { %v2796_v42 = vpop.xlane.xlu0 %2795 }
0x134f   :  { %8902 = vrcp.f32 %v2796_v42 }
0x1352   :  { %v2799_v43 = vpop.xlane.xlu0 %2798 }
0x1353   :  { %8904 = vrcp.f32 %v2799_v43 }
0x1356   :  { %v8748_v44 = vpop.permute.xlu0 %8747 }
0x1357   :  { %v8750_v45 = vunpack.i.h.bf16 %v8748_v44  ;;  %v8749_v46 = vunpack.i.l.bf16 %v8748_v44 }
0x1359   :  { %v8903_v48 = vpop.eup %8902  ;;  %v8477_v49 = vpack.c.bf16 %v8750_v45, %v8749_v46 }
0x135a   :  { %v2801_v53 = vmul.f32 %v8903_v48, %v8899_v39  ;;  %v2963_v1 = vpop.permute.xlu0 %2962  ;;  %v7348_v48 = vld [vmem:[%s10379_s2 + $0x70] sm:$0xff] }
0x135b   :  { %8478 = vmatpush3.bf16.msra.mxu0 %v8477_v49  ;;  %v8500_v51 = vpack.c.bf16 %v7349_v50, %v7348_v48  ;;  %v3556_v48 = vld [vmem:[%s10382_s5 + $0x40] sm:$0xff] }
0x135c   :  { %8482 = vmatprep.subr.bf16.mxu0 %v9117_v36 }
0x135d   :  { %v8905_v54 = vpop.eup %8904 }
0x135e   :  { %7999 = vmatmul.mubr.msk.f32.vlgmr.msra.gmra.mrb[28].mxu0 %vm1599_vm3, %v2801_v53  ;;  %v2803_v28 = vmul.f32 %v8905_v54, %v8901_v41 }
0x135f   :  { %8012 = vmatprep.mubr.msk.f32.mxu0 %vm9107_vm1, %v9106_v14 }
0x1360   :  { %8006 = vmatmul.mubr.msk.f32.vlgmr.msra.gmra.mrb[36].mxu1 %vm1599_vm3, %v2803_v28 }
0x1361   :  { %8489 = vmatpush3.bf16.xpose.msk.msra.mxu1 %vm9502_vm5, %v8487_v57  ;;  %8019 = vmatprep.mubr.msk.f32.mxu1 %vm9107_vm1, %v9106_v14 }
0x1362   :  { %8493 = vmatprep.subr.bf16.mxu1 %v9117_v36 }
0x1364   :  { %8485 = vmatpush3.bf16.xpose.msk.msra.mxu0 %vm9502_vm5, %v8483_v59 }
0x1365   :  { %8490 = vmatprep.subr.bf16.mxu0 %v9117_v36 }
0x1368   :  { %8020 = vmatmul.mubr.msk.f32.vlgmr.msra.gmra.mrb[38].mxu1 %vm256_vm2, %v3045_v62 }
0x1369   :  { %8033 = vmatprep.mubr.msk.f32.mxu1 %vm9107_vm1, %v9106_v14 }
0x136b   :  { %8013 = vmatmul.mubr.msk.f32.vlgmr.msra.gmra.mrb[30].mxu0 %vm256_vm2, %v2963_v1 }
0x136c   :  { %8026 = vmatprep.mubr.msk.f32.mxu0 %vm9107_vm1, %v9106_v14 }
0x1431   :  { %v2879_v58 = vpop.f32.mrb[28].mxu0 }
0x1432   :  { %v8000_v2 = vpop.f32.mrb[29].mxu0 }
0x1433   :  { %v2958_v3 = vpop.f32.mrb[36].mxu1 }
0x1434   :  { %v8007_v6 = vpop.f32.mrb[37].mxu1 }
0x143b   :  { %v3122_v9 = vpop.f32.mrb[38].mxu1 }
0x143c   :  { %v8021_v12 = vpop.f32.mrb[39].mxu1  ;;  %v3129_v15 = vsel %vm1599_vm3, %v3122_v9, -inf }
0x143d   :  { %3130 = vmax.xlane.f32.xlu1 %v3129_v15 }
0x143e   :  { %v3040_v17 = vpop.f32.mrb[30].mxu0 }
0x143f   :  { %v8014_v22 = vpop.f32.mrb[31].mxu0  ;;  %v3126_v24 = vsel %vm1599_vm3, %v3040_v17, -inf }
0x1440   :  { %3127 = vmax.xlane.f32.xlu0 %v3126_v24 }
0x144e   :  { %8772 = vrot.lane.b32.xlu1 %v9514_v11, %s9114_s8 }
0x1452   :  { %3308 = vrot.lane.b32.xlu1 %v9609_v29, %s9104_s14 }
0x1456   :  { %3310 = vrot.lane.b32.xlu1 %v9611_v7, %s9104_s14 }
0x145a   :  { %3318 = vrot.lane.b32.xlu1 %v2958_v3, %s9115_s9 }
0x14ca   :  { %v3131_v20 = vpop.xlane.xlu1 %3130 }
0x14cb   :  { %v3133_v26 = vsub.f32 %v3122_v9, %v3131_v20 }
0x14cd   :  { %v3128_v30 = vpop.xlane.xlu0 %3127  ;;  %v3136_v34 = vmul.f32 1.442695, %v3133_v26 }
0x14ce   :  { %v3132_v31 = vsub.f32 %v3040_v17, %v3128_v30  ;;  %v8773_v32 = vpop.permute.xlu1 %8772  ;;  %v3338_v17 = vsub.s32 5, %v9241_v16 }
0x14cf   :  { %v8775_v25 = vunpack.i.h.bf16 %v8773_v32  ;;  %v8774_v33 = vunpack.i.l.bf16 %v8773_v32 }
0x14d0   :  { %v3134_v35 = vmul.f32 1.442695, %v3132_v31 }
0x14d1   :  { %v8494_v37 = vpack.c.bf16 %v8775_v25, %v8774_v33 }
0x14d2   :  { %8906 = vpow2.f32 %v3134_v35  ;;  %v3309_v28 = vpop.permute.xlu1 %3308  ;;  %v3457_v35 = vld [vmem:[%s10381_s4] sm:$0xff] }
0x14d3   :  { %8495 = vmatpush3.bf16.msra.mxu1 %v8494_v37  ;;  %8908 = vpow2.f32 %v3136_v34  ;;  %v3330_v1 = vsel %vm256_vm2, %v9569_v8, %v3309_v28  ;;  %v9693_v8 = vld [vmem:[%s10383_s6] sm:$0xff]  ;;  %v3458_v37 = vld [vmem:[%s10381_s4 + $0x8] sm:$0xff] }
0x14d6   :  { %v3311_v57 = vpop.permute.xlu1 %3310 }
0x14d7   :  { %v3331_v3 = vsel %vm256_vm2, %v9571_v10, %v3311_v57  ;;  %v3339_v10 = vrot.slane %v9693_v8, %v3338_v17 }
0x14da   :  { %v3319_v62 = vpop.permute.xlu1 %3318 }
0x14db   :  { %v3333_v9 = vsel %vm1599_vm3, %v3331_v3, %v3319_v62 }
0x14dc   :  { %v8907_v11 = vpop.eup %8906 }
0x14dd   :  { %v3138_v29 = vsel %vm1599_vm3, %v8907_v11, 0.0  ;;  %v8909_v38 = vpop.eup %8908 }
0x14de   :  { %3139 = vadd.xlane.f32.xlu0 %v3138_v29  ;;  %v3141_v7 = vsel %vm1599_vm3, %v8909_v38, 0.0  ;;  %v3459_v29 = vld [vmem:[%s10381_s4 + $0x10] sm:$0xff] }
0x14e2   :  { %3142 = vadd.xlane.f32.xlu0 %v3141_v7 }
0x14f8   :  { %8767 = vrot.lane.b32.xlu0 %v9509_v5, %s9114_s8  ;;  %v7346_v5 = vld [vmem:[%s10379_s2 + $0x60] sm:$0xff] }
0x14f9   :  { %v8496_v49 = vpack.c.bf16 %v7347_v47, %v7346_v5  ;;  %v3555_v5 = vld [vmem:[%s10382_s5 + $0x38] sm:$0xff] }
0x14fc   :  { %3316 = vrot.lane.b32.xlu0 %v2879_v58, %s9115_s9 }
0x156b   :  { %v3140_v39 = vpop.xlane.xlu0 %3139 }
0x156c   :  { %8910 = vrcp.f32 %v3140_v39  ;;  %v3548_v39 = vld [vmem:[%s10382_s5] sm:$0xff] }
0x156f   :  { %v3143_v40 = vpop.xlane.xlu0 %3142 }
0x1570   :  { %8912 = vrcp.f32 %v3143_v40  ;;  %v3549_v40 = vld [vmem:[%s10382_s5 + $0x8] sm:$0xff] }
0x1573   :  { %v8768_v41 = vpop.permute.xlu0 %8767 }
0x1574   :  { %v8770_v18 = vunpack.i.h.bf16 %v8768_v41  ;;  %v8769_v42 = vunpack.i.l.bf16 %v8768_v41  ;;  %v3550_v41 = vld [vmem:[%s10382_s5 + $0x10] sm:$0xff] }
0x1576   :  { %v8911_v27 = vpop.eup %8910  ;;  %v8491_v43 = vpack.c.bf16 %v8770_v18, %v8769_v42  ;;  %v8512_v18 = vpack.c.bf16 %v3549_v40, %v3548_v39  ;;  %v3551_v42 = vld [vmem:[%s10382_s5 + $0x18] sm:$0xff] }
0x1577   :  { %v3145_v44 = vmul.f32 %v8911_v27, %v8907_v11  ;;  %v3317_v59 = vpop.permute.xlu0 %3316  ;;  %v8504_v11 = vpack.c.bf16 %v3458_v37, %v3457_v35  ;;  %v8516_v27 = vpack.c.bf16 %v3551_v42, %v3550_v41 }
0x1578   :  { %8492 = vmatpush3.bf16.msra.mxu0 %v8491_v43  ;;  %v3332_v58 = vsel %vm1599_vm3, %v3330_v1, %v3317_v59  ;;  %v3552_v43 = vld [vmem:[%s10382_s5 + $0x20] sm:$0xff] }
0x1579   :  { %8497 = vmatprep.subr.bf16.mxu0 %v8496_v49  ;;  %8505 = vmatprep.subr.bf16.mxu1 %v8504_v11 }
0x157a   :  { %v8913_v45 = vpop.eup %8912 }
0x157b   :  { %8027 = vmatmul.mubr.msk.f32.vlgmr.msra.gmra.mrb[32].mxu0 %vm1599_vm3, %v3145_v44  ;;  %v3147_v46 = vmul.f32 %v8913_v45, %v8909_v38  ;;  %v3460_v38 = vld [vmem:[%s10381_s4 + $0x18] sm:$0xff]  ;;  %v3553_v44 = vld [vmem:[%s10382_s5 + $0x28] sm:$0xff] }
0x157c   :  { %8499 = vmatpush3.bf16.msra.mxu0 %v8496_v49  ;;  %v8508_v7 = vpack.c.bf16 %v3460_v38, %v3459_v29  ;;  %v8520_v45 = vpack.c.bf16 %v3553_v44, %v3552_v43  ;;  %v3557_v49 = vld [vmem:[%s10382_s5 + $0x48] sm:$0xff]  ;;  %v3463_v29 = vsub.s32 6, %v9241_v16 }
0x157d   :  { %8034 = vmatmul.mubr.msk.f32.vlgmr.msra.gmra.mrb[40].mxu1 %vm1599_vm3, %v3147_v46  ;;  %8501 = vmatprep.subr.bf16.mxu0 %v8500_v51  ;;  %v3554_v46 = vld [vmem:[%s10382_s5 + $0x30] sm:$0xff]  ;;  %v8528_v50 = vpack.c.bf16 %v3557_v49, %v3556_v48 }
0x157e   :  { %8507 = vmatpush3.bf16.msra.mxu1 %v8504_v11  ;;  %v8524_v47 = vpack.c.bf16 %v3555_v5, %v3554_v46 }
0x157f   :  { %8509 = vmatprep.subr.bf16.mxu1 %v8508_v7 }
0x1580   :  { %8503 = vmatpush3.bf16.msra.mxu0 %v8500_v51  ;;  %v3558_v51 = vld [vmem:[%s10382_s5 + $0x50] sm:$0xff] }
0x1581   :  { %8513 = vmatprep.subr.bf16.mxu0 %v8512_v18 }
0x1582   :  { %8511 = vmatpush3.bf16.msra.mxu1 %v8508_v7 }
0x164e   :  { %v3223_v53 = vpop.f32.mrb[32].mxu0 }
0x164f   :  { %3324 = vrot.lane.b32.xlu0 %v3223_v53, %s9116_s18  ;;  %v8028_v54 = vpop.f32.mrb[33].mxu0  ;;  %v3559_v53 = vld [vmem:[%s10382_s5 + $0x58] sm:$0xff] }
0x1650   :  { %v3302_v56 = vpop.f32.mrb[40].mxu1  ;;  %v8532_v54 = vpack.c.bf16 %v3559_v53, %v3558_v51 }
0x1651   :  { %3326 = vrot.lane.b32.xlu1 %v3302_v56, %s9116_s18  ;;  %v8035_v23 = vpop.f32.mrb[41].mxu1  ;;  %v3560_v56 = vld [vmem:[%s10382_s5 + $0x60] sm:$0xff] }
0x1652   :  { %v3561_v23 = vld [vmem:[%s10382_s5 + $0x68] sm:$0xff] }
0x1653   :  { %v8536_v28 = vpack.c.bf16 %v3561_v23, %v3560_v56  ;;  %v7396_v23 = vld [vmem:[%s10379_s2 + $0x90] sm:$0xff] }
0x16c1   :  { %v3325_v2 = vpop.permute.xlu0 %3324 }
0x16c2   :  { %v3334_v6 = vsel %vm1602_vm4, %v3332_v58, %v3325_v2 }
0x16c3   :  { %8044 = vmatprep.mubr.msk.f32.mxu0 %vm95_vm0, %v3334_v6  ;;  %v3327_v12 = vpop.permute.xlu1 %3326 }
0x16c4   :  { %v3335_v15 = vsel %vm1602_vm4, %v3333_v9, %v3327_v12 }
0x16c5   :  { %8045 = vmatmul.mubr.msk.f32.vlgmr.msra.gmra.mrb[34].mxu0 %vm95_vm0, %v3335_v15 }
0x16c6   :  { %8515 = vmatpush3.bf16.msra.mxu0 %v8512_v18  ;;  %v3566_v18 = vsub.s32 7, %v9241_v16 }
0x16c7   :  { %8517 = vmatprep.subr.bf16.mxu0 %v8516_v27 }
0x16c8   :  { %v3567_v42 = vrot.slane %v9693_v8, %v3566_v18 }
0x16ca   :  { %8519 = vmatpush3.bf16.msra.mxu0 %v8516_v27 }
0x16cb   :  { %8521 = vmatprep.subr.bf16.mxu0 %v8520_v45 }
0x16ce   :  { %8523 = vmatpush3.bf16.msra.mxu0 %v8520_v45 }
0x16cf   :  { %8525 = vmatprep.subr.bf16.mxu0 %v8524_v47 }
0x16d2   :  { %8527 = vmatpush3.bf16.msra.mxu0 %v8524_v47 }
0x16d3   :  { %8529 = vmatprep.subr.bf16.mxu0 %v8528_v50 }
0x16d6   :  { %8531 = vmatpush3.bf16.msra.mxu0 %v8528_v50 }
0x16d7   :  { %8533 = vmatprep.subr.bf16.mxu0 %v8532_v54 }
0x16da   :  { %8535 = vmatpush3.bf16.msra.mxu0 %v8532_v54  ;;  %v7395_v54 = vld [vmem:[%s10379_s2 + $0x88] sm:$0xff] }
0x16db   :  { %8537 = vmatprep.subr.bf16.mxu0 %v8536_v28 }
0x16de   :  { %8539 = vmatpush3.bf16.msra.mxu0 %v8536_v28  ;;  %v7397_v28 = vld [vmem:[%s10379_s2 + $0x98] sm:$0xff] }
0x1798   :  { %v8046_v22 = vpop.f32.mrb[34].mxu0 }
0x1799   :  { %v3418_v24 = vadd.f32 %v8046_v22, %v3339_v10  ;;  %v3412_v20 = vpop.f32.mrb[35].mxu0 }
0x179a   :  { %v3413_v26 = vadd.f32 %v3412_v20, %v3339_v10 }
0x179b   :  { %v9699_v30 = vadd.f32 %v3418_v24, %v9490_v63 }
0x179c   :  { %v9702_v31 = vadd.f32 %v3413_v26, %v9484_v61 }
0x179d   :  { %v3426_v32 = vsel %vm95_vm0, %v9699_v30, 0.0  ;;  %v3432_v63 = vmul.f32 %v9699_v30, %v9699_v30 }
0x179e   :  { %3427 = vadd.xlane.f32.xlu1 %v3426_v32  ;;  %v3423_v25 = vsel %vm95_vm0, %v9702_v31, 0.0  ;;  %v3431_v33 = vmul.f32 %v9702_v31, %v9702_v31 }
0x179f   :  { %3424 = vadd.xlane.f32.xlu0 %v3423_v25  ;;  %v3436_v61 = vsel %vm95_vm0, %v3432_v63, 0.0 }
0x17a0   :  { %v3433_v34 = vsel %vm95_vm0, %v3431_v33, 0.0 }
0x17a3   :  { %3434 = vadd.xlane.f32.xlu0 %v3433_v34 }
0x17a7   :  { %3437 = vadd.xlane.f32.xlu0 %v3436_v61 }
0x182b   :  { %v3428_v62 = vpop.xlane.xlu1 %3427 }
0x182c   :  { %v3425_v57 = vpop.xlane.xlu0 %3424  ;;  %v3430_v58 = vmul.f32 0.03125, %v3428_v62  ;;  %v3699_v62 = vld [vmem:[#allocation7 + $0x48] sm:$0xff] }
0x182d   :  { %v3429_v59 = vmul.f32 0.03125, %v3425_v57  ;;  %v8548_v57 = vpack.c.bf16 %v7397_v28, %v7396_v23 }
0x182e   :  { %v3442_v12 = vmul.f32 %v3430_v58, %v3430_v58  ;;  %v3446_v25 = vsub.f32 %v9699_v30, %v3430_v58  ;;  %v3563_v30 = vld [vmem:[%s10382_s5 + $0x78] sm:$0xff] }
0x182f   :  { %v3441_v2 = vmul.f32 %v3429_v59, %v3429_v59  ;;  %v3445_v20 = vsub.f32 %v9702_v31, %v3429_v59  ;;  %v3562_v31 = vld [vmem:[%s10382_s5 + $0x70] sm:$0xff] }
0x1830   :  { %v3435_v1 = vpop.xlane.xlu0 %3434  ;;  %v8540_v11 = vpack.c.bf16 %v3563_v30, %v3562_v31  ;;  %v3698_v59 = vld [vmem:[#allocation7 + $0x40] sm:$0xff] }
0x1831   :  { %v3439_v3 = vmul.f32 0.03125, %v3435_v1  ;;  %v8552_v1 = vpack.c.bf16 %v3699_v62, %v3698_v59 }
0x1832   :  { %8541 = vmatprep.subr.bf16.mxu0 %v8540_v11 }
0x1833   :  { %v3443_v6 = vsub.f32 %v3439_v3, %v3441_v2  ;;  %8543 = vmatpush3.bf16.msra.mxu0 %v8540_v11 }
0x1834   :  { %v3438_v9 = vpop.xlane.xlu0 %3437  ;;  %8135 = vmatprep.subr.mxu0 %v9106_v14 }
0x1835   :  { %v3447_v15 = vadd.f32 1e-05, %v3443_v6  ;;  %v3440_v10 = vmul.f32 0.03125, %v3438_v9 }
0x1837   :  { %8914 = vrsqrt.f32 %v3447_v15  ;;  %v3444_v22 = vsub.f32 %v3440_v10, %v3442_v12 }
0x1839   :  { %v3448_v24 = vadd.f32 1e-05, %v3444_v22 }
0x183b   :  { %8916 = vrsqrt.f32 %v3448_v24 }
0x1841   :  { %v8915_v26 = vpop.eup %8914 }
0x1842   :  { %v3451_v32 = vmul.f32 %v8915_v26, %v3445_v20 }
0x1844   :  { %v3453_v33 = vmul.f32 %v3451_v32, %v9476_v52 }
0x1845   :  { %v8917_v34 = vpop.eup %8916 }
0x1846   :  { %v3452_v63 = vmul.f32 %v8917_v34, %v3446_v25  ;;  %v3455_v61 = vadd.f32 %v3453_v33, %v9479_v55  ;;  %v8999_v34 = vld [vmem:[%s10383_s6 + $0x8] sm:$0xf] }
0x1847   :  { %v3684_v30 = vrot.slane %v8999_v34, %v9517_v13 }
0x1848   :  { %8055 = vmatprep.mubr.msk.f32.mxu1 %vm95_vm0, %v3455_v61  ;;  %v3454_v35 = vmul.f32 %v3452_v63, %v9476_v52  ;;  %v3464_v52 = vrot.slane %v9693_v8, %v3463_v29  ;;  %v7394_v8 = vld [vmem:[%s10379_s2 + $0x80] sm:$0xff]  ;;  %v3678_v63 = vrot.slane %v8999_v34, %v9431_v60 }
0x1849   :  { %v8544_v56 = vpack.c.bf16 %v7395_v54, %v7394_v8 }
0x184a   :  { %v3456_v37 = vadd.f32 %v3454_v35, %v9479_v55 }
0x184b   :  { %8545 = vmatprep.subr.bf16.mxu1 %v8544_v56 }
0x184c   :  { %8056 = vmatmul.mubr.msk.f32.vlgmr.msra.gmra.mrb[42].mxu1 %vm95_vm0, %v3456_v37 }
0x184d   :  { %8547 = vmatpush3.bf16.msra.mxu1 %v8544_v56 }
0x184e   :  { %8549 = vmatprep.subr.bf16.mxu1 %v8548_v57 }
0x1851   :  { %8551 = vmatpush3.bf16.msra.mxu1 %v8548_v57 }
0x1852   :  { %8553 = vmatprep.subr.bf16.mxu1 %v8552_v1 }
0x191f   :  { %v8057_v55 = vpop.f32.mrb[42].mxu1 }
0x1920   :  { %v3543_v38 = vadd.f32 %v8057_v55, %v3464_v52  ;;  %v3537_v7 = vpop.f32.mrb[43].mxu1 }
0x1921   :  { %v3538_v39 = vadd.f32 %v3537_v7, %v3464_v52 }
0x1922   :  { %v3547_v41 = vmax.f32 %v3543_v38, 0.0 }
0x1923   :  { %v3546_v40 = vmax.f32 %v3538_v39, 0.0  ;;  %v3700_v39 = vld [vmem:[#allocation7 + $0x50] sm:$0xff] }
0x1925   :  { %8090 = vmatprep.mubr.f32.mxu0 %v3546_v40  ;;  %v3701_v40 = vld [vmem:[#allocation7 + $0x58] sm:$0xff] }
0x1926   :  { %8091 = vmatmul.mubr.f32.vlgmr.msra.gmra.mrb[36].mxu0 %v3547_v41  ;;  %v9000_v41 = vld [vmem:[#allocation2] sm:$0xff] }
0x1927   :  { %8137 = vmatprep.mubr.msk.f32.mxu0 %vm9107_vm1, %v9106_v14 }
0x19f9   :  { %v8092_v27 = vpop.f32.mrb[36].mxu0 }
0x19fa   :  { %v3640_v43 = vadd.f32 %v8092_v27, %v3567_v42  ;;  %v3634_v44 = vpop.f32.mrb[37].mxu0  ;;  %v9001_v27 = vld [vmem:[#allocation2 + $0x8] sm:$0xff] }
0x19fb   :  { %v3635_v45 = vadd.f32 %v3634_v44, %v3567_v42  ;;  %v8556_v44 = vpack.c.bf16 %v3701_v40, %v3700_v39 }
0x19fc   :  { %v3644_v46 = vadd.f32 %v3640_v43, %v3456_v37 }
0x19fd   :  { %v3643_v5 = vadd.f32 %v3635_v45, %v3455_v61 }
0x19fe   :  { %v3648_v47 = vsel %vm95_vm0, %v3644_v46, 0.0  ;;  %v3654_v48 = vmul.f32 %v3644_v46, %v3644_v46 }
0x19ff   :  { %3649 = vadd.xlane.f32.xlu1 %v3648_v47  ;;  %v3645_v49 = vsel %vm95_vm0, %v3643_v5, 0.0  ;;  %v3653_v50 = vmul.f32 %v3643_v5, %v3643_v5 }
0x1a00   :  { %3646 = vadd.xlane.f32.xlu0 %v3645_v49  ;;  %v3658_v51 = vsel %vm95_vm0, %v3654_v48, 0.0 }
0x1a01   :  { %v3655_v53 = vsel %vm95_vm0, %v3653_v50, 0.0 }
0x1a03   :  { %3659 = vadd.xlane.f32.xlu1 %v3658_v51 }
0x1a04   :  { %3656 = vadd.xlane.f32.xlu0 %v3655_v53 }
0x1a8c   :  { %v3650_v58 = vpop.xlane.xlu1 %3649 }
0x1a8d   :  { %v3652_v2 = vmul.f32 0.03125, %v3650_v58  ;;  %v3647_v3 = vpop.xlane.xlu0 %3646 }
0x1a8e   :  { %v3651_v6 = vmul.f32 0.03125, %v3647_v3 }
0x1a8f   :  { %v3664_v12 = vmul.f32 %v3652_v2, %v3652_v2  ;;  %v3668_v33 = vsub.f32 %v3644_v46, %v3652_v2 }
0x1a90   :  { %v3660_v9 = vpop.xlane.xlu1 %3659  ;;  %v3663_v22 = vmul.f32 %v3651_v6, %v3651_v6  ;;  %v3667_v35 = vsub.f32 %v3643_v5, %v3651_v6  ;;  %v9832_v5 = vld [vmem:[%s10383_s6 + $0x10] sm:$0xff] }
0x1a91   :  { %v3662_v15 = vmul.f32 0.03125, %v3660_v9  ;;  %v3657_v10 = vpop.xlane.xlu0 %3656  ;;  %v3795_v47 = vrot.slane %v9832_v5, %v9244_v19  ;;  %v3710_v49 = vrot.slane %v9832_v5, %v9252_v21 }
0x1a92   :  { %v3661_v24 = vmul.f32 0.03125, %v3657_v10 }
0x1a93   :  { %v3666_v20 = vsub.f32 %v3662_v15, %v3664_v12 }
0x1a94   :  { %v3665_v26 = vsub.f32 %v3661_v24, %v3663_v22 }
0x1a95   :  { %v3670_v32 = vadd.f32 1e-05, %v3666_v20 }
0x1a96   :  { %v3669_v25 = vadd.f32 1e-05, %v3665_v26 }
0x1a97   :  { %8918 = vrsqrt.f32 %v3670_v32 }
0x1a98   :  { %8920 = vrsqrt.f32 %v3669_v25 }
0x1aa1   :  { %v8919_v61 = vpop.eup %8918 }
0x1aa2   :  { %v8921_v37 = vpop.eup %8920  ;;  %v3674_v31 = vmul.f32 %v8919_v61, %v3668_v33 }
0x1aa3   :  { %v3673_v11 = vmul.f32 %v8921_v37, %v3667_v35 }
0x1aa4   :  { %v3680_v52 = vmul.f32 %v3678_v63, %v3674_v31 }
0x1aa5   :  { %v3679_v55 = vmul.f32 %v3678_v63, %v3673_v11 }
0x1aa6   :  { %v3686_v38 = vadd.f32 %v3684_v30, %v3680_v52 }
0x1aa7   :  { %v3685_v7 = vadd.f32 %v3684_v30, %v3679_v55 }
0x1aa8   :  { %v9816_v43 = vadd.f32 %v9001_v27, %v3686_v38 }
0x1aa9   :  { %v9814_v42 = vadd.f32 %v9000_v41, %v3685_v7 }
0x1aab   :  { %8101 = vmatprep.mubr.msk.f32.mxu1 %vm95_vm0, %v9814_v42 }
0x1aac   :  { %8102 = vmatmul.mubr.msk.f32.vlgmr.msra.gmra.mrb[44].mxu1 %vm95_vm0, %v9816_v43 }
0x1aad   :  { %8555 = vmatpush3.bf16.msra.mxu1 %v8552_v1  ;;  %8112 = vmatprep.mubr.msk.f32.mxu1 %vm95_vm0, %v9814_v42 }
0x1aae   :  { %8557 = vmatprep.subr.bf16.mxu1 %v8556_v44 }
0x1ab1   :  { %8559 = vmatpush3.bf16.msra.mxu1 %v8556_v44 }
0x1ab2   :  { %8115 = vmatprep.subr.mxu1 %v9106_v14 }
0x1ab4   :  { %8113 = vmatmul.mubr.msk.f32.vlgmr.msra.gmra.mrb[46].mxu1 %vm95_vm0, %v9816_v43 }
0x1ab5   :  { %8117 = vmatprep.mubr.msk.f32.mxu1 %vm9107_vm1, %v9106_v14 }
0x1b7f   :  { %v8103_v45 = vpop.f32.mrb[44].mxu1 }
0x1b80   :  { %v3783_v46 = vpop.f32.mrb[45].mxu1  ;;  %v9853_v54 = vadd.f32 %v8103_v45, %v3710_v49 }
0x1b81   :  { %v9842_v53 = vadd.f32 %v3783_v46, %v3710_v49 }
0x1b87   :  { %v8114_v48 = vpop.f32.mrb[46].mxu1 }
0x1b88   :  { %v3862_v50 = vpop.f32.mrb[47].mxu1  ;;  %v9845_v8 = vadd.f32 %v8114_v48, %v3795_v47 }
0x1b89   :  { %v9838_v51 = vadd.f32 %v3862_v50, %v3795_v47 }
0x1b8b   :  { %8116 = vmatpush3.xpose.msk.msra.mxu1 %vm256_vm2, %v9838_v51 }
0x1b8c   :  { %8120 = vmatprep.subr.mxu1 %v9106_v14 }
0x1b8e   :  { %8118 = vmatmul.mubr.msk.f32.vlgmr.msra.gmra.mrb[48].mxu1 %vm256_vm2, %v9842_v53 }
0x1b8f   :  { %8121 = vmatpush3.xpose.msk.msra.mxu1 %vm256_vm2, %v9845_v8  ;;  %8122 = vmatprep.mubr.msk.f32.mxu1 %vm9107_vm1, %v9106_v14 }
0x1b90   :  { %8125 = vmatprep.subr.mxu1 %v9106_v14 }
0x1b92   :  { %8123 = vmatmul.mubr.msk.f32.vlgmr.msra.gmra.mrb[50].mxu1 %vm256_vm2, %v9853_v54 }
0x1b93   :  { %8127 = vmatprep.mubr.msk.f32.mxu1 %vm9107_vm1, %v9106_v14 }
0x1c61   :  { %v3943_v56 = vpop.f32.mrb[48].mxu1 }
0x1c62   :  { %v8119_v23 = vpop.f32.mrb[49].mxu1  ;;  %v4023_v28 = vsel %vm256_vm2, %v3943_v56, -inf }
0x1c63   :  { %4024 = vmax.xlane.f32.xlu0 %v4023_v28 }
0x1c65   :  { %v4019_v57 = vpop.f32.mrb[50].mxu1 }
0x1c66   :  { %v8124_v59 = vpop.f32.mrb[51].mxu1  ;;  %v4026_v62 = vsel %vm256_vm2, %v4019_v57, -inf }
0x1c67   :  { %4027 = vmax.xlane.f32.xlu1 %v4026_v62 }
0x1c78   :  { %4121 = vrot.lane.b32.xlu1 %v9845_v8, %s9108_s1 }
0x1c7c   :  { %4199 = vrot.lane.b32.xlu1 %v9838_v51, %s9109_s25 }
0x1c80   :  { %4277 = vrot.lane.b32.xlu1 %v9845_v8, %s9109_s25 }
0x1cf0   :  { %v4025_v1 = vpop.xlane.xlu0 %4024 }
0x1cf1   :  { %v4029_v58 = vsub.f32 %v3943_v56, %v4025_v1 }
0x1cf3   :  { %v4031_v2 = vmul.f32 1.442695, %v4029_v58 }
0x1cf4   :  { %v4028_v3 = vpop.xlane.xlu1 %4027 }
0x1cf5   :  { %8922 = vpow2.f32 %v4031_v2  ;;  %v4030_v6 = vsub.f32 %v4019_v57, %v4028_v3 }
0x1cf7   :  { %v4033_v9 = vmul.f32 1.442695, %v4030_v6 }
0x1cf8   :  { %v4122_v12 = vpop.permute.xlu1 %4121 }
0x1cf9   :  { %8924 = vpow2.f32 %v4033_v9 }
0x1cfc   :  { %v4200_v15 = vpop.permute.xlu1 %4199 }
0x1cfd   :  { %8136 = vmatpush3.xpose.msk.msra.mxu0 %vm256_vm2, %v4200_v15 }
0x1cfe   :  { %8145 = vmatprep.subr.mxu0 %v9106_v14 }
0x1cff   :  { %v8923_v10 = vpop.eup %8922 }
0x1d00   :  { %v4035_v22 = vsel %vm256_vm2, %v8923_v10, 0.0  ;;  %v4278_v26 = vpop.permute.xlu1 %4277 }
0x1d01   :  { %4036 = vadd.xlane.f32.xlu0 %v4035_v22 }
0x1d03   :  { %v8925_v24 = vpop.eup %8924 }
0x1d04   :  { %v4038_v20 = vsel %vm256_vm2, %v8925_v24, 0.0 }
0x1d05   :  { %4039 = vadd.xlane.f32.xlu1 %v4038_v20 }
0x1d16   :  { %4275 = vrot.lane.b32.xlu1 %v9853_v54, %s9109_s25 }
0x1d17   :  { %4045 = vrot.lane.b32.xlu0 %v9838_v51, %s9108_s1 }
0x1d1b   :  { %4197 = vrot.lane.b32.xlu0 %v9842_v53, %s9109_s25 }
0x1d8e   :  { %v4037_v32 = vpop.xlane.xlu0 %4036 }
0x1d8f   :  { %8926 = vrcp.f32 %v4037_v32 }
0x1d92   :  { %v4046_v25 = vpop.permute.xlu0 %4045  ;;  %v4040_v33 = vpop.xlane.xlu1 %4039 }
0x1d93   :  { %8928 = vrcp.f32 %v4040_v33  ;;  %8126 = vmatpush3.msra.mxu1 %v4046_v25 }
0x1d94   :  { %8130 = vmatprep.subr.mxu1 %v9106_v14 }
0x1d96   :  { %v4198_v34 = vpop.permute.xlu0 %4197  ;;  %v4276_v31 = vpop.permute.xlu1 %4275 }
0x1d97   :  { %8138 = vmatmul.mubr.msk.f32.vlgmr.msra.gmra.mrb[38].mxu0 %vm256_vm2, %v4198_v34 }
0x1d98   :  { %8147 = vmatprep.mubr.msk.f32.mxu0 %vm9107_vm1, %v9106_v14 }
0x1d99   :  { %v8927_v63 = vpop.eup %8926 }
0x1d9a   :  { %v4042_v61 = vmul.f32 %v8927_v63, %v8923_v10 }
0x1d9c   :  { %8128 = vmatmul.mubr.msk.f32.vlgmr.msra.gmra.mrb[52].mxu1 %vm256_vm2, %v4042_v61 }
0x1d9d   :  { %v8929_v35 = vpop.eup %8928  ;;  %8131 = vmatpush3.msra.mxu1 %v4122_v12  ;;  %8132 = vmatprep.mubr.msk.f32.mxu1 %vm9107_vm1, %v9106_v14 }
0x1d9e   :  { %v4044_v37 = vmul.f32 %v8929_v35, %v8925_v24  ;;  %8140 = vmatprep.subr.mxu1 %v9106_v14 }
0x1da0   :  { %8133 = vmatmul.mubr.msk.f32.vlgmr.msra.gmra.mrb[54].mxu1 %vm256_vm2, %v4044_v37 }
0x1da1   :  { %8142 = vmatprep.mubr.msk.f32.mxu1 %vm9107_vm1, %v9106_v14 }
0x1da4   :  { %8141 = vmatpush3.xpose.msk.msra.mxu1 %vm256_vm2, %v4278_v26 }
0x1da5   :  { %8150 = vmatprep.subr.mxu1 %v9106_v14 }
0x1da7   :  { %8143 = vmatmul.mubr.msk.f32.vlgmr.msra.gmra.mrb[56].mxu1 %vm256_vm2, %v4276_v31 }
0x1da8   :  { %8152 = vmatprep.mubr.msk.f32.mxu1 %vm9107_vm1, %v9106_v14 }
0x1e6a   :  { %v4271_v30 = vpop.f32.mrb[38].mxu0 }
0x1e6b   :  { %v8139_v11 = vpop.f32.mrb[39].mxu0  ;;  %v4353_v52 = vsel %vm256_vm2, %v4271_v30, -inf }
0x1e6c   :  { %4354 = vmax.xlane.f32.xlu0 %v4353_v52 }
0x1e6f   :  { %v9895_v55 = vpop.f32.mrb[52].mxu1 }
0x1e70   :  { %v8129_v38 = vpop.f32.mrb[53].mxu1 }
0x1e73   :  { %v9897_v7 = vpop.f32.mrb[54].mxu1 }
0x1e74   :  { %v8134_v39 = vpop.f32.mrb[55].mxu1 }
0x1e7a   :  { %v4349_v40 = vpop.f32.mrb[56].mxu1 }
0x1e7b   :  { %v8144_v41 = vpop.f32.mrb[57].mxu1  ;;  %v4356_v27 = vsel %vm256_vm2, %v4349_v40, -inf }
0x1e7c   :  { %4357 = vmax.xlane.f32.xlu1 %v4356_v27 }
0x1e8d   :  { %4451 = vrot.lane.b32.xlu1 %v9845_v8, %s9110_s26 }
0x1e91   :  { %4529 = vrot.lane.b32.xlu1 %v9838_v51, %s9111_s28 }
0x1e95   :  { %4607 = vrot.lane.b32.xlu1 %v9845_v8, %s9111_s28 }
0x1e99   :  { %4605 = vrot.lane.b32.xlu1 %v9853_v54, %s9111_s28 }
0x1ef9   :  { %v4355_v44 = vpop.xlane.xlu0 %4354 }
0x1efa   :  { %v4359_v45 = vsub.f32 %v4271_v30, %v4355_v44 }
0x1efc   :  { %v4361_v46 = vmul.f32 1.442695, %v4359_v45 }
0x1efe   :  { %8930 = vpow2.f32 %v4361_v46 }
0x1f08   :  { %v8931_v47 = vpop.eup %8930 }
0x1f09   :  { %v4358_v48 = vpop.xlane.xlu1 %4357  ;;  %v4365_v49 = vsel %vm256_vm2, %v8931_v47, 0.0 }
0x1f0a   :  { %4366 = vadd.xlane.f32.xlu0 %v4365_v49  ;;  %v4360_v56 = vsub.f32 %v4349_v40, %v4358_v48 }
0x1f0c   :  { %v4363_v23 = vmul.f32 1.442695, %v4360_v56 }
0x1f0d   :  { %v4452_v50 = vpop.permute.xlu1 %4451 }
0x1f0e   :  { %8151 = vmatpush3.msra.mxu1 %v4452_v50  ;;  %8932 = vpow2.f32 %v4363_v23 }
0x1f0f   :  { %8160 = vmatprep.subr.mxu1 %v9106_v14 }
0x1f11   :  { %v4530_v2 = vpop.permute.xlu1 %4529 }
0x1f15   :  { %v4608_v12 = vpop.permute.xlu1 %4607 }
0x1f18   :  { %v8933_v28 = vpop.eup %8932 }
0x1f19   :  { %v4368_v57 = vsel %vm256_vm2, %v8933_v28, 0.0  ;;  %v4606_v10 = vpop.permute.xlu1 %4605 }
0x1f20   :  { %4375 = vrot.lane.b32.xlu0 %v9838_v51, %s9110_s26 }
0x1f3f   :  { %4369 = vadd.xlane.f32.xlu0 %v4368_v57 }
0x1f55   :  { %4527 = vrot.lane.b32.xlu0 %v9842_v53, %s9111_s28 }
0x1f97   :  { %v4367_v59 = vpop.xlane.xlu0 %4366 }
0x1f98   :  { %8934 = vrcp.f32 %v4367_v59 }
0x1f9b   :  { %v4376_v62 = vpop.permute.xlu0 %4375 }
0x1f9c   :  { %8146 = vmatpush3.msra.mxu0 %v4376_v62 }
0x1f9d   :  { %8155 = vmatprep.subr.mxu0 %v9106_v14 }
0x1fa2   :  { %v8935_v1 = vpop.eup %8934 }
0x1fa3   :  { %v4372_v58 = vmul.f32 %v8935_v1, %v8931_v47 }
0x1fa5   :  { %8148 = vmatmul.mubr.msk.f32.vlgmr.msra.gmra.mrb[40].mxu0 %vm256_vm2, %v4372_v58 }
0x1fa6   :  { %8156 = vmatpush3.xpose.msk.msra.mxu0 %vm256_vm2, %v4530_v2  ;;  %8157 = vmatprep.mubr.msk.f32.mxu0 %vm9107_vm1, %v9106_v14 }
0x1fa7   :  { %8165 = vmatprep.subr.mxu0 %v9106_v14 }
0x1fcc   :  { %v4370_v3 = vpop.xlane.xlu0 %4369 }
0x1fcd   :  { %8936 = vrcp.f32 %v4370_v3 }
0x1fd0   :  { %v4528_v6 = vpop.permute.xlu0 %4527 }
0x1fd1   :  { %8158 = vmatmul.mubr.msk.f32.vlgmr.msra.gmra.mrb[42].mxu0 %vm256_vm2, %v4528_v6 }
0x1fd2   :  { %8167 = vmatprep.mubr.msk.f32.mxu0 %vm9107_vm1, %v9106_v14 }
0x1fd7   :  { %v8937_v9 = vpop.eup %8936 }
0x1fd8   :  { %v4374_v15 = vmul.f32 %v8937_v9, %v8933_v28 }
0x1fda   :  { %8153 = vmatmul.mubr.msk.f32.vlgmr.msra.gmra.mrb[58].mxu1 %vm256_vm2, %v4374_v15 }
0x1fdb   :  { %8161 = vmatpush3.xpose.msk.msra.mxu1 %vm256_vm2, %v4608_v12  ;;  %8162 = vmatprep.mubr.msk.f32.mxu1 %vm9107_vm1, %v9106_v14 }
0x1fdc   :  { %8170 = vmatprep.subr.mxu1 %v9106_v14 }
0x1fde   :  { %8163 = vmatmul.mubr.msk.f32.vlgmr.msra.gmra.mrb[60].mxu1 %vm256_vm2, %v4606_v10 }
0x1fdf   :  { %8172 = vmatprep.mubr.msk.f32.mxu1 %vm9107_vm1, %v9106_v14 }
0x2078   :  { %v9932_v22 = vpop.f32.mrb[40].mxu0 }
0x2079   :  { %v8149_v24 = vpop.f32.mrb[41].mxu0 }
0x20a4   :  { %v4601_v20 = vpop.f32.mrb[42].mxu0 }
0x20a5   :  { %v8159_v26 = vpop.f32.mrb[43].mxu0  ;;  %v4683_v32 = vsel %vm256_vm2, %v4601_v20, -inf }
0x20a6   :  { %4684 = vmax.xlane.f32.xlu0 %v4683_v32 }
0x20ad   :  { %v9935_v25 = vpop.f32.mrb[58].mxu1 }
0x20ae   :  { %v8154_v33 = vpop.f32.mrb[59].mxu1 }
0x20b1   :  { %v4679_v34 = vpop.f32.mrb[60].mxu1 }
0x20b2   :  { %v8164_v63 = vpop.f32.mrb[61].mxu1  ;;  %v4686_v61 = vsel %vm256_vm2, %v4679_v34, -inf }
0x20b3   :  { %4687 = vmax.xlane.f32.xlu1 %v4686_v61 }
0x20c4   :  { %4781 = vrot.lane.b32.xlu1 %v9845_v8, %s9112_s29 }
0x20c8   :  { %4859 = vrot.lane.b32.xlu1 %v9838_v51, %s9113_s30 }
0x20cc   :  { %4937 = vrot.lane.b32.xlu1 %v9845_v8, %s9113_s30 }
0x20d0   :  { %4935 = vrot.lane.b32.xlu1 %v9853_v54, %s9113_s30 }
0x2133   :  { %v4685_v35 = vpop.xlane.xlu0 %4684 }
0x2134   :  { %v4689_v37 = vsub.f32 %v4601_v20, %v4685_v35 }
0x2136   :  { %v4691_v31 = vmul.f32 1.442695, %v4689_v37 }
0x2138   :  { %8938 = vpow2.f32 %v4691_v31 }
0x2140   :  { %v4688_v30 = vpop.xlane.xlu1 %4687 }
0x2141   :  { %v4690_v39 = vsub.f32 %v4679_v34, %v4688_v30 }
0x2142   :  { %v8939_v11 = vpop.eup %8938 }
0x2143   :  { %v4695_v52 = vsel %vm256_vm2, %v8939_v11, 0.0  ;;  %v4693_v40 = vmul.f32 1.442695, %v4690_v39  ;;  %v7401_v39 = vld [vmem:[%s10379_s2 + $0xb8] sm:$0xff] }
0x2144   :  { %4696 = vadd.xlane.f32.xlu0 %v4695_v52  ;;  %v4782_v38 = vpop.permute.xlu1 %4781 }
0x2145   :  { %8171 = vmatpush3.msra.mxu1 %v4782_v38  ;;  %8940 = vpow2.f32 %v4693_v40  ;;  %v7400_v38 = vld [vmem:[%s10379_s2 + $0xb0] sm:$0xff] }
0x2146   :  { %8180 = vmatprep.subr.mxu1 %v9106_v14  ;;  %v8564_v40 = vpack.c.bf16 %v7401_v39, %v7400_v38 }
0x2148   :  { %v4860_v47 = vpop.permute.xlu1 %4859 }
0x214c   :  { %v4938_v50 = vpop.permute.xlu1 %4937 }
0x214f   :  { %v8941_v54 = vpop.eup %8940 }
0x2150   :  { %v4698_v41 = vsel %vm256_vm2, %v8941_v54, 0.0  ;;  %v4936_v23 = vpop.permute.xlu1 %4935 }
0x215a   :  { %4705 = vrot.lane.b32.xlu0 %v9838_v51, %s9112_s29 }
0x2179   :  { %4699 = vadd.xlane.f32.xlu0 %v4698_v41 }
0x218f   :  { %4857 = vrot.lane.b32.xlu0 %v9842_v53, %s9113_s30 }
0x21d1   :  { %v4697_v27 = vpop.xlane.xlu0 %4696 }
0x21d2   :  { %8942 = vrcp.f32 %v4697_v27 }
0x21d5   :  { %v4706_v44 = vpop.permute.xlu0 %4705 }
0x21d6   :  { %8166 = vmatpush3.msra.mxu0 %v4706_v44 }
0x21d7   :  { %8175 = vmatprep.subr.mxu0 %v9106_v14 }
0x21dc   :  { %v8943_v45 = vpop.eup %8942 }
0x21dd   :  { %v4702_v46 = vmul.f32 %v8943_v45, %v8939_v11  ;;  %v7399_v11 = vld [vmem:[%s10379_s2 + $0xa8] sm:$0xff] }
0x21df   :  { %8168 = vmatmul.mubr.msk.f32.vlgmr.msra.gmra.mrb[44].mxu0 %vm256_vm2, %v4702_v46 }
0x21e0   :  { %8176 = vmatpush3.xpose.msk.msra.mxu0 %vm256_vm2, %v4860_v47  ;;  %8177 = vmatprep.mubr.msk.f32.mxu0 %vm9107_vm1, %v9106_v14 }
0x21e1   :  { %8185 = vmatprep.subr.mxu0 %v9106_v14 }
0x2206   :  { %v4700_v48 = vpop.xlane.xlu0 %4699 }
0x2207   :  { %8944 = vrcp.f32 %v4700_v48 }
0x220a   :  { %v4858_v53 = vpop.permute.xlu0 %4857 }
0x220b   :  { %8178 = vmatmul.mubr.msk.f32.vlgmr.msra.gmra.mrb[46].mxu0 %vm256_vm2, %v4858_v53 }
0x220c   :  { %8187 = vmatprep.mubr.msk.f32.mxu0 %vm9107_vm1, %v9106_v14 }
0x2211   :  { %v8945_v49 = vpop.eup %8944 }
0x2212   :  { %v4704_v56 = vmul.f32 %v8945_v49, %v8941_v54 }
0x2214   :  { %8173 = vmatmul.mubr.msk.f32.vlgmr.msra.gmra.mrb[62].mxu1 %vm256_vm2, %v4704_v56 }
0x2215   :  { %8181 = vmatpush3.xpose.msk.msra.mxu1 %vm256_vm2, %v4938_v50  ;;  %8182 = vmatprep.mubr.msk.f32.mxu1 %vm9107_vm1, %v9106_v14 }
0x2216   :  { %8190 = vmatprep.subr.mxu1 %v9106_v14 }
0x2218   :  { %8183 = vmatmul.mubr.msk.f32.vlgmr.msra.gmra.mrb[64].mxu1 %vm256_vm2, %v4936_v23 }
0x2219   :  { %8192 = vmatprep.mubr.msk.f32.mxu1 %vm9107_vm1, %v9106_v14 }
0x22b2   :  { %v4777_v28 = vpop.f32.mrb[44].mxu0 }
0x22b3   :  { %v8169_v57 = vpop.f32.mrb[45].mxu0 }
0x22de   :  { %v4931_v59 = vpop.f32.mrb[46].mxu0 }
0x22df   :  { %v8179_v62 = vpop.f32.mrb[47].mxu0  ;;  %v5013_v1 = vsel %vm256_vm2, %v4931_v59, -inf }
0x22e0   :  { %5014 = vmax.xlane.f32.xlu0 %v5013_v1  ;;  %v9002_v62 = vld [vmem:[#allocation5] sm:$0xff] }
0x22e7   :  { %v4853_v58 = vpop.f32.mrb[62].mxu1 }
0x22e8   :  { %v8174_v2 = vpop.f32.mrb[63].mxu1 }
0x22eb   :  { %v5009_v3 = vpop.f32.mrb[64].mxu1 }
0x22ec   :  { %v8184_v6 = vpop.f32.mrb[65].mxu1  ;;  %v5016_v9 = vsel %vm256_vm2, %v5009_v3, -inf }
0x22ed   :  { %5017 = vmax.xlane.f32.xlu1 %v5016_v9 }
0x22fe   :  { %5111 = vrot.lane.b32.xlu1 %v9845_v8, %s9114_s8 }
0x2302   :  { %5189 = vrot.lane.b32.xlu1 %v9932_v22, %s9104_s14 }
0x2306   :  { %5191 = vrot.lane.b32.xlu1 %v9935_v25, %s9104_s14 }
0x230a   :  { %5199 = vrot.lane.b32.xlu1 %v4853_v58, %s9115_s9 }
0x236d   :  { %v5015_v12 = vpop.xlane.xlu0 %5014 }
0x236e   :  { %v5019_v15 = vsub.f32 %v4931_v59, %v5015_v12 }
0x2370   :  { %v5021_v10 = vmul.f32 1.442695, %v5019_v15 }
0x2372   :  { %8946 = vpow2.f32 %v5021_v10 }
0x237a   :  { %v5018_v24 = vpop.xlane.xlu1 %5017 }
0x237b   :  { %v5020_v20 = vsub.f32 %v5009_v3, %v5018_v24 }
0x237c   :  { %v8947_v26 = vpop.eup %8946 }
0x237d   :  { %v5023_v32 = vmul.f32 1.442695, %v5020_v20  ;;  %v5025_v33 = vsel %vm256_vm2, %v8947_v26, 0.0 }
0x237e   :  { %5026 = vadd.xlane.f32.xlu0 %v5025_v33  ;;  %v5112_v8 = vpop.permute.xlu1 %5111  ;;  %v5355_v33 = vld [vmem:[#allocation7 + $0x78] sm:$0xff] }
0x237f   :  { %8948 = vpow2.f32 %v5023_v32  ;;  %8191 = vmatpush3.msra.mxu1 %v5112_v8  ;;  %v5354_v32 = vld [vmem:[#allocation7 + $0x70] sm:$0xff] }
0x2380   :  { %v8580_v8 = vpack.c.bf16 %v5355_v33, %v5354_v32 }
0x2382   :  { %v5190_v45 = vpop.permute.xlu1 %5189 }
0x2383   :  { %v5211_v48 = vsel %vm256_vm2, %v9895_v55, %v5190_v45  ;;  %v5220_v55 = vrot.slane %v9832_v5, %v9431_v60 }
0x2386   :  { %v5192_v47 = vpop.permute.xlu1 %5191 }
0x2387   :  { %v5212_v23 = vsel %vm256_vm2, %v9897_v7, %v5192_v47 }
0x2389   :  { %v8949_v22 = vpop.eup %8948 }
0x238a   :  { %v5028_v34 = vsel %vm256_vm2, %v8949_v22, 0.0  ;;  %v5200_v56 = vpop.permute.xlu1 %5199 }
0x238b   :  { %5029 = vadd.xlane.f32.xlu0 %v5028_v34  ;;  %v9004_v34 = vld [vmem:[#allocation5 + $0x10] sm:$0xff] }
0x23a1   :  { %5035 = vrot.lane.b32.xlu0 %v9838_v51, %s9114_s8  ;;  %v7398_v51 = vld [vmem:[%s10379_s2 + $0xa0] sm:$0xff] }
0x23a2   :  { %v8560_v52 = vpack.c.bf16 %v7399_v11, %v7398_v51 }
0x23a5   :  { %5197 = vrot.lane.b32.xlu0 %v4777_v28, %s9115_s9  ;;  %v5214_v28 = vsel %vm1599_vm3, %v5212_v23, %v5200_v56 }
0x240b   :  { %v5027_v25 = vpop.xlane.xlu0 %5026 }
0x240c   :  { %8950 = vrcp.f32 %v5027_v25  ;;  %v7432_v25 = vld [vmem:[%s10379_s2 + $0xc0] sm:$0xff] }
0x2416   :  { %v8951_v61 = vpop.eup %8950 }
0x2417   :  { %v5032_v35 = vmul.f32 %v8951_v61, %v8947_v26  ;;  %v5353_v26 = vld [vmem:[#allocation7 + $0x68] sm:$0xff]  ;;  %v9005_v61 = vld [vmem:[#allocation5 + $0x18] sm:$0xff] }
0x2418   :  { %v5030_v63 = vpop.xlane.xlu0 %5029 }
0x2419   :  { %8952 = vrcp.f32 %v5030_v63  ;;  %v7433_v63 = vld [vmem:[%s10379_s2 + $0xc8] sm:$0xff] }
0x241c   :  { %v5036_v37 = vpop.permute.xlu0 %5035 }
0x241d   :  { %8186 = vmatpush3.msra.mxu0 %v5036_v37  ;;  %v7434_v37 = vld [vmem:[%s10379_s2 + $0xd0] sm:$0xff] }
0x241e   :  { %8188 = vmatmul.mubr.msk.f32.vlgmr.msra.gmra.mrb[48].mxu0 %vm256_vm2, %v5032_v35  ;;  %8561 = vmatprep.subr.bf16.mxu0 %v8560_v52  ;;  %v8568_v35 = vpack.c.bf16 %v7433_v63, %v7432_v25 }
0x241f   :  { %8563 = vmatpush3.bf16.msra.mxu0 %v8560_v52 }
0x2420   :  { %8565 = vmatprep.subr.bf16.mxu0 %v8564_v40  ;;  %v5198_v46 = vpop.permute.xlu0 %5197  ;;  %8569 = vmatprep.subr.bf16.mxu1 %v8568_v35 }
0x2421   :  { %v5213_v53 = vsel %vm1599_vm3, %v5211_v48, %v5198_v46 }
0x2423   :  { %v8953_v31 = vpop.eup %8952  ;;  %8567 = vmatpush3.bf16.msra.mxu0 %v8564_v40 }
0x2424   :  { %v5034_v30 = vmul.f32 %v8953_v31, %v8949_v22  ;;  %v9003_v22 = vld [vmem:[#allocation5 + $0x8] sm:$0xff] }
0x2425   :  { %v7435_v31 = vld [vmem:[%s10379_s2 + $0xd8] sm:$0xff] }
0x2426   :  { %8193 = vmatmul.mubr.msk.f32.vlgmr.msra.gmra.mrb[66].mxu1 %vm256_vm2, %v5034_v30  ;;  %v8572_v30 = vpack.c.bf16 %v7435_v31, %v7434_v37 }
0x2427   :  { %8571 = vmatpush3.bf16.msra.mxu1 %v8568_v35 }
0x2428   :  { %8573 = vmatprep.subr.bf16.mxu1 %v8572_v30 }
0x242b   :  { %8575 = vmatpush3.bf16.msra.mxu1 %v8572_v30 }
0x242c   :  { %8584 = vmatprep.subr.bf16.mxu1 %v9117_v36 }
0x24f1   :  { %v5107_v54 = vpop.f32.mrb[48].mxu0 }
0x24f2   :  { %5205 = vrot.lane.b32.xlu0 %v5107_v54, %s9116_s18  ;;  %v8189_v41 = vpop.f32.mrb[49].mxu0 }
0x24f9   :  { %v5183_v27 = vpop.f32.mrb[66].mxu1 }
0x24fa   :  { %5207 = vrot.lane.b32.xlu1 %v5183_v27, %s9116_s18  ;;  %v8194_v44 = vpop.f32.mrb[67].mxu1 }
0x2564   :  { %v5206_v49 = vpop.permute.xlu0 %5205 }
0x2565   :  { %v5215_v50 = vsel %vm1602_vm4, %v5213_v53, %v5206_v49  ;;  %v10046_v53 = vld [vmem:[%s10383_s6 + $0x18] sm:$0xf] }
0x2566   :  { %8203 = vmatprep.mubr.msk.f32.mxu0 %vm95_vm0, %v5215_v50  ;;  %v10050_v50 = vrot.slane %v10046_v53, %v9252_v21 }
0x256c   :  { %v5208_v57 = vpop.permute.xlu1 %5207 }
0x256d   :  { %v5216_v59 = vsel %vm1602_vm4, %v5214_v28, %v5208_v57  ;;  %v10054_v28 = vrot.slane %v10046_v53, %v9244_v19  ;;  %v5449_v19 = vrot.slane %v9832_v5, %v1837_v0 }
0x256e   :  { %8204 = vmatmul.mubr.msk.f32.vlgmr.msra.gmra.mrb[50].mxu0 %vm95_vm0, %v5216_v59 }
0x256f   :  { %8225 = vmatprep.mubr.msk.f32.mxu0 %vm95_vm0, %v9002_v62 }
0x2641   :  { %v8205_v1 = vpop.f32.mrb[50].mxu0 }
0x2642   :  { %v5299_v58 = vadd.f32 %v8205_v1, %v5220_v55  ;;  %v5293_v2 = vpop.f32.mrb[51].mxu0 }
0x2643   :  { %v5294_v3 = vadd.f32 %v5293_v2, %v5220_v55 }
0x2644   :  { %v10014_v6 = vadd.f32 %v5299_v58, %v9816_v43  ;;  %v5352_v43 = vld [vmem:[#allocation7 + $0x60] sm:$0xff] }
0x2645   :  { %v5302_v7 = vadd.f32 %v5294_v3, %v9814_v42  ;;  %v8576_v42 = vpack.c.bf16 %v5353_v26, %v5352_v43  ;;  %v5364_v26 = vrot.slane %v9832_v5, %v9517_v13 }
0x2646   :  { %v5307_v9 = vsel %vm95_vm0, %v10014_v6, 0.0  ;;  %v5313_v24 = vmul.f32 %v10014_v6, %v10014_v6 }
0x2647   :  { %5308 = vadd.xlane.f32.xlu1 %v5307_v9  ;;  %v5304_v12 = vsel %vm95_vm0, %v5302_v7, 0.0  ;;  %v5312_v15 = vmul.f32 %v5302_v7, %v5302_v7  ;;  %8577 = vmatprep.subr.bf16.mxu0 %v8576_v42 }
0x2648   :  { %5305 = vadd.xlane.f32.xlu0 %v5304_v12  ;;  %v5317_v20 = vsel %vm95_vm0, %v5313_v24, 0.0  ;;  %8579 = vmatpush3.bf16.msra.mxu0 %v8576_v42 }
0x2649   :  { %v5314_v10 = vsel %vm95_vm0, %v5312_v15, 0.0  ;;  %8581 = vmatprep.subr.bf16.mxu0 %v8580_v8 }
0x264c   :  { %5315 = vadd.xlane.f32.xlu0 %v5314_v10  ;;  %8583 = vmatpush3.bf16.msra.mxu0 %v8580_v8 }
0x264d   :  { %8588 = vmatprep.subr.bf16.mxu0 %v9117_v36 }
0x264f   :  { %8226 = vmatmul.mubr.msk.f32.vlgmr.msra.gmra.mrb[52].mxu0 %vm95_vm0, %v9003_v22 }
0x2650   :  { %5318 = vadd.xlane.f32.xlu0 %v5317_v20  ;;  %8228 = vmatprep.mubr.msk.f32.mxu0 %vm95_vm0, %v9004_v34 }
0x2653   :  { %8229 = vmatmul.mubr.msk.f32.gmra.mrb[54].mxu0 %vm95_vm0, %v9005_v61 }
0x2654   :  { %8242 = vmatprep.mubr.msk.f32.mxu0 %vm9107_vm1, %v9106_v14 }
0x26d4   :  { %v5309_v52 = vpop.xlane.xlu1 %5308 }
0x26d5   :  { %v5306_v51 = vpop.xlane.xlu0 %5305  ;;  %v5311_v39 = vmul.f32 0.03125, %v5309_v52 }
0x26d6   :  { %v5310_v11 = vmul.f32 0.03125, %v5306_v51 }
0x26d7   :  { %v5323_v44 = vmul.f32 %v5311_v39, %v5311_v39  ;;  %v5327_v57 = vsub.f32 %v10014_v6, %v5311_v39 }
0x26d8   :  { %v5322_v40 = vmul.f32 %v5310_v11, %v5310_v11  ;;  %v5326_v49 = vsub.f32 %v5302_v7, %v5310_v11 }
0x26d9   :  { %v5316_v38 = vpop.xlane.xlu0 %5315 }
0x26da   :  { %v5320_v54 = vmul.f32 0.03125, %v5316_v38 }
0x26dc   :  { %v5324_v41 = vsub.f32 %v5320_v54, %v5322_v40 }
0x26dd   :  { %v5319_v27 = vpop.xlane.xlu0 %5318 }
0x26de   :  { %v5328_v45 = vadd.f32 1e-05, %v5324_v41  ;;  %v5321_v46 = vmul.f32 0.03125, %v5319_v27 }
0x26e0   :  { %8954 = vrsqrt.f32 %v5328_v45  ;;  %v5325_v47 = vsub.f32 %v5321_v46, %v5323_v44 }
0x26e2   :  { %v5329_v48 = vadd.f32 1e-05, %v5325_v47 }
0x26e4   :  { %8956 = vrsqrt.f32 %v5329_v48 }
0x26ea   :  { %v8955_v56 = vpop.eup %8954 }
0x26eb   :  { %v5332_v23 = vmul.f32 %v8955_v56, %v5326_v49 }
0x26ed   :  { %v5338_v59 = vmul.f32 %v10050_v50, %v5332_v23 }
0x26ee   :  { %v8957_v62 = vpop.eup %8956 }
0x26ef   :  { %v5333_v55 = vmul.f32 %v8957_v62, %v5327_v57  ;;  %v10059_v1 = vadd.f32 %v10054_v28, %v5338_v59 }
0x26f1   :  { %8214 = vmatprep.mubr.msk.f32.mxu1 %vm95_vm0, %v10059_v1  ;;  %v5339_v21 = vmul.f32 %v10050_v50, %v5333_v55 }
0x26f3   :  { %v10065_v58 = vadd.f32 %v10054_v28, %v5339_v21 }
0x26f5   :  { %8215 = vmatmul.mubr.msk.f32.vlgmr.msra.gmra.mrb[68].mxu1 %vm95_vm0, %v10065_v58 }
0x26f6   :  { %8235 = vmatprep.mubr.msk.f32.mxu1 %vm9107_vm1, %v9106_v14 }
0x2722   :  { %v8227_v2 = vpop.f32.mrb[52].mxu0 }
0x2723   :  { %v5522_v3 = vadd.f32 %v8227_v2, %v5449_v19  ;;  %v5516_v6 = vpop.f32.mrb[53].mxu0 }
0x2724   :  { %v5517_v7 = vadd.f32 %v5516_v6, %v5449_v19 }
0x2726   :  { %v8230_v9 = vpop.f32.mrb[54].mxu0  ;;  %v8585_v12 = vpack.c.bf16 %v5522_v3, %v5517_v7  ;;  %v10077_v43 = vpack.i.bf16 %v5522_v3, %v5517_v7 }
0x2727   :  { %v5532_v15 = vadd.f32 %v8230_v9, %v5449_v19  ;;  %v5526_v10 = vpop.f32.mrb[55].mxu0 }
0x2728   :  { %v5527_v24 = vadd.f32 %v5526_v10, %v5449_v19  ;;  %8587 = vmatpush3.bf16.xpose.msk.msra.mxu1 %vm9502_vm5, %v8585_v12 }
0x2729   :  { %8592 = vmatprep.subr.bf16.mxu1 %v9117_v36 }
0x272a   :  { %v8589_v20 = vpack.c.bf16 %v5532_v15, %v5527_v24  ;;  %v10082_v0 = vpack.i.bf16 %v5532_v15, %v5527_v24 }
0x272c   :  { %8591 = vmatpush3.bf16.xpose.msk.msra.mxu0 %vm9502_vm5, %v8589_v20 }
0x272d   :  { %8598 = vmatprep.subr.bf16.mxu0 %v9117_v36 }
0x27c8   :  { %v8216_v42 = vpop.f32.mrb[68].mxu1 }
0x27c9   :  { %v10086_v32 = vadd.f32 %v8216_v42, %v5364_v26  ;;  %v5437_v33 = vpop.f32.mrb[69].mxu1 }
0x27ca   :  { %v10088_v8 = vadd.f32 %v5437_v33, %v5364_v26 }
0x27cb   :  { %8243 = vmatmul.mubr.msk.f32.vlgmr.msra.gmra.mrb[56].mxu0 %vm256_vm2, %v10086_v32 }
0x27cc   :  { %8236 = vmatmul.mubr.msk.f32.vlgmr.msra.gmra.mrb[70].mxu1 %vm256_vm2, %v10088_v8  ;;  %8263 = vmatprep.mubr.msk.f32.mxu0 %vm9107_vm1, %v9106_v14 }
0x27cd   :  { %8249 = vmatprep.mubr.msk.f32.mxu1 %vm9107_vm1, %v9106_v14 }
0x289e   :  { %v5689_v22 = vpop.f32.mrb[56].mxu0 }
0x289f   :  { %v5610_v5 = vpop.f32.mrb[70].mxu1  ;;  %v8244_v34 = vpop.f32.mrb[57].mxu0  ;;  %v5696_v25 = vsel %vm1599_vm3, %v5689_v22, -inf }
0x28a0   :  { %5697 = vmax.xlane.f32.xlu1 %v5696_v25  ;;  %v8237_v63 = vpop.f32.mrb[71].mxu1  ;;  %v5693_v61 = vsel %vm1599_vm3, %v5610_v5, -inf }
0x28a1   :  { %5694 = vmax.xlane.f32.xlu0 %v5693_v61 }
0x292d   :  { %v5698_v35 = vpop.xlane.xlu1 %5697 }
0x292e   :  { %v5700_v37 = vsub.f32 %v5689_v22, %v5698_v35  ;;  %v5695_v31 = vpop.xlane.xlu0 %5694 }
0x292f   :  { %v5699_v30 = vsub.f32 %v5610_v5, %v5695_v31 }
0x2930   :  { %v5703_v51 = vmul.f32 1.442695, %v5700_v37 }
0x2931   :  { %v5701_v11 = vmul.f32 1.442695, %v5699_v30 }
0x2932   :  { %8958 = vpow2.f32 %v5703_v51 }
0x2933   :  { %8960 = vpow2.f32 %v5701_v11 }
0x293c   :  { %v8959_v52 = vpop.eup %8958 }
0x293d   :  { %v8961_v38 = vpop.eup %8960  ;;  %v5708_v39 = vsel %vm1599_vm3, %v8959_v52, 0.0 }
0x293e   :  { %5709 = vadd.xlane.f32.xlu1 %v5708_v39  ;;  %v5705_v40 = vsel %vm1599_vm3, %v8961_v38, 0.0 }
0x293f   :  { %5706 = vadd.xlane.f32.xlu0 %v5705_v40 }
0x294f   :  { %8782 = vrot.lane.b32.xlu1 %v10082_v0, %s9108_s1 }
0x2953   :  { %8787 = vrot.lane.b32.xlu1 %v10077_v43, %s9109_s25 }
0x2955   :  { %8777 = vrot.lane.b32.xlu0 %v10077_v43, %s9108_s1 }
0x2957   :  { %8792 = vrot.lane.b32.xlu1 %v10082_v0, %s9109_s25 }
0x2959   :  { %5873 = vrot.lane.b32.xlu0 %v10088_v8, %s9109_s25 }
0x295b   :  { %5955 = vrot.lane.b32.xlu1 %v10086_v32, %s9109_s25 }
0x29cb   :  { %v5710_v54 = vpop.xlane.xlu1 %5709 }
0x29cc   :  { %v5707_v41 = vpop.xlane.xlu0 %5706 }
0x29cd   :  { %8962 = vrcp.f32 %v5707_v41 }
0x29ce   :  { %8964 = vrcp.f32 %v5710_v54 }
0x29cf   :  { %v8783_v27 = vpop.permute.xlu1 %8782 }
0x29d0   :  { %v8778_v44 = vpop.permute.xlu0 %8777  ;;  %v8785_v23 = vunpack.i.h.bf16 %v8783_v27  ;;  %v8784_v57 = vunpack.i.l.bf16 %v8783_v27 }
0x29d1   :  { %v8780_v45 = vunpack.i.h.bf16 %v8778_v44  ;;  %v8779_v46 = vunpack.i.l.bf16 %v8778_v44 }
0x29d2   :  { %v8596_v19 = vpack.c.bf16 %v8785_v23, %v8784_v57 }
0x29d3   :  { %v8593_v47 = vpack.c.bf16 %v8780_v45, %v8779_v46  ;;  %v8788_v48 = vpop.permute.xlu1 %8787 }
0x29d4   :  { %v8790_v49 = vunpack.i.h.bf16 %v8788_v48  ;;  %v8789_v56 = vunpack.i.l.bf16 %v8788_v48  ;;  %v5874_v6 = vpop.permute.xlu0 %5873 }
0x29d5   :  { %8594 = vmatpush3.bf16.msra.mxu1 %v8593_v47 }
0x29d6   :  { %v8599_v59 = vpack.c.bf16 %v8790_v49, %v8789_v56  ;;  %8595 = vmatprep.subr.bf16.mxu1 %v9117_v36 }
0x29d7   :  { %v8963_v62 = vpop.eup %8962  ;;  %v8793_v2 = vpop.permute.xlu1 %8792 }
0x29d8   :  { %v5712_v55 = vmul.f32 %v8963_v62, %v8961_v38  ;;  %8601 = vmatpush3.bf16.xpose.msk.msra.mxu0 %vm9502_vm5, %v8599_v59  ;;  %v8965_v21 = vpop.eup %8964  ;;  %v8795_v7 = vunpack.i.h.bf16 %v8793_v2  ;;  %v8794_v9 = vunpack.i.l.bf16 %v8793_v2 }
0x29d9   :  { %8606 = vmatprep.subr.bf16.mxu0 %v9117_v36  ;;  %v5714_v3 = vmul.f32 %v8965_v21, %v8959_v52 }
0x29da   :  { %8250 = vmatmul.mubr.msk.f32.vlgmr.msra.gmra.mrb[72].mxu1 %vm1599_vm3, %v5712_v55  ;;  %v8603_v12 = vpack.c.bf16 %v8795_v7, %v8794_v9 }
0x29db   :  { %8597 = vmatpush3.bf16.msra.mxu1 %v8596_v19  ;;  %8256 = vmatprep.mubr.msk.f32.mxu1 %vm9107_vm1, %v9106_v14  ;;  %v5956_v15 = vpop.permute.xlu1 %5955 }
0x29dc   :  { %8602 = vmatprep.subr.bf16.mxu1 %v9117_v36 }
0x29de   :  { %8257 = vmatmul.mubr.msk.f32.vlgmr.msra.gmra.mrb[74].mxu1 %vm1599_vm3, %v5714_v3 }
0x29df   :  { %8264 = vmatmul.mubr.msk.f32.vlgmr.msra.gmra.mrb[58].mxu0 %vm256_vm2, %v5874_v6  ;;  %8270 = vmatprep.mubr.msk.f32.mxu1 %vm9107_vm1, %v9106_v14 }
0x29e0   :  { %8277 = vmatprep.mubr.msk.f32.mxu0 %vm9107_vm1, %v9106_v14 }
0x29e4   :  { %8605 = vmatpush3.bf16.xpose.msk.msra.mxu1 %vm9502_vm5, %v8603_v12 }
0x29e5   :  { %8609 = vmatprep.subr.bf16.mxu1 %v9117_v36 }
0x29eb   :  { %8271 = vmatmul.mubr.msk.f32.vlgmr.msra.gmra.mrb[76].mxu1 %vm256_vm2, %v5956_v15 }
0x29ec   :  { %8284 = vmatprep.mubr.msk.f32.mxu1 %vm9107_vm1, %v9106_v14 }
0x2aad   :  { %v10134_v10 = vpop.f32.mrb[72].mxu1 }
0x2aae   :  { %v8251_v24 = vpop.f32.mrb[73].mxu1 }
0x2ab1   :  { %v10136_v20 = vpop.f32.mrb[74].mxu1 }
0x2ab2   :  { %v8258_v26 = vpop.f32.mrb[75].mxu1  ;;  %v5951_v42 = vpop.f32.mrb[58].mxu0 }
0x2ab3   :  { %v8265_v33 = vpop.f32.mrb[59].mxu0  ;;  %v6037_v22 = vsel %vm1599_vm3, %v5951_v42, -inf }
0x2ab4   :  { %6038 = vmax.xlane.f32.xlu0 %v6037_v22 }
0x2abe   :  { %v6033_v5 = vpop.f32.mrb[76].mxu1 }
0x2abf   :  { %v8272_v34 = vpop.f32.mrb[77].mxu1  ;;  %v6040_v25 = vsel %vm1599_vm3, %v6033_v5, -inf }
0x2ac0   :  { %6041 = vmax.xlane.f32.xlu1 %v6040_v25 }
0x2ad1   :  { %8802 = vrot.lane.b32.xlu1 %v10082_v0, %s9110_s26 }
0x2ad5   :  { %8807 = vrot.lane.b32.xlu1 %v10077_v43, %s9111_s28 }
0x2ad9   :  { %8812 = vrot.lane.b32.xlu1 %v10082_v0, %s9111_s28 }
0x2add   :  { %6299 = vrot.lane.b32.xlu1 %v10086_v32, %s9111_s28 }
0x2b41   :  { %v6039_v63 = vpop.xlane.xlu0 %6038 }
0x2b42   :  { %v6043_v61 = vsub.f32 %v5951_v42, %v6039_v63 }
0x2b44   :  { %v6045_v35 = vmul.f32 1.442695, %v6043_v61 }
0x2b46   :  { %8966 = vpow2.f32 %v6045_v35 }
0x2b4d   :  { %v6042_v37 = vpop.xlane.xlu1 %6041 }
0x2b4e   :  { %v6044_v31 = vsub.f32 %v6033_v5, %v6042_v37 }
0x2b50   :  { %v8967_v30 = vpop.eup %8966  ;;  %v6047_v51 = vmul.f32 1.442695, %v6044_v31 }
0x2b51   :  { %v8803_v11 = vpop.permute.xlu1 %8802  ;;  %v6049_v52 = vsel %vm1599_vm3, %v8967_v30, 0.0 }
0x2b52   :  { %8968 = vpow2.f32 %v6047_v51  ;;  %v8805_v38 = vunpack.i.h.bf16 %v8803_v11  ;;  %v8804_v39 = vunpack.i.l.bf16 %v8803_v11  ;;  %6050 = vadd.xlane.f32.xlu0 %v6049_v52 }
0x2b54   :  { %v8610_v40 = vpack.c.bf16 %v8805_v38, %v8804_v39 }
0x2b55   :  { %v8808_v44 = vpop.permute.xlu1 %8807 }
0x2b56   :  { %8611 = vmatpush3.bf16.msra.mxu1 %v8610_v40  ;;  %v8810_v21 = vunpack.i.h.bf16 %v8808_v44  ;;  %v8809_v19 = vunpack.i.l.bf16 %v8808_v44 }
0x2b57   :  { %8616 = vmatprep.subr.bf16.mxu1 %v9117_v36 }
0x2b58   :  { %v8613_v6 = vpack.c.bf16 %v8810_v21, %v8809_v19 }
0x2b59   :  { %v8813_v49 = vpop.permute.xlu1 %8812 }
0x2b5a   :  { %v8815_v57 = vunpack.i.h.bf16 %v8813_v49  ;;  %v8814_v59 = vunpack.i.l.bf16 %v8813_v49 }
0x2b5c   :  { %v8969_v54 = vpop.eup %8968  ;;  %v8617_v3 = vpack.c.bf16 %v8815_v57, %v8814_v59 }
0x2b5d   :  { %v6052_v41 = vsel %vm1599_vm3, %v8969_v54, 0.0  ;;  %v6300_v7 = vpop.permute.xlu1 %6299 }
0x2b5e   :  { %6053 = vadd.xlane.f32.xlu0 %v6052_v41 }
0x2b74   :  { %8797 = vrot.lane.b32.xlu0 %v10077_v43, %s9110_s26 }
0x2b78   :  { %6217 = vrot.lane.b32.xlu0 %v10088_v8, %s9111_s28 }
0x2bdf   :  { %v6051_v27 = vpop.xlane.xlu0 %6050 }
0x2be0   :  { %8970 = vrcp.f32 %v6051_v27 }
0x2bea   :  { %v8971_v56 = vpop.eup %8970 }
0x2beb   :  { %v6054_v45 = vpop.xlane.xlu0 %6053  ;;  %v6056_v62 = vmul.f32 %v8971_v56, %v8967_v30 }
0x2bec   :  { %8972 = vrcp.f32 %v6054_v45 }
0x2bef   :  { %v8798_v46 = vpop.permute.xlu0 %8797 }
0x2bf0   :  { %v8800_v47 = vunpack.i.h.bf16 %v8798_v46  ;;  %v8799_v48 = vunpack.i.l.bf16 %v8798_v46 }
0x2bf2   :  { %v8607_v23 = vpack.c.bf16 %v8800_v47, %v8799_v48 }
0x2bf3   :  { %v6218_v9 = vpop.permute.xlu0 %6217 }
0x2bf4   :  { %8608 = vmatpush3.bf16.msra.mxu0 %v8607_v23 }
0x2bf5   :  { %8612 = vmatprep.subr.bf16.mxu0 %v9117_v36 }
0x2bf6   :  { %v8973_v55 = vpop.eup %8972 }
0x2bf7   :  { %v6058_v2 = vmul.f32 %v8973_v55, %v8969_v54  ;;  %8278 = vmatmul.mubr.msk.f32.vlgmr.msra.gmra.mrb[60].mxu0 %vm1599_vm3, %v6056_v62 }
0x2bf8   :  { %8291 = vmatprep.mubr.msk.f32.mxu0 %vm9107_vm1, %v9106_v14 }
0x2bf9   :  { %8285 = vmatmul.mubr.msk.f32.vlgmr.msra.gmra.mrb[78].mxu1 %vm1599_vm3, %v6058_v2 }
0x2bfa   :  { %8619 = vmatpush3.bf16.xpose.msk.msra.mxu1 %vm9502_vm5, %v8617_v3  ;;  %8298 = vmatprep.mubr.msk.f32.mxu1 %vm9107_vm1, %v9106_v14 }
0x2bfb   :  { %8623 = vmatprep.subr.bf16.mxu1 %v9117_v36 }
0x2bfd   :  { %8615 = vmatpush3.bf16.xpose.msk.msra.mxu0 %vm9502_vm5, %v8613_v6 }
0x2bfe   :  { %8620 = vmatprep.subr.bf16.mxu0 %v9117_v36 }
0x2c01   :  { %8299 = vmatmul.mubr.msk.f32.vlgmr.msra.gmra.mrb[80].mxu1 %vm256_vm2, %v6300_v7 }
0x2c02   :  { %8312 = vmatprep.mubr.msk.f32.mxu1 %vm9107_vm1, %v9106_v14 }
0x2c04   :  { %8292 = vmatmul.mubr.msk.f32.vlgmr.msra.gmra.mrb[62].mxu0 %vm256_vm2, %v6218_v9 }
0x2c05   :  { %8305 = vmatprep.mubr.msk.f32.mxu0 %vm9107_vm1, %v9106_v14 }
0x2cca   :  { %v10174_v12 = vpop.f32.mrb[60].mxu0 }
0x2ccb   :  { %v8279_v15 = vpop.f32.mrb[61].mxu0 }
0x2ccc   :  { %v10176_v24 = vpop.f32.mrb[78].mxu1 }
0x2ccd   :  { %v8286_v26 = vpop.f32.mrb[79].mxu1 }
0x2cd4   :  { %v6377_v42 = vpop.f32.mrb[80].mxu1 }
0x2cd5   :  { %v8300_v33 = vpop.f32.mrb[81].mxu1  ;;  %v6384_v22 = vsel %vm1599_vm3, %v6377_v42, -inf }
0x2cd6   :  { %6385 = vmax.xlane.f32.xlu1 %v6384_v22 }
0x2cd7   :  { %v6295_v5 = vpop.f32.mrb[62].mxu0 }
0x2cd8   :  { %v8293_v34 = vpop.f32.mrb[63].mxu0  ;;  %v6381_v25 = vsel %vm1599_vm3, %v6295_v5, -inf }
0x2cd9   :  { %6382 = vmax.xlane.f32.xlu0 %v6381_v25 }
0x2ce7   :  { %8822 = vrot.lane.b32.xlu1 %v10082_v0, %s9112_s29 }
0x2ceb   :  { %8827 = vrot.lane.b32.xlu1 %v10077_v43, %s9113_s30 }
0x2cef   :  { %8832 = vrot.lane.b32.xlu1 %v10082_v0, %s9113_s30 }
0x2cf3   :  { %6643 = vrot.lane.b32.xlu1 %v10086_v32, %s9113_s30 }
0x2d63   :  { %v6386_v63 = vpop.xlane.xlu1 %6385 }
0x2d64   :  { %v6388_v61 = vsub.f32 %v6377_v42, %v6386_v63 }
0x2d66   :  { %v6383_v35 = vpop.xlane.xlu0 %6382  ;;  %v6391_v11 = vmul.f32 1.442695, %v6388_v61 }
0x2d67   :  { %v6387_v37 = vsub.f32 %v6295_v5, %v6383_v35  ;;  %v8823_v31 = vpop.permute.xlu1 %8822 }
0x2d68   :  { %v8825_v30 = vunpack.i.h.bf16 %v8823_v31  ;;  %v8824_v51 = vunpack.i.l.bf16 %v8823_v31 }
0x2d69   :  { %v6389_v52 = vmul.f32 1.442695, %v6387_v37 }
0x2d6a   :  { %v8624_v38 = vpack.c.bf16 %v8825_v30, %v8824_v51 }
0x2d6b   :  { %8974 = vpow2.f32 %v6389_v52  ;;  %v8828_v27 = vpop.permute.xlu1 %8827 }
0x2d6c   :  { %8625 = vmatpush3.bf16.msra.mxu1 %v8624_v38  ;;  %8976 = vpow2.f32 %v6391_v11  ;;  %v8830_v55 = vunpack.i.h.bf16 %v8828_v27 }
0x2d6d   :  { %8630 = vmatprep.subr.bf16.mxu1 %v9117_v36 }
0x2d6f   :  { %v8833_v48 = vpop.permute.xlu1 %8832 }
0x2d70   :  { %v8835_v23 = vunpack.i.h.bf16 %v8833_v48  ;;  %v8834_v57 = vunpack.i.l.bf16 %v8833_v48 }
0x2d72   :  { %v8631_v19 = vpack.c.bf16 %v8835_v23, %v8834_v57 }
0x2d73   :  { %v6644_v3 = vpop.permute.xlu1 %6643 }
0x2d75   :  { %v8975_v39 = vpop.eup %8974 }
0x2d76   :  { %v6393_v40 = vsel %vm1599_vm3, %v8975_v39, 0.0  ;;  %v8977_v54 = vpop.eup %8976 }
0x2d77   :  { %6394 = vadd.xlane.f32.xlu0 %v6393_v40  ;;  %v6396_v32 = vsel %vm1599_vm3, %v8977_v54, 0.0 }
0x2d7b   :  { %6397 = vadd.xlane.f32.xlu0 %v6396_v32 }
0x2d91   :  { %8817 = vrot.lane.b32.xlu0 %v10077_v43, %s9112_s29 }
0x2d95   :  { %6561 = vrot.lane.b32.xlu0 %v10088_v8, %s9113_s30  ;;  %v8829_v8 = vunpack.i.l.bf16 %v8828_v27 }
0x2d97   :  { %v8627_v2 = vpack.c.bf16 %v8830_v55, %v8829_v8 }
0x2e04   :  { %v6395_v41 = vpop.xlane.xlu0 %6394 }
0x2e05   :  { %8978 = vrcp.f32 %v6395_v41 }
0x2e08   :  { %v6398_v44 = vpop.xlane.xlu0 %6397 }
0x2e09   :  { %8980 = vrcp.f32 %v6398_v44 }
0x2e0c   :  { %v8818_v45 = vpop.permute.xlu0 %8817 }
0x2e0d   :  { %v8820_v46 = vunpack.i.h.bf16 %v8818_v45  ;;  %v8819_v47 = vunpack.i.l.bf16 %v8818_v45 }
0x2e0f   :  { %v8979_v49 = vpop.eup %8978  ;;  %v8621_v56 = vpack.c.bf16 %v8820_v46, %v8819_v47  ;;  %v7437_v46 = vld [vmem:[%s10379_s2 + $0xe8] sm:$0xff]  ;;  %v7438_v47 = vld [vmem:[%s10379_s2 + $0xf0] sm:$0xff] }
0x2e10   :  { %v6400_v59 = vmul.f32 %v8979_v49, %v8975_v39  ;;  %v6562_v6 = vpop.permute.xlu0 %6561  ;;  %v7439_v49 = vld [vmem:[%s10379_s2 + $0xf8] sm:$0xff] }
0x2e11   :  { %8622 = vmatpush3.bf16.msra.mxu0 %v8621_v56  ;;  %v8644_v56 = vpack.c.bf16 %v7439_v49, %v7438_v47  ;;  %v7497_v47 = vld [vmem:[%s10382_s5 + $0xd8] sm:$0xff]  ;;  %v7498_v49 = vld [vmem:[%s10382_s5 + $0xe0] sm:$0xff] }
0x2e12   :  { %8626 = vmatprep.subr.bf16.mxu0 %v9117_v36 }
0x2e13   :  { %v8981_v62 = vpop.eup %8980 }
0x2e14   :  { %v6402_v21 = vmul.f32 %v8981_v62, %v8977_v54  ;;  %8306 = vmatmul.mubr.msk.f32.vlgmr.msra.gmra.mrb[64].mxu0 %vm1599_vm3, %v6400_v59 }
0x2e15   :  { %8319 = vmatprep.mubr.msk.f32.mxu0 %vm9107_vm1, %v9106_v14 }
0x2e16   :  { %8313 = vmatmul.mubr.msk.f32.vlgmr.msra.gmra.mrb[82].mxu1 %vm1599_vm3, %v6402_v21 }
0x2e17   :  { %8633 = vmatpush3.bf16.xpose.msk.msra.mxu1 %vm9502_vm5, %v8631_v19  ;;  %8326 = vmatprep.mubr.msk.f32.mxu1 %vm9107_vm1, %v9106_v14 }
0x2e18   :  { %8637 = vmatprep.subr.bf16.mxu1 %v9117_v36 }
0x2e1a   :  { %8629 = vmatpush3.bf16.xpose.msk.msra.mxu0 %vm9502_vm5, %v8627_v2 }
0x2e1b   :  { %8634 = vmatprep.subr.bf16.mxu0 %v9117_v36 }
0x2e1e   :  { %8327 = vmatmul.mubr.msk.f32.vlgmr.msra.gmra.mrb[84].mxu1 %vm256_vm2, %v6644_v3 }
0x2e1f   :  { %8340 = vmatprep.mubr.msk.f32.mxu1 %vm9107_vm1, %v9106_v14 }
0x2e21   :  { %8320 = vmatmul.mubr.msk.f32.vlgmr.msra.gmra.mrb[66].mxu0 %vm256_vm2, %v6562_v6 }
0x2e22   :  { %8333 = vmatprep.mubr.msk.f32.mxu0 %vm9107_vm1, %v9106_v14 }
0x2ee7   :  { %v6478_v7 = vpop.f32.mrb[64].mxu0 }
0x2ee8   :  { %v8307_v9 = vpop.f32.mrb[65].mxu0 }
0x2ee9   :  { %v6557_v15 = vpop.f32.mrb[82].mxu1 }
0x2eea   :  { %v8314_v26 = vpop.f32.mrb[83].mxu1 }
0x2ef1   :  { %v6721_v4 = vpop.f32.mrb[84].mxu1 }
0x2ef2   :  { %v8328_v42 = vpop.f32.mrb[85].mxu1  ;;  %v6728_v36 = vsel %vm1599_vm3, %v6721_v4, -inf }
0x2ef3   :  { %6729 = vmax.xlane.f32.xlu1 %v6728_v36 }
0x2ef4   :  { %v6639_v33 = vpop.f32.mrb[66].mxu0 }
0x2ef5   :  { %v8321_v22 = vpop.f32.mrb[67].mxu0  ;;  %v6725_v5 = vsel %vm1599_vm3, %v6639_v33, -inf }
0x2ef6   :  { %6726 = vmax.xlane.f32.xlu0 %v6725_v5 }
0x2f04   :  { %8842 = vrot.lane.b32.xlu1 %v10082_v0, %s9114_s8 }
0x2f08   :  { %6907 = vrot.lane.b32.xlu1 %v10174_v12, %s9104_s14 }
0x2f0c   :  { %6909 = vrot.lane.b32.xlu1 %v10176_v24, %s9104_s14 }
0x2f10   :  { %6917 = vrot.lane.b32.xlu1 %v6557_v15, %s9115_s9 }
0x2f80   :  { %v6730_v14 = vpop.xlane.xlu1 %6729 }
0x2f81   :  { %v6732_v34 = vsub.f32 %v6721_v4, %v6730_v14 }
0x2f83   :  { %v6727_v25 = vpop.xlane.xlu0 %6726  ;;  %v6735_v31 = vmul.f32 1.442695, %v6732_v34 }
0x2f84   :  { %v6731_v63 = vsub.f32 %v6639_v33, %v6727_v25  ;;  %v8843_v61 = vpop.permute.xlu1 %8842 }
0x2f85   :  { %v8845_v35 = vunpack.i.h.bf16 %v8843_v61  ;;  %v8844_v37 = vunpack.i.l.bf16 %v8843_v61  ;;  %v7480_v61 = vld [vmem:[%s10381_s4 + $0x20] sm:$0xff] }
0x2f86   :  { %v6733_v30 = vmul.f32 1.442695, %v6731_v63 }
0x2f87   :  { %v8638_v51 = vpack.c.bf16 %v8845_v35, %v8844_v37  ;;  %v7481_v35 = vld [vmem:[%s10381_s4 + $0x28] sm:$0xff] }
0x2f88   :  { %8982 = vpow2.f32 %v6733_v30  ;;  %v6908_v55 = vpop.permute.xlu1 %6907  ;;  %v8648_v37 = vpack.c.bf16 %v7481_v35, %v7480_v61  ;;  %v7483_v30 = vld [vmem:[%s10381_s4 + $0x38] sm:$0xff] }
0x2f89   :  { %8639 = vmatpush3.bf16.msra.mxu1 %v8638_v51  ;;  %8984 = vpow2.f32 %v6735_v31  ;;  %v6929_v2 = vsel %vm256_vm2, %v10134_v10, %v6908_v55  ;;  %v10257_v10 = vld [vmem:[%s10383_s6 + $0x10] sm:$0xff] }
0x2f8a   :  { %8649 = vmatprep.subr.bf16.mxu1 %v8648_v37  ;;  %v7482_v31 = vld [vmem:[%s10381_s4 + $0x30] sm:$0xff] }
0x2f8b   :  { %v8652_v51 = vpack.c.bf16 %v7483_v30, %v7482_v31  ;;  %v7168_v30 = vrot.slane %v10257_v10, %v3566_v18 }
0x2f8c   :  { %v6910_v8 = vpop.permute.xlu1 %6909 }
0x2f90   :  { %v6918_v19 = vpop.permute.xlu1 %6917 }
0x2f92   :  { %v8983_v0 = vpop.eup %8982 }
0x2f93   :  { %v6737_v12 = vsel %vm1599_vm3, %v8983_v0, 0.0  ;;  %v8985_v11 = vpop.eup %8984 }
0x2f94   :  { %6738 = vadd.xlane.f32.xlu0 %v6737_v12  ;;  %v6740_v24 = vsel %vm1599_vm3, %v8985_v11, 0.0  ;;  %v7487_v12 = vld [vmem:[%s10382_s5 + $0x88] sm:$0xff] }
0x2f98   :  { %6741 = vadd.xlane.f32.xlu0 %v6740_v24 }
0x2fae   :  { %8837 = vrot.lane.b32.xlu0 %v10077_v43, %s9114_s8  ;;  %v7436_v43 = vld [vmem:[%s10379_s2 + $0xe0] sm:$0xff] }
0x2faf   :  { %v8640_v48 = vpack.c.bf16 %v7437_v46, %v7436_v43  ;;  %v7496_v46 = vld [vmem:[%s10382_s5 + $0xd0] sm:$0xff] }
0x2fb2   :  { %6915 = vrot.lane.b32.xlu0 %v6478_v7, %s9115_s9  ;;  %v6930_v7 = vsel %vm256_vm2, %v10136_v20, %v6910_v8  ;;  %v6938_v20 = vrot.slane %v10257_v10, %v3338_v17 }
0x2fb3   :  { %v6932_v15 = vsel %vm1599_vm3, %v6930_v7, %v6918_v19 }
0x3021   :  { %v6739_v52 = vpop.xlane.xlu0 %6738 }
0x3022   :  { %8986 = vrcp.f32 %v6739_v52  ;;  %v7489_v52 = vld [vmem:[%s10382_s5 + $0x98] sm:$0xff] }
0x3025   :  { %v6742_v38 = vpop.xlane.xlu0 %6741 }
0x3026   :  { %8988 = vrcp.f32 %v6742_v38 }
0x3029   :  { %v8838_v39 = vpop.permute.xlu0 %8837 }
0x302a   :  { %v8840_v40 = vunpack.i.h.bf16 %v8838_v39  ;;  %v8839_v54 = vunpack.i.l.bf16 %v8838_v39  ;;  %v7490_v39 = vld [vmem:[%s10382_s5 + $0xa0] sm:$0xff] }
0x302c   :  { %v8987_v32 = vpop.eup %8986  ;;  %v8635_v41 = vpack.c.bf16 %v8840_v40, %v8839_v54  ;;  %v7491_v40 = vld [vmem:[%s10382_s5 + $0xa8] sm:$0xff] }
0x302d   :  { %v6744_v27 = vmul.f32 %v8987_v32, %v8983_v0  ;;  %v6916_v21 = vpop.permute.xlu0 %6915  ;;  %v7486_v0 = vld [vmem:[%s10382_s5 + $0x80] sm:$0xff]  ;;  %v8664_v54 = vpack.c.bf16 %v7491_v40, %v7490_v39  ;;  %v7492_v32 = vld [vmem:[%s10382_s5 + $0xb0] sm:$0xff] }
0x302e   :  { %8636 = vmatpush3.bf16.msra.mxu0 %v8635_v41  ;;  %v6931_v3 = vsel %vm1599_vm3, %v6929_v2, %v6916_v21  ;;  %v8656_v24 = vpack.c.bf16 %v7487_v12, %v7486_v0  ;;  %v7493_v41 = vld [vmem:[%s10382_s5 + $0xb8] sm:$0xff] }
0x302f   :  { %8641 = vmatprep.subr.bf16.mxu0 %v8640_v48 }
0x3030   :  { %v8989_v44 = vpop.eup %8988 }
0x3031   :  { %v6746_v45 = vmul.f32 %v8989_v44, %v8985_v11  ;;  %8334 = vmatmul.mubr.msk.f32.vlgmr.msra.gmra.mrb[68].mxu0 %vm1599_vm3, %v6744_v27  ;;  %v7488_v11 = vld [vmem:[%s10382_s5 + $0x90] sm:$0xff]  ;;  %v8668_v27 = vpack.c.bf16 %v7493_v41, %v7492_v32  ;;  %v7494_v44 = vld [vmem:[%s10382_s5 + $0xc0] sm:$0xff] }
0x3032   :  { %8643 = vmatpush3.bf16.msra.mxu0 %v8640_v48  ;;  %v8660_v38 = vpack.c.bf16 %v7489_v52, %v7488_v11  ;;  %v8676_v48 = vpack.c.bf16 %v7497_v47, %v7496_v46 }
0x3033   :  { %8341 = vmatmul.mubr.msk.f32.vlgmr.msra.gmra.mrb[86].mxu1 %vm1599_vm3, %v6746_v45  ;;  %8645 = vmatprep.subr.bf16.mxu0 %v8644_v56  ;;  %v7495_v45 = vld [vmem:[%s10382_s5 + $0xc8] sm:$0xff] }
0x3034   :  { %8651 = vmatpush3.bf16.msra.mxu1 %v8648_v37  ;;  %v8672_v43 = vpack.c.bf16 %v7495_v45, %v7494_v44 }
0x3035   :  { %8653 = vmatprep.subr.bf16.mxu1 %v8652_v51 }
0x3036   :  { %8647 = vmatpush3.bf16.msra.mxu0 %v8644_v56  ;;  %v7499_v56 = vld [vmem:[%s10382_s5 + $0xe8] sm:$0xff] }
0x3037   :  { %8657 = vmatprep.subr.bf16.mxu0 %v8656_v24 }
0x3038   :  { %8655 = vmatpush3.bf16.msra.mxu1 %v8652_v51 }
0x3104   :  { %v6822_v23 = vpop.f32.mrb[68].mxu0 }
0x3105   :  { %6923 = vrot.lane.b32.xlu0 %v6822_v23, %s9116_s18  ;;  %v8335_v57 = vpop.f32.mrb[69].mxu0  ;;  %v8680_v23 = vpack.c.bf16 %v7499_v56, %v7498_v49 }
0x3106   :  { %v6901_v59 = vpop.f32.mrb[86].mxu1 }
0x3107   :  { %6925 = vrot.lane.b32.xlu1 %v6901_v59, %s9116_s18  ;;  %v8342_v62 = vpop.f32.mrb[87].mxu1 }
0x3177   :  { %v6924_v6 = vpop.permute.xlu0 %6923 }
0x3178   :  { %v6933_v9 = vsel %vm1602_vm4, %v6931_v3, %v6924_v6 }
0x3179   :  { %8351 = vmatprep.mubr.msk.f32.mxu0 %vm95_vm0, %v6933_v9  ;;  %v6926_v26 = vpop.permute.xlu1 %6925 }
0x317a   :  { %v6934_v4 = vsel %vm1602_vm4, %v6932_v15, %v6926_v26 }
0x317b   :  { %8352 = vmatmul.mubr.msk.f32.vlgmr.msra.gmra.mrb[70].mxu0 %vm95_vm0, %v6934_v4 }
0x317c   :  { %8659 = vmatpush3.bf16.msra.mxu0 %v8656_v24 }
0x317d   :  { %8661 = vmatprep.subr.bf16.mxu0 %v8660_v38 }
0x3180   :  { %8663 = vmatpush3.bf16.msra.mxu0 %v8660_v38 }
0x3181   :  { %8665 = vmatprep.subr.bf16.mxu0 %v8664_v54 }
0x3184   :  { %8667 = vmatpush3.bf16.msra.mxu0 %v8664_v54 }
0x3185   :  { %8669 = vmatprep.subr.bf16.mxu0 %v8668_v27 }
0x3188   :  { %8671 = vmatpush3.bf16.msra.mxu0 %v8668_v27 }
0x3189   :  { %8673 = vmatprep.subr.bf16.mxu0 %v8672_v43 }
0x318c   :  { %8675 = vmatpush3.bf16.msra.mxu0 %v8672_v43 }
0x318d   :  { %8677 = vmatprep.subr.bf16.mxu0 %v8676_v48 }
0x3190   :  { %8679 = vmatpush3.bf16.msra.mxu0 %v8676_v48 }
0x3191   :  { %8681 = vmatprep.subr.bf16.mxu0 %v8680_v23 }
0x3194   :  { %8683 = vmatpush3.bf16.msra.mxu0 %v8680_v23 }
0x324e   :  { %v8353_v42 = vpop.f32.mrb[70].mxu0 }
0x324f   :  { %v7017_v36 = vadd.f32 %v8353_v42, %v6938_v20  ;;  %v7011_v33 = vpop.f32.mrb[71].mxu0 }
0x3250   :  { %v7012_v22 = vadd.f32 %v7011_v33, %v6938_v20 }
0x3251   :  { %v10263_v5 = vadd.f32 %v7017_v36, %v10065_v58 }
0x3252   :  { %v10266_v14 = vadd.f32 %v7012_v22, %v10059_v1 }
0x3253   :  { %v7025_v34 = vsel %vm95_vm0, %v10263_v5, 0.0  ;;  %v7031_v58 = vmul.f32 %v10263_v5, %v10263_v5 }
0x3254   :  { %7026 = vadd.xlane.f32.xlu1 %v7025_v34  ;;  %v7022_v25 = vsel %vm95_vm0, %v10266_v14, 0.0  ;;  %v7030_v17 = vmul.f32 %v10266_v14, %v10266_v14 }
0x3255   :  { %7023 = vadd.xlane.f32.xlu0 %v7022_v25  ;;  %v7035_v1 = vsel %vm95_vm0, %v7031_v58, 0.0 }
0x3256   :  { %v7032_v63 = vsel %vm95_vm0, %v7030_v17, 0.0 }
0x3259   :  { %7033 = vadd.xlane.f32.xlu0 %v7032_v63 }
0x325d   :  { %7036 = vadd.xlane.f32.xlu0 %v7035_v1  ;;  %v7064_v1 = vrot.slane %v10257_v10, %v3463_v29 }
0x32e1   :  { %v7027_v62 = vpop.xlane.xlu1 %7026 }
0x32e2   :  { %v7024_v57 = vpop.xlane.xlu0 %7023  ;;  %v7029_v8 = vmul.f32 0.03125, %v7027_v62 }
0x32e3   :  { %v7028_v59 = vmul.f32 0.03125, %v7024_v57 }
0x32e4   :  { %v7041_v6 = vmul.f32 %v7029_v8, %v7029_v8  ;;  %v7045_v36 = vsub.f32 %v10263_v5, %v7029_v8  ;;  %v7501_v5 = vld [vmem:[%s10382_s5 + $0xf8] sm:$0xff] }
0x32e5   :  { %v7040_v21 = vmul.f32 %v7028_v59, %v7028_v59  ;;  %v7044_v4 = vsub.f32 %v10266_v14, %v7028_v59  ;;  %v7500_v14 = vld [vmem:[%s10382_s5 + $0xf0] sm:$0xff]  ;;  %v7279_v59 = vrot.slane %v10046_v53, %v9431_v60  ;;  %s9118_s5 = smov [#allocation8]  }
0x32e6   :  { %v7034_v55 = vpop.xlane.xlu0 %7033  ;;  %v8684_v58 = vpack.c.bf16 %v7501_v5, %v7500_v14  ;;  %s7295_s27 = sshll.u32 %s9118_s5, 4  ;;  %s7296_s27 = int_to_ptr.vmem [resolvable:$true] %s7295_s27 }
0x32e7   :  { %v7038_v19 = vmul.f32 0.03125, %v7034_v55  ;;  %s9073_s16 = scalar_lea.vmem %s7296_s27, 256  ;;  %p9078_p11 = scmp.lt.s32.totalorder %s7296_s27, %s7296_s27 }
0x32e8   :  { %8685 = vmatprep.subr.bf16.mxu0 %v8684_v58  ;;  %p9074_p10 = scmp.ne.s32.totalorder %s7296_s27, %s9073_s16  ;;  %p9079_p12 = scmp.lt.s32.totalorder %s9073_s16, %s9073_s16 }
0x32e9   :  { %v7042_v2 = vsub.f32 %v7038_v19, %v7040_v21  ;;  %8687 = vmatpush3.bf16.msra.mxu0 %v8684_v58  ;;  %v7285_v19 = vrot.slane %v10046_v53, %v9517_v13 }
0x32ea   :  { %v7037_v3 = vpop.xlane.xlu0 %7036  ;;  %p9080_p13 = por %p9079_p12, %p9078_p11 }
0x32eb   :  { %v7046_v7 = vadd.f32 1e-05, %v7042_v2  ;;  %v7039_v9 = vmul.f32 0.03125, %v7037_v3 }
0x32ec   :  { %p9081_p0 = pnand %p9080_p13, %p9074_p10 }
0x32ed   :  { %8990 = vrsqrt.f32 %v7046_v7  ;;  %v7043_v15 = vsub.f32 %v7039_v9, %v7041_v6 }
0x32ef   :  { %v7047_v26 = vadd.f32 1e-05, %v7043_v15 }
0x32f1   :  { %8992 = vrsqrt.f32 %v7047_v26 }
0x32f7   :  { %v8991_v20 = vpop.eup %8990 }
0x32f8   :  { %v7050_v42 = vmul.f32 %v8991_v20, %v7044_v4 }
0x32fa   :  { %v7052_v33 = vmul.f32 %v7050_v42, %v10050_v50 }
0x32fb   :  { %v8993_v22 = vpop.eup %8992 }
0x32fc   :  { %v7051_v34 = vmul.f32 %v8993_v22, %v7045_v36  ;;  %v7054_v25 = vadd.f32 %v7052_v33, %v10054_v28 }
0x32fe   :  { %8362 = vmatprep.mubr.msk.f32.mxu1 %vm95_vm0, %v7054_v25  ;;  %v7053_v17 = vmul.f32 %v7051_v34, %v10050_v50 }
0x3300   :  { %v7055_v63 = vadd.f32 %v7053_v17, %v10054_v28 }
0x3302   :  { %8363 = vmatmul.mubr.msk.f32.vlgmr.msra.gmra.mrb[88].mxu1 %vm95_vm0, %v7055_v63 }
0x33d5   :  { %v8364_v50 = vpop.f32.mrb[88].mxu1 }
0x33d6   :  { %v7143_v61 = vadd.f32 %v8364_v50, %v7064_v1  ;;  %v7137_v28 = vpop.f32.mrb[89].mxu1 }
0x33d7   :  { %v7138_v35 = vadd.f32 %v7137_v28, %v7064_v1 }
0x33d8   :  { %v7147_v31 = vmax.f32 %v7143_v61, 0.0 }
0x33d9   :  { %v7146_v37 = vmax.f32 %v7138_v35, 0.0 }
0x33db   :  { %8397 = vmatprep.mubr.f32.mxu0 %v7146_v37 }
0x33dc   :  { %8398 = vmatmul.mubr.f32.vlgmr.msra.gmra.mrb[72].mxu0 %v7147_v31 }
0x34af   :  { %v8399_v51 = vpop.f32.mrb[72].mxu0 }
0x34b0   :  { %v7241_v0 = vadd.f32 %v8399_v51, %v7168_v30  ;;  %v7235_v12 = vpop.f32.mrb[73].mxu0 }
0x34b1   :  { %v7236_v11 = vadd.f32 %v7235_v12, %v7168_v30 }
0x34b2   :  { %v7245_v24 = vadd.f32 %v7241_v0, %v7055_v63 }
0x34b3   :  { %v7244_v52 = vadd.f32 %v7236_v11, %v7054_v25 }
0x34b4   :  { %v7249_v29 = vsel %vm95_vm0, %v7245_v24, 0.0  ;;  %v7255_v38 = vmul.f32 %v7245_v24, %v7245_v24 }
0x34b5   :  { %7250 = vadd.xlane.f32.xlu1 %v7249_v29  ;;  %v7246_v39 = vsel %vm95_vm0, %v7244_v52, 0.0  ;;  %v7254_v40 = vmul.f32 %v7244_v52, %v7244_v52 }
0x34b6   :  { %7247 = vadd.xlane.f32.xlu0 %v7246_v39  ;;  %v7259_v54 = vsel %vm95_vm0, %v7255_v38, 0.0 }
0x34b7   :  { %v7256_v16 = vsel %vm95_vm0, %v7254_v40, 0.0 }
0x34b9   :  { %7260 = vadd.xlane.f32.xlu1 %v7259_v54 }
0x34ba   :  { %7257 = vadd.xlane.f32.xlu0 %v7256_v16 }
0x3542   :  { %v7251_v18 = vpop.xlane.xlu1 %7250 }
0x3543   :  { %v7253_v10 = vmul.f32 0.03125, %v7251_v18  ;;  %v7248_v32 = vpop.xlane.xlu0 %7247 }
0x3544   :  { %v7252_v41 = vmul.f32 0.03125, %v7248_v32 }
0x3545   :  { %v7265_v44 = vmul.f32 %v7253_v10, %v7253_v10  ;;  %v7269_v57 = vsub.f32 %v7245_v24, %v7253_v10 }
0x3546   :  { %v7261_v27 = vpop.xlane.xlu1 %7260  ;;  %v7264_v46 = vmul.f32 %v7252_v41, %v7252_v41  ;;  %v7268_v55 = vsub.f32 %v7244_v52, %v7252_v41 }
0x3547   :  { %v7263_v45 = vmul.f32 0.03125, %v7261_v27  ;;  %v7258_v43 = vpop.xlane.xlu0 %7257 }
0x3548   :  { %v7262_v47 = vmul.f32 0.03125, %v7258_v43 }
0x3549   :  { %v7267_v48 = vsub.f32 %v7263_v45, %v7265_v44 }
0x354a   :  { %v7266_v49 = vsub.f32 %v7262_v47, %v7264_v46 }
0x354b   :  { %v7271_v56 = vadd.f32 1e-05, %v7267_v48 }
0x354c   :  { %v7270_v23 = vadd.f32 1e-05, %v7266_v49 }
0x354d   :  { %8994 = vrsqrt.f32 %v7271_v56 }
0x354e   :  { %8996 = vrsqrt.f32 %v7270_v23 }
0x3557   :  { %v8995_v62 = vpop.eup %8994 }
0x3558   :  { %v8997_v8 = vpop.eup %8996  ;;  %v7275_v21 = vmul.f32 %v8995_v62, %v7269_v57 }
0x3559   :  { %v7274_v2 = vmul.f32 %v8997_v8, %v7268_v55 }
0x355a   :  { %v7281_v3 = vmul.f32 %v7279_v59, %v7275_v21 }
0x355b   :  { %v7280_v6 = vmul.f32 %v7279_v59, %v7274_v2 }
0x355c   :  { %v7287_v7 = vadd.f32 %v7285_v19, %v7281_v3 }
0x355d   :  { %v7286_v9 = vadd.f32 %v7285_v19, %v7280_v6 }
0x355e   :  { %7289 = vst.msk [vmem:[#allocation8 + $0x8] sm:$0xff] %vm95_vm0, %v7287_v7 }
0x355f   :  { %7288 = vst.msk [vmem:[#allocation8] sm:$0xff] %vm95_vm0, %v7286_v9 }
0x3560   :  { %9084 = shalt.err (!%p9081_p0)
}
0x3561   :  { %s9085_s1 = scalar_lea.hbm %s10384_s7, 256 }
0x3562   :  { %p9086_p1 = scmp.ne.s32.totalorder %s10384_s7, %s9085_s1  ;;  %p9089_p2 = scmp.lt.u32.totalorder %s9085_s1, %s10384_s7 }
0x3564   :  { %p9091_p3 = pnand %p9089_p2, %p9086_p1 }
0x3566   :  { %9094 = shalt.err (!%p9091_p3)
}
0x3567   :  { %7301 = dma.vmem_to_hbm [thread:$0]  %s7296_s27, 256, %s10384_s7, [#allocation4], %s9103_s13, %s9103_s13, %s9104_s14  }
0x3568   :  { %9099 = dma.done.wait [#allocation4], 256  }
0x3569   :  { %9100 = vsyncadd [#allocation4], 4294967040 }
0x356a   :  { %7305 = vsyncpa [#allocation3], 1 }
0x356b   :  { %7306 = vsyncpa [#allocation6], 1 }
0x356c   :  { %7307 = vsyncpa [#allocation4], 1 }

</bundles_post_ra>
